<compile_context>
chip_gen: v6e
topology: v6e:2x2x1
jax: 0.10.0
libtpu: 0.0.40
codegen_flags: <defaults>
</compile_context>

<pallas_src>
import functools

import jax
import jax.numpy as jnp
from jax.experimental import pallas as pl
from jax.experimental.pallas import tpu as pltpu


def decoder_kernel(x_ref, h_ref,
                   wih0_ref, whh0_ref, bih0_ref, bhh0_ref,
                   wih1_ref, whh1_ref, bih1_ref, bhh1_ref,
                   wlin_ref, blin_ref,
                   y_ref, hout_ref,
                   h0_s, h1_s, h1_slab,
                   *, hidden_size):
    H = hidden_size
    Tt, Bt, I = x_ref.shape            # time block, batch tile, input size (static)
    t_idx = pl.program_id(1)           # time axis is the inner ("arbitrary") grid axis

    # Initialize the carried hidden state from the provided initial hidden at the
    # first time block of this batch tile; it persists in VMEM scratch afterwards.
    @pl.when(t_idx == 0)
    def _():
        h0_s[...] = h_ref[0]
        h1_s[...] = h_ref[1]

    # bf16 weights resident in VMEM; f32 biases.
    whh0 = whh0_ref[...]
    wih1 = wih1_ref[...]
    whh1 = whh1_ref[...]
    bhh0 = bhh0_ref[...]
    bih1 = bih1_ref[...]
    bhh1 = bhh1_ref[...]

    # --- Hoisted layer-0 input projection: one MXU matmul for the whole block. ---
    x_blk = x_ref[...].reshape(Tt * Bt, I)                        # bf16
    gi0_all = (jnp.dot(x_blk, wih0_ref[...],
                       preferred_element_type=jnp.float32)
               + bih0_ref[...]).reshape(Tt, Bt, 3 * H)

    h0 = h0_s[...]                                                # f32 carries
    h1 = h1_s[...]

    # Fully unrolled time loop (Tt small/static): static indices, good MXU/EUP overlap.
    for t in range(Tt):
        # Layer-1 recurrent half: depends only on previous-step h1, so it can overlap
        # layer-0's recurrent matmul in the scheduled unroll (off the critical path).
        gh1 = jnp.dot(h1.astype(jnp.bfloat16), whh1,
                      preferred_element_type=jnp.float32) + bhh1

        # Layer 0: only the recurrent matmul remains on the serial path.
        gi0 = gi0_all[t]
        gh0 = jnp.dot(h0.astype(jnp.bfloat16), whh0,
                      preferred_element_type=jnp.float32) + bhh0
        rz0 = jax.nn.sigmoid(gi0[:, :2 * H] + gh0[:, :2 * H])     # fused r,z sigmoid
        r0, z0 = rz0[:, :H], rz0[:, H:]
        n0 = jnp.tanh(gi0[:, 2 * H:] + r0 * gh0[:, 2 * H:])
        h0 = (1.0 - z0) * n0 + z0 * h0

        # Layer-1 input half (depends on this step's h0) — K=H matmul on the chain.
        gi1 = jnp.dot(h0.astype(jnp.bfloat16), wih1,
                      preferred_element_type=jnp.float32) + bih1
        rz1 = jax.nn.sigmoid(gi1[:, :2 * H] + gh1[:, :2 * H])     # fused r,z sigmoid
        r1, z1 = rz1[:, :H], rz1[:, H:]
        n1 = jnp.tanh(gi1[:, 2 * H:] + r1 * gh1[:, 2 * H:])
        h1 = (1.0 - z1) * n1 + z1 * h1

        # Stash h1 in the scratch slab (bounds vreg live ranges across the unroll).
        h1_slab[pl.ds(t * Bt, Bt), :] = h1

    # --- Hoisted output Linear: one big matmul + one contiguous block store. ---
    y_blk = (jnp.dot(h1_slab[...].astype(jnp.bfloat16), wlin_ref[...],
                     preferred_element_type=jnp.float32) + blin_ref[...])
    y_ref[...] = y_blk.reshape(Tt, Bt, I).astype(y_ref.dtype)

    # Carry hidden state to the next time block.
    h0_s[...] = h0
    h1_s[...] = h1

    # Only the final time block needs to write the returned hidden state.
    @pl.when(t_idx == pl.num_programs(1) - 1)
    def _():
        hout_ref[0] = h0.astype(hout_ref.dtype)
        hout_ref[1] = h1.astype(hout_ref.dtype)


def decoder_forward(x, hidden, params, *, t_block=8):
    """x: (T, B, I) f32, hidden: (2, B, H) f32 -> (y: (T, B, I), h: (2, B, H))."""
    T, B, I = x.shape
    L, _, H = hidden.shape
    assert L == 2

    # Pad batch to a sublane-tile multiple: 8 rows for a single tile, 16-row tiles
    # (bf16 sublane packing) once the batch spans more than one tile.
    Bp = ((max(B, 8) + 7) // 8) * 8
    if Bp > 8:
        Bp = ((Bp + 15) // 16) * 16
        btile = 16
    else:
        btile = 8
    n_bt = Bp // btile
    if Bp != B:
        x = jnp.pad(x, ((0, 0), (0, Bp - B), (0, 0)))
        hidden = jnp.pad(hidden, ((0, 0), (0, Bp - B), (0, 0)))

    # Time-block size that divides T (single grid step when T is small).
    tb = min(t_block, T)
    while T % tb:
        tb -= 1
    n_t = T // tb

    f32, bf16 = jnp.float32, jnp.bfloat16
    operands = (x.astype(bf16), hidden.astype(f32),
                params["wih0"].astype(bf16), params["whh0"].astype(bf16),
                params["bih0"].astype(f32), params["bhh0"].astype(f32),
                params["wih1"].astype(bf16), params["whh1"].astype(bf16),
                params["bih1"].astype(f32), params["bhh1"].astype(f32),
                params["wlin"].astype(bf16), params["blin"].astype(f32))

    flops = 2 * T * Bp * (3 * H * (I + 3 * H) + H * I)
    transcendentals = 6 * T * Bp * H
    bytes_accessed = int(2 * x.size + 4 * T * Bp * I + 4 * 2 * hidden.size
                         + sum(int(a.size) * a.dtype.itemsize for a in operands[2:]))

    def make_call(single_buffer_weights):
        def resident(a):  # full-array block, constant index map -> stays in VMEM
            nd = a.ndim
            index_map = lambda bt, t, _n=nd: (0,) * _n
            if single_buffer_weights:
                return pl.BlockSpec(a.shape, index_map,
                                    pipeline_mode=pl.Buffered(1))
            return pl.BlockSpec(a.shape, index_map)

        in_specs = ([pl.BlockSpec((tb, btile, I), lambda bt, t: (t, bt, 0)),
                     pl.BlockSpec((2, btile, H), lambda bt, t: (0, bt, 0))]
                    + [resident(a) for a in operands[2:]])

        return pl.pallas_call(
            functools.partial(decoder_kernel, hidden_size=H),
            grid=(n_bt, n_t),
            in_specs=in_specs,
            out_specs=(pl.BlockSpec((tb, btile, I), lambda bt, t: (t, bt, 0)),
                       pl.BlockSpec((2, btile, H), lambda bt, t: (0, bt, 0))),
            out_shape=(jax.ShapeDtypeStruct((T, Bp, I), f32),
                       jax.ShapeDtypeStruct((2, Bp, H), f32)),
            scratch_shapes=[pltpu.VMEM((btile, H), f32),        # carried h0
                            pltpu.VMEM((btile, H), f32),        # carried h1
                            pltpu.VMEM((tb * btile, H), f32)],  # per-block h1 slab
            compiler_params=pltpu.CompilerParams(
                # batch tiles are independent (megacore); time recurrence is serial
                dimension_semantics=("parallel", "arbitrary"),
                vmem_limit_bytes=48 * 1024 * 1024),
            cost_estimate=pl.CostEstimate(flops=flops,
                                          transcendentals=transcendentals,
                                          bytes_accessed=bytes_accessed),
        )

    try:
        y, hout = make_call(True)(*operands)
    except Exception:
        # pipeline_mode=pl.Buffered(1) unsupported on this jax build: fall back to the
        # default (double-buffered) allocation for the resident weights.
        y, hout = make_call(False)(*operands)

    return y[:, :B], hout[:, :B]


def init_params(key, input_size, hidden_size):
    """Parameters in pre-transposed layout (gate order r, z, n):
      wih0: (I, 3H), whh0: (H, 3H), wih1: (H, 3H), whh1: (H, 3H)
      biases: (1, 3H);  wlin: (H, I), blin: (1, I)
    """
    I, H = input_size, hidden_size
    bound = 1.0 / jnp.sqrt(H)
    keys = jax.random.split(key, 10)

    def u(k, shape):
        return jax.random.uniform(k, shape, jnp.float32, -bound, bound)

    return {
        "wih0": u(keys[0], (I, 3 * H)),
        "whh0": u(keys[1], (H, 3 * H)),
        "bih0": u(keys[2], (1, 3 * H)),
        "bhh0": u(keys[3], (1, 3 * H)),
        "wih1": u(keys[4], (H, 3 * H)),
        "whh1": u(keys[5], (H, 3 * H)),
        "bih1": u(keys[6], (1, 3 * H)),
        "bhh1": u(keys[7], (1, 3 * H)),
        "wlin": u(keys[8], (H, I)),
        "blin": u(keys[9], (1, I)),
    }


def _gru_cell_ref(x, h, w_ih, w_hh, b_ih, b_hh, H, matmul_dtype=jnp.float32):
    """PyTorch-semantics GRU cell (reference; matmul inputs cast to matmul_dtype)."""
    md = matmul_dtype
    gi = jnp.dot(x.astype(md), w_ih.astype(md),
                 preferred_element_type=jnp.float32) + b_ih
    gh = jnp.dot(h.astype(md), w_hh.astype(md),
                 preferred_element_type=jnp.float32) + b_hh
    r = jax.nn.sigmoid(gi[:, :H] + gh[:, :H])
    z = jax.nn.sigmoid(gi[:, H:2 * H] + gh[:, H:2 * H])
    n = jnp.tanh(gi[:, 2 * H:] + r * gh[:, 2 * H:])
    return (1.0 - z) * n + z * h


def decoder_reference(x, hidden, params, matmul_dtype=jnp.float32):
    """Pure-JAX reference (same math as torch 2-layer GRU + Linear)."""
    T = x.shape[0]
    H = hidden.shape[-1]
    md = matmul_dtype
    h0, h1 = hidden[0], hidden[1]
    ys = []
    for t in range(T):
        h0 = _gru_cell_ref(x[t], h0, params["wih0"], params["whh0"],
                           params["bih0"], params["bhh0"], H, md)
        h1 = _gru_cell_ref(h0, h1, params["wih1"], params["whh1"],
                           params["bih1"], params["bhh1"], H, md)
        ys.append(jnp.dot(h1.astype(md), params["wlin"].astype(md),
                          preferred_element_type=jnp.float32) + params["blin"])
    return jnp.stack(ys, axis=0), jnp.stack([h0, h1], axis=0)


if __name__ == "__main__":
    T, B, I, H = 8, 4, 16, 32  # seq, batch, input_size, hidden_size

    key = jax.random.PRNGKey(0)
    k_x, k_h, k_p = jax.random.split(key, 3)
    x = jax.random.normal(k_x, (T, B, I), jnp.float32)
    hidden = jax.random.normal(k_h, (2, B, H), jnp.float32)
    params = init_params(k_p, I, H)

    y, h_out = decoder_forward(x, hidden, params)
    y, h_out = jax.block_until_ready((y, h_out))
    assert y.shape == (T, B, I) and h_out.shape == (2, B, H)

    # Primary check: reference using the same bf16 matmul inputs (tight tolerance —
    # validates the kernel math, gate order and recurrence exactly).
    y_bf, h_bf = decoder_reference(x, hidden, params, matmul_dtype=jnp.bfloat16)
    assert jnp.allclose(y, y_bf, atol=2e-3, rtol=2e-3)
    assert jnp.allclose(h_out, h_bf, atol=2e-3, rtol=2e-3)

    # Sanity check against the exact f32 PyTorch-semantics math (loose tolerance only
    # accounts for the intentional bf16 weight/activation quantization).
    y_ref, h_ref = decoder_reference(x, hidden, params)
    assert jnp.allclose(y, y_ref, atol=1e-1, rtol=1e-1)
    assert jnp.allclose(h_out, h_ref, atol=1e-1, rtol=1e-1)

    print("KERNEL_OK")
</pallas_src>

<mosaic_0001>
module attributes {stable_mosaic.version = 11 : i64} {
  func.func @decoder_kernel(%arg0: i32, %arg1: i32, %arg2: memref<8x8x16xbf16, #tpu.memory_space<vmem>>, %arg3: memref<2x8x32xf32, #tpu.memory_space<vmem>>, %arg4: memref<16x96xbf16, #tpu.memory_space<vmem>>, %arg5: memref<32x96xbf16, #tpu.memory_space<vmem>>, %arg6: memref<1x96xf32, #tpu.memory_space<vmem>>, %arg7: memref<1x96xf32, #tpu.memory_space<vmem>>, %arg8: memref<32x96xbf16, #tpu.memory_space<vmem>>, %arg9: memref<32x96xbf16, #tpu.memory_space<vmem>>, %arg10: memref<1x96xf32, #tpu.memory_space<vmem>>, %arg11: memref<1x96xf32, #tpu.memory_space<vmem>>, %arg12: memref<32x16xbf16, #tpu.memory_space<vmem>>, %arg13: memref<1x16xf32, #tpu.memory_space<vmem>>, %arg14: memref<8x8x16xf32, #tpu.memory_space<vmem>>, %arg15: memref<2x8x32xf32, #tpu.memory_space<vmem>>, %arg16: memref<8x32xf32, #tpu.memory_space<vmem>>, %arg17: memref<8x32xf32, #tpu.memory_space<vmem>>, %arg18: memref<64x32xf32, #tpu.memory_space<vmem>>) attributes {dimension_semantics = [#tpu.dimension_semantics<parallel>, #tpu.dimension_semantics<arbitrary>], iteration_bounds = array<i64: 1, 1>, scalar_prefetch = 0 : i64, scratch_operands = 3 : i64, tpu.core_type = #tpu.core_type<tc>, window_params = [{transform_indices = @transform_0, window_bounds = array<i64: 8, 8, 16>}, {transform_indices = @transform_1, window_bounds = array<i64: 2, 8, 32>}, {pipeline_mode = #tpu.pipeline_mode<synchronous>, transform_indices = @transform_2, window_bounds = array<i64: 16, 96>}, {pipeline_mode = #tpu.pipeline_mode<synchronous>, transform_indices = @transform_3, window_bounds = array<i64: 32, 96>}, {pipeline_mode = #tpu.pipeline_mode<synchronous>, transform_indices = @transform_4, window_bounds = array<i64: 1, 96>}, {pipeline_mode = #tpu.pipeline_mode<synchronous>, transform_indices = @transform_5, window_bounds = array<i64: 1, 96>}, {pipeline_mode = #tpu.pipeline_mode<synchronous>, transform_indices = @transform_6, window_bounds = array<i64: 32, 96>}, {pipeline_mode = #tpu.pipeline_mode<synchronous>, transform_indices = @transform_7, window_bounds = array<i64: 32, 96>}, {pipeline_mode = #tpu.pipeline_mode<synchronous>, transform_indices = @transform_8, window_bounds = array<i64: 1, 96>}, {pipeline_mode = #tpu.pipeline_mode<synchronous>, transform_indices = @transform_9, window_bounds = array<i64: 1, 96>}, {pipeline_mode = #tpu.pipeline_mode<synchronous>, transform_indices = @transform_10, window_bounds = array<i64: 32, 16>}, {pipeline_mode = #tpu.pipeline_mode<synchronous>, transform_indices = @transform_11, window_bounds = array<i64: 1, 16>}, {transform_indices = @transform_12, window_bounds = array<i64: 8, 8, 16>}, {transform_indices = @transform_13, window_bounds = array<i64: 2, 8, 32>}]} {
    %c0_i32 = arith.constant 0 : i32
    %0 = arith.cmpi eq, %arg1, %c0_i32 : i32
    %1 = arith.extui %0 : i1 to i32
    %c0_i32_0 = arith.constant 0 : i32
    %2 = arith.cmpi ne, %1, %c0_i32_0 : i32
    scf.if %2 {
      %c0_104 = arith.constant 0 : index
      %c0_105 = arith.constant 0 : index
      %c0_106 = arith.constant 0 : index
      %473 = vector.load %arg3[%c0_104, %c0_105, %c0_106] : memref<2x8x32xf32, #tpu.memory_space<vmem>>, vector<1x8x32xf32>
      %474 = vector.shape_cast %473 : vector<1x8x32xf32> to vector<8x32xf32>
      %c0_107 = arith.constant 0 : index
      %c0_108 = arith.constant 0 : index
      %475 = vector.load %arg16[%c0_107, %c0_108] : memref<8x32xf32, #tpu.memory_space<vmem>>, vector<8x32xf32>
      tpu.vector_store %arg16[%c0_107, %c0_108], %474 {strides = array<i32>} : memref<8x32xf32, #tpu.memory_space<vmem>>, vector<8x32xf32>,
      %c1 = arith.constant 1 : index
      %c0_109 = arith.constant 0 : index
      %c0_110 = arith.constant 0 : index
      %476 = vector.load %arg3[%c1, %c0_109, %c0_110] : memref<2x8x32xf32, #tpu.memory_space<vmem>>, vector<1x8x32xf32>
      %477 = vector.shape_cast %476 : vector<1x8x32xf32> to vector<8x32xf32>
      %c0_111 = arith.constant 0 : index
      %c0_112 = arith.constant 0 : index
      %478 = vector.load %arg17[%c0_111, %c0_112] : memref<8x32xf32, #tpu.memory_space<vmem>>, vector<8x32xf32>
      tpu.vector_store %arg17[%c0_111, %c0_112], %477 {strides = array<i32>} : memref<8x32xf32, #tpu.memory_space<vmem>>, vector<8x32xf32>,
    } else {
    }
    %c0 = arith.constant 0 : index
    %c0_1 = arith.constant 0 : index
    %3 = vector.load %arg5[%c0, %c0_1] : memref<32x96xbf16, #tpu.memory_space<vmem>>, vector<32x96xbf16>
    %c0_2 = arith.constant 0 : index
    %c0_3 = arith.constant 0 : index
    %4 = vector.load %arg8[%c0_2, %c0_3] : memref<32x96xbf16, #tpu.memory_space<vmem>>, vector<32x96xbf16>
    %c0_4 = arith.constant 0 : index
    %c0_5 = arith.constant 0 : index
    %5 = vector.load %arg9[%c0_4, %c0_5] : memref<32x96xbf16, #tpu.memory_space<vmem>>, vector<32x96xbf16>
    %c0_6 = arith.constant 0 : index
    %c0_7 = arith.constant 0 : index
    %6 = vector.load %arg7[%c0_6, %c0_7] : memref<1x96xf32, #tpu.memory_space<vmem>>, vector<1x96xf32>
    %c0_8 = arith.constant 0 : index
    %c0_9 = arith.constant 0 : index
    %7 = vector.load %arg10[%c0_8, %c0_9] : memref<1x96xf32, #tpu.memory_space<vmem>>, vector<1x96xf32>
    %c0_10 = arith.constant 0 : index
    %c0_11 = arith.constant 0 : index
    %8 = vector.load %arg11[%c0_10, %c0_11] : memref<1x96xf32, #tpu.memory_space<vmem>>, vector<1x96xf32>
    %c0_12 = arith.constant 0 : index
    %c0_13 = arith.constant 0 : index
    %c0_14 = arith.constant 0 : index
    %9 = vector.load %arg2[%c0_12, %c0_13, %c0_14] : memref<8x8x16xbf16, #tpu.memory_space<vmem>>, vector<8x8x16xbf16>
    %10 = vector.shape_cast %9 : vector<8x8x16xbf16> to vector<64x16xbf16>
    %c0_15 = arith.constant 0 : index
    %c0_16 = arith.constant 0 : index
    %11 = vector.load %arg4[%c0_15, %c0_16] : memref<16x96xbf16, #tpu.memory_space<vmem>>, vector<16x96xbf16>
    %cst = arith.constant dense<0.000000e+00> : vector<64x96xf32>
    %12 = tpu.matmul %10, %11, %cst {dimension_numbers = #tpu.dot_dimension_numbers<[1], [0], [0], [1], [0, 0, 1, 1], [], []>} : vector<64x16xbf16>, vector<16x96xbf16>, vector<64x96xf32> -> vector<64x96xf32>
    %c0_17 = arith.constant 0 : index
    %c0_18 = arith.constant 0 : index
    %13 = vector.load %arg6[%c0_17, %c0_18] : memref<1x96xf32, #tpu.memory_space<vmem>>, vector<1x96xf32>
    %14 = vector.broadcast %13 : vector<1x96xf32> to vector<64x96xf32>
    %15 = arith.addf %12, %14 : vector<64x96xf32>
    %16 = vector.shape_cast %15 : vector<64x96xf32> to vector<8x8x96xf32>
    %c0_19 = arith.constant 0 : index
    %c0_20 = arith.constant 0 : index
    %17 = vector.load %arg16[%c0_19, %c0_20] : memref<8x32xf32, #tpu.memory_space<vmem>>, vector<8x32xf32>
    %c0_21 = arith.constant 0 : index
    %c0_22 = arith.constant 0 : index
    %18 = vector.load %arg17[%c0_21, %c0_22] : memref<8x32xf32, #tpu.memory_space<vmem>>, vector<8x32xf32>
    %19 = arith.truncf %18 : vector<8x32xf32> to vector<8x32xbf16>
    %cst_23 = arith.constant dense<0.000000e+00> : vector<8x96xf32>
    %20 = tpu.matmul %19, %5, %cst_23 {dimension_numbers = #tpu.dot_dimension_numbers<[1], [0], [0], [1], [0, 0, 1, 1], [], []>} : vector<8x32xbf16>, vector<32x96xbf16>, vector<8x96xf32> -> vector<8x96xf32>
    %21 = vector.broadcast %8 : vector<1x96xf32> to vector<8x96xf32>
    %22 = arith.addf %20, %21 : vector<8x96xf32>
    %23 = vector.extract_strided_slice %16 {offsets = [0, 0, 0], sizes = [1, 8, 96], strides = [1, 1, 1]} : vector<8x8x96xf32> to vector<1x8x96xf32>
    %24 = vector.shape_cast %23 : vector<1x8x96xf32> to vector<8x96xf32>
    %25 = arith.truncf %17 : vector<8x32xf32> to vector<8x32xbf16>
    %cst_24 = arith.constant dense<0.000000e+00> : vector<8x96xf32>
    %26 = tpu.matmul %25, %3, %cst_24 {dimension_numbers = #tpu.dot_dimension_numbers<[1], [0], [0], [1], [0, 0, 1, 1], [], []>} : vector<8x32xbf16>, vector<32x96xbf16>, vector<8x96xf32> -> vector<8x96xf32>
    %27 = vector.broadcast %6 : vector<1x96xf32> to vector<8x96xf32>
    %28 = arith.addf %26, %27 : vector<8x96xf32>
    %29 = vector.extract_strided_slice %24 {offsets = [0, 0], sizes = [8, 64], strides = [1, 1]} : vector<8x96xf32> to vector<8x64xf32>
    %30 = vector.extract_strided_slice %28 {offsets = [0, 0], sizes = [8, 64], strides = [1, 1]} : vector<8x96xf32> to vector<8x64xf32>
    %31 = arith.addf %29, %30 : vector<8x64xf32>
    %32 = arith.negf %31 : vector<8x64xf32>
    %33 = math.exp %32 : vector<8x64xf32>
    %cst_25 = arith.constant 1.000000e+00 : f32
    %34 = vector.broadcast %cst_25 : f32 to vector<8x64xf32>
    %35 = arith.addf %34, %33 : vector<8x64xf32>
    %36 = arith.divf %34, %35 : vector<8x64xf32>
    %37 = vector.extract_strided_slice %36 {offsets = [0, 0], sizes = [8, 32], strides = [1, 1]} : vector<8x64xf32> to vector<8x32xf32>
    %38 = vector.extract_strided_slice %36 {offsets = [0, 32], sizes = [8, 32], strides = [1, 1]} : vector<8x64xf32> to vector<8x32xf32>
    %39 = vector.extract_strided_slice %24 {offsets = [0, 64], sizes = [8, 32], strides = [1, 1]} : vector<8x96xf32> to vector<8x32xf32>
    %40 = vector.extract_strided_slice %28 {offsets = [0, 64], sizes = [8, 32], strides = [1, 1]} : vector<8x96xf32> to vector<8x32xf32>
    %41 = arith.mulf %37, %40 : vector<8x32xf32>
    %42 = arith.addf %39, %41 : vector<8x32xf32>
    %43 = math.tanh %42 : vector<8x32xf32>
    %cst_26 = arith.constant 1.000000e+00 : f32
    %44 = vector.broadcast %cst_26 : f32 to vector<8x32xf32>
    %45 = arith.subf %44, %38 : vector<8x32xf32>
    %46 = arith.mulf %45, %43 : vector<8x32xf32>
    %47 = arith.mulf %38, %17 : vector<8x32xf32>
    %48 = arith.addf %46, %47 : vector<8x32xf32>
    %49 = arith.truncf %48 : vector<8x32xf32> to vector<8x32xbf16>
    %cst_27 = arith.constant dense<0.000000e+00> : vector<8x96xf32>
    %50 = tpu.matmul %49, %4, %cst_27 {dimension_numbers = #tpu.dot_dimension_numbers<[1], [0], [0], [1], [0, 0, 1, 1], [], []>} : vector<8x32xbf16>, vector<32x96xbf16>, vector<8x96xf32> -> vector<8x96xf32>
    %51 = vector.broadcast %7 : vector<1x96xf32> to vector<8x96xf32>
    %52 = arith.addf %50, %51 : vector<8x96xf32>
    %53 = vector.extract_strided_slice %52 {offsets = [0, 0], sizes = [8, 64], strides = [1, 1]} : vector<8x96xf32> to vector<8x64xf32>
    %54 = vector.extract_strided_slice %22 {offsets = [0, 0], sizes = [8, 64], strides = [1, 1]} : vector<8x96xf32> to vector<8x64xf32>
    %55 = arith.addf %53, %54 : vector<8x64xf32>
    %56 = arith.negf %55 : vector<8x64xf32>
    %57 = math.exp %56 : vector<8x64xf32>
    %cst_28 = arith.constant 1.000000e+00 : f32
    %58 = vector.broadcast %cst_28 : f32 to vector<8x64xf32>
    %59 = arith.addf %58, %57 : vector<8x64xf32>
    %60 = arith.divf %58, %59 : vector<8x64xf32>
    %61 = vector.extract_strided_slice %60 {offsets = [0, 0], sizes = [8, 32], strides = [1, 1]} : vector<8x64xf32> to vector<8x32xf32>
    %62 = vector.extract_strided_slice %60 {offsets = [0, 32], sizes = [8, 32], strides = [1, 1]} : vector<8x64xf32> to vector<8x32xf32>
    %63 = vector.extract_strided_slice %52 {offsets = [0, 64], sizes = [8, 32], strides = [1, 1]} : vector<8x96xf32> to vector<8x32xf32>
    %64 = vector.extract_strided_slice %22 {offsets = [0, 64], sizes = [8, 32], strides = [1, 1]} : vector<8x96xf32> to vector<8x32xf32>
    %65 = arith.mulf %61, %64 : vector<8x32xf32>
    %66 = arith.addf %63, %65 : vector<8x32xf32>
    %67 = math.tanh %66 : vector<8x32xf32>
    %cst_29 = arith.constant 1.000000e+00 : f32
    %68 = vector.broadcast %cst_29 : f32 to vector<8x32xf32>
    %69 = arith.subf %68, %62 : vector<8x32xf32>
    %70 = arith.mulf %69, %67 : vector<8x32xf32>
    %71 = arith.mulf %62, %18 : vector<8x32xf32>
    %72 = arith.addf %70, %71 : vector<8x32xf32>
    %c0_30 = arith.constant 0 : index
    %c0_31 = arith.constant 0 : index
    %73 = vector.load %arg18[%c0_30, %c0_31] : memref<64x32xf32, #tpu.memory_space<vmem>>, vector<8x32xf32>
    tpu.vector_store %arg18[%c0_30, %c0_31], %72 {strides = array<i32>} : memref<64x32xf32, #tpu.memory_space<vmem>>, vector<8x32xf32>,
    %74 = arith.truncf %72 : vector<8x32xf32> to vector<8x32xbf16>
    %cst_32 = arith.constant dense<0.000000e+00> : vector<8x96xf32>
    %75 = tpu.matmul %74, %5, %cst_32 {dimension_numbers = #tpu.dot_dimension_numbers<[1], [0], [0], [1], [0, 0, 1, 1], [], []>} : vector<8x32xbf16>, vector<32x96xbf16>, vector<8x96xf32> -> vector<8x96xf32>
    %76 = vector.broadcast %8 : vector<1x96xf32> to vector<8x96xf32>
    %77 = arith.addf %75, %76 : vector<8x96xf32>
    %78 = vector.extract_strided_slice %16 {offsets = [1, 0, 0], sizes = [1, 8, 96], strides = [1, 1, 1]} : vector<8x8x96xf32> to vector<1x8x96xf32>
    %79 = vector.shape_cast %78 : vector<1x8x96xf32> to vector<8x96xf32>
    %80 = arith.truncf %48 : vector<8x32xf32> to vector<8x32xbf16>
    %cst_33 = arith.constant dense<0.000000e+00> : vector<8x96xf32>
    %81 = tpu.matmul %80, %3, %cst_33 {dimension_numbers = #tpu.dot_dimension_numbers<[1], [0], [0], [1], [0, 0, 1, 1], [], []>} : vector<8x32xbf16>, vector<32x96xbf16>, vector<8x96xf32> -> vector<8x96xf32>
    %82 = vector.broadcast %6 : vector<1x96xf32> to vector<8x96xf32>
    %83 = arith.addf %81, %82 : vector<8x96xf32>
    %84 = vector.extract_strided_slice %79 {offsets = [0, 0], sizes = [8, 64], strides = [1, 1]} : vector<8x96xf32> to vector<8x64xf32>
    %85 = vector.extract_strided_slice %83 {offsets = [0, 0], sizes = [8, 64], strides = [1, 1]} : vector<8x96xf32> to vector<8x64xf32>
    %86 = arith.addf %84, %85 : vector<8x64xf32>
    %87 = arith.negf %86 : vector<8x64xf32>
    %88 = math.exp %87 : vector<8x64xf32>
    %cst_34 = arith.constant 1.000000e+00 : f32
    %89 = vector.broadcast %cst_34 : f32 to vector<8x64xf32>
    %90 = arith.addf %89, %88 : vector<8x64xf32>
    %91 = arith.divf %89, %90 : vector<8x64xf32>
    %92 = vector.extract_strided_slice %91 {offsets = [0, 0], sizes = [8, 32], strides = [1, 1]} : vector<8x64xf32> to vector<8x32xf32>
    %93 = vector.extract_strided_slice %91 {offsets = [0, 32], sizes = [8, 32], strides = [1, 1]} : vector<8x64xf32> to vector<8x32xf32>
    %94 = vector.extract_strided_slice %79 {offsets = [0, 64], sizes = [8, 32], strides = [1, 1]} : vector<8x96xf32> to vector<8x32xf32>
    %95 = vector.extract_strided_slice %83 {offsets = [0, 64], sizes = [8, 32], strides = [1, 1]} : vector<8x96xf32> to vector<8x32xf32>
    %96 = arith.mulf %92, %95 : vector<8x32xf32>
    %97 = arith.addf %94, %96 : vector<8x32xf32>
    %98 = math.tanh %97 : vector<8x32xf32>
    %cst_35 = arith.constant 1.000000e+00 : f32
    %99 = vector.broadcast %cst_35 : f32 to vector<8x32xf32>
    %100 = arith.subf %99, %93 : vector<8x32xf32>
    %101 = arith.mulf %100, %98 : vector<8x32xf32>
    %102 = arith.mulf %93, %48 : vector<8x32xf32>
    %103 = arith.addf %101, %102 : vector<8x32xf32>
    %104 = arith.truncf %103 : vector<8x32xf32> to vector<8x32xbf16>
    %cst_36 = arith.constant dense<0.000000e+00> : vector<8x96xf32>
    %105 = tpu.matmul %104, %4, %cst_36 {dimension_numbers = #tpu.dot_dimension_numbers<[1], [0], [0], [1], [0, 0, 1, 1], [], []>} : vector<8x32xbf16>, vector<32x96xbf16>, vector<8x96xf32> -> vector<8x96xf32>
    %106 = vector.broadcast %7 : vector<1x96xf32> to vector<8x96xf32>
    %107 = arith.addf %105, %106 : vector<8x96xf32>
    %108 = vector.extract_strided_slice %107 {offsets = [0, 0], sizes = [8, 64], strides = [1, 1]} : vector<8x96xf32> to vector<8x64xf32>
    %109 = vector.extract_strided_slice %77 {offsets = [0, 0], sizes = [8, 64], strides = [1, 1]} : vector<8x96xf32> to vector<8x64xf32>
    %110 = arith.addf %108, %109 : vector<8x64xf32>
    %111 = arith.negf %110 : vector<8x64xf32>
    %112 = math.exp %111 : vector<8x64xf32>
    %cst_37 = arith.constant 1.000000e+00 : f32
    %113 = vector.broadcast %cst_37 : f32 to vector<8x64xf32>
    %114 = arith.addf %113, %112 : vector<8x64xf32>
    %115 = arith.divf %113, %114 : vector<8x64xf32>
    %116 = vector.extract_strided_slice %115 {offsets = [0, 0], sizes = [8, 32], strides = [1, 1]} : vector<8x64xf32> to vector<8x32xf32>
    %117 = vector.extract_strided_slice %115 {offsets = [0, 32], sizes = [8, 32], strides = [1, 1]} : vector<8x64xf32> to vector<8x32xf32>
    %118 = vector.extract_strided_slice %107 {offsets = [0, 64], sizes = [8, 32], strides = [1, 1]} : vector<8x96xf32> to vector<8x32xf32>
    %119 = vector.extract_strided_slice %77 {offsets = [0, 64], sizes = [8, 32], strides = [1, 1]} : vector<8x96xf32> to vector<8x32xf32>
    %120 = arith.mulf %116, %119 : vector<8x32xf32>
    %121 = arith.addf %118, %120 : vector<8x32xf32>
    %122 = math.tanh %121 : vector<8x32xf32>
    %cst_38 = arith.constant 1.000000e+00 : f32
    %123 = vector.broadcast %cst_38 : f32 to vector<8x32xf32>
    %124 = arith.subf %123, %117 : vector<8x32xf32>
    %125 = arith.mulf %124, %122 : vector<8x32xf32>
    %126 = arith.mulf %117, %72 : vector<8x32xf32>
    %127 = arith.addf %125, %126 : vector<8x32xf32>
    %c8 = arith.constant 8 : index
    %c0_39 = arith.constant 0 : index
    %128 = vector.load %arg18[%c8, %c0_39] : memref<64x32xf32, #tpu.memory_space<vmem>>, vector<8x32xf32>
    tpu.vector_store %arg18[%c8, %c0_39], %127 {strides = array<i32>} : memref<64x32xf32, #tpu.memory_space<vmem>>, vector<8x32xf32>,
    %129 = arith.truncf %127 : vector<8x32xf32> to vector<8x32xbf16>
    %cst_40 = arith.constant dense<0.000000e+00> : vector<8x96xf32>
    %130 = tpu.matmul %129, %5, %cst_40 {dimension_numbers = #tpu.dot_dimension_numbers<[1], [0], [0], [1], [0, 0, 1, 1], [], []>} : vector<8x32xbf16>, vector<32x96xbf16>, vector<8x96xf32> -> vector<8x96xf32>
    %131 = vector.broadcast %8 : vector<1x96xf32> to vector<8x96xf32>
    %132 = arith.addf %130, %131 : vector<8x96xf32>
    %133 = vector.extract_strided_slice %16 {offsets = [2, 0, 0], sizes = [1, 8, 96], strides = [1, 1, 1]} : vector<8x8x96xf32> to vector<1x8x96xf32>
    %134 = vector.shape_cast %133 : vector<1x8x96xf32> to vector<8x96xf32>
    %135 = arith.truncf %103 : vector<8x32xf32> to vector<8x32xbf16>
    %cst_41 = arith.constant dense<0.000000e+00> : vector<8x96xf32>
    %136 = tpu.matmul %135, %3, %cst_41 {dimension_numbers = #tpu.dot_dimension_numbers<[1], [0], [0], [1], [0, 0, 1, 1], [], []>} : vector<8x32xbf16>, vector<32x96xbf16>, vector<8x96xf32> -> vector<8x96xf32>
    %137 = vector.broadcast %6 : vector<1x96xf32> to vector<8x96xf32>
    %138 = arith.addf %136, %137 : vector<8x96xf32>
    %139 = vector.extract_strided_slice %134 {offsets = [0, 0], sizes = [8, 64], strides = [1, 1]} : vector<8x96xf32> to vector<8x64xf32>
    %140 = vector.extract_strided_slice %138 {offsets = [0, 0], sizes = [8, 64], strides = [1, 1]} : vector<8x96xf32> to vector<8x64xf32>
    %141 = arith.addf %139, %140 : vector<8x64xf32>
    %142 = arith.negf %141 : vector<8x64xf32>
    %143 = math.exp %142 : vector<8x64xf32>
    %cst_42 = arith.constant 1.000000e+00 : f32
    %144 = vector.broadcast %cst_42 : f32 to vector<8x64xf32>
    %145 = arith.addf %144, %143 : vector<8x64xf32>
    %146 = arith.divf %144, %145 : vector<8x64xf32>
    %147 = vector.extract_strided_slice %146 {offsets = [0, 0], sizes = [8, 32], strides = [1, 1]} : vector<8x64xf32> to vector<8x32xf32>
    %148 = vector.extract_strided_slice %146 {offsets = [0, 32], sizes = [8, 32], strides = [1, 1]} : vector<8x64xf32> to vector<8x32xf32>
    %149 = vector.extract_strided_slice %134 {offsets = [0, 64], sizes = [8, 32], strides = [1, 1]} : vector<8x96xf32> to vector<8x32xf32>
    %150 = vector.extract_strided_slice %138 {offsets = [0, 64], sizes = [8, 32], strides = [1, 1]} : vector<8x96xf32> to vector<8x32xf32>
    %151 = arith.mulf %147, %150 : vector<8x32xf32>
    %152 = arith.addf %149, %151 : vector<8x32xf32>
    %153 = math.tanh %152 : vector<8x32xf32>
    %cst_43 = arith.constant 1.000000e+00 : f32
    %154 = vector.broadcast %cst_43 : f32 to vector<8x32xf32>
    %155 = arith.subf %154, %148 : vector<8x32xf32>
    %156 = arith.mulf %155, %153 : vector<8x32xf32>
    %157 = arith.mulf %148, %103 : vector<8x32xf32>
    %158 = arith.addf %156, %157 : vector<8x32xf32>
    %159 = arith.truncf %158 : vector<8x32xf32> to vector<8x32xbf16>
    %cst_44 = arith.constant dense<0.000000e+00> : vector<8x96xf32>
    %160 = tpu.matmul %159, %4, %cst_44 {dimension_numbers = #tpu.dot_dimension_numbers<[1], [0], [0], [1], [0, 0, 1, 1], [], []>} : vector<8x32xbf16>, vector<32x96xbf16>, vector<8x96xf32> -> vector<8x96xf32>
    %161 = vector.broadcast %7 : vector<1x96xf32> to vector<8x96xf32>
    %162 = arith.addf %160, %161 : vector<8x96xf32>
    %163 = vector.extract_strided_slice %162 {offsets = [0, 0], sizes = [8, 64], strides = [1, 1]} : vector<8x96xf32> to vector<8x64xf32>
    %164 = vector.extract_strided_slice %132 {offsets = [0, 0], sizes = [8, 64], strides = [1, 1]} : vector<8x96xf32> to vector<8x64xf32>
    %165 = arith.addf %163, %164 : vector<8x64xf32>
    %166 = arith.negf %165 : vector<8x64xf32>
    %167 = math.exp %166 : vector<8x64xf32>
    %cst_45 = arith.constant 1.000000e+00 : f32
    %168 = vector.broadcast %cst_45 : f32 to vector<8x64xf32>
    %169 = arith.addf %168, %167 : vector<8x64xf32>
    %170 = arith.divf %168, %169 : vector<8x64xf32>
    %171 = vector.extract_strided_slice %170 {offsets = [0, 0], sizes = [8, 32], strides = [1, 1]} : vector<8x64xf32> to vector<8x32xf32>
    %172 = vector.extract_strided_slice %170 {offsets = [0, 32], sizes = [8, 32], strides = [1, 1]} : vector<8x64xf32> to vector<8x32xf32>
    %173 = vector.extract_strided_slice %162 {offsets = [0, 64], sizes = [8, 32], strides = [1, 1]} : vector<8x96xf32> to vector<8x32xf32>
    %174 = vector.extract_strided_slice %132 {offsets = [0, 64], sizes = [8, 32], strides = [1, 1]} : vector<8x96xf32> to vector<8x32xf32>
    %175 = arith.mulf %171, %174 : vector<8x32xf32>
    %176 = arith.addf %173, %175 : vector<8x32xf32>
    %177 = math.tanh %176 : vector<8x32xf32>
    %cst_46 = arith.constant 1.000000e+00 : f32
    %178 = vector.broadcast %cst_46 : f32 to vector<8x32xf32>
    %179 = arith.subf %178, %172 : vector<8x32xf32>
    %180 = arith.mulf %179, %177 : vector<8x32xf32>
    %181 = arith.mulf %172, %127 : vector<8x32xf32>
    %182 = arith.addf %180, %181 : vector<8x32xf32>
    %c16 = arith.constant 16 : index
    %c0_47 = arith.constant 0 : index
    %183 = vector.load %arg18[%c16, %c0_47] : memref<64x32xf32, #tpu.memory_space<vmem>>, vector<8x32xf32>
    tpu.vector_store %arg18[%c16, %c0_47], %182 {strides = array<i32>} : memref<64x32xf32, #tpu.memory_space<vmem>>, vector<8x32xf32>,
    %184 = arith.truncf %182 : vector<8x32xf32> to vector<8x32xbf16>
    %cst_48 = arith.constant dense<0.000000e+00> : vector<8x96xf32>
    %185 = tpu.matmul %184, %5, %cst_48 {dimension_numbers = #tpu.dot_dimension_numbers<[1], [0], [0], [1], [0, 0, 1, 1], [], []>} : vector<8x32xbf16>, vector<32x96xbf16>, vector<8x96xf32> -> vector<8x96xf32>
    %186 = vector.broadcast %8 : vector<1x96xf32> to vector<8x96xf32>
    %187 = arith.addf %185, %186 : vector<8x96xf32>
    %188 = vector.extract_strided_slice %16 {offsets = [3, 0, 0], sizes = [1, 8, 96], strides = [1, 1, 1]} : vector<8x8x96xf32> to vector<1x8x96xf32>
    %189 = vector.shape_cast %188 : vector<1x8x96xf32> to vector<8x96xf32>
    %190 = arith.truncf %158 : vector<8x32xf32> to vector<8x32xbf16>
    %cst_49 = arith.constant dense<0.000000e+00> : vector<8x96xf32>
    %191 = tpu.matmul %190, %3, %cst_49 {dimension_numbers = #tpu.dot_dimension_numbers<[1], [0], [0], [1], [0, 0, 1, 1], [], []>} : vector<8x32xbf16>, vector<32x96xbf16>, vector<8x96xf32> -> vector<8x96xf32>
    %192 = vector.broadcast %6 : vector<1x96xf32> to vector<8x96xf32>
    %193 = arith.addf %191, %192 : vector<8x96xf32>
    %194 = vector.extract_strided_slice %189 {offsets = [0, 0], sizes = [8, 64], strides = [1, 1]} : vector<8x96xf32> to vector<8x64xf32>
    %195 = vector.extract_strided_slice %193 {offsets = [0, 0], sizes = [8, 64], strides = [1, 1]} : vector<8x96xf32> to vector<8x64xf32>
    %196 = arith.addf %194, %195 : vector<8x64xf32>
    %197 = arith.negf %196 : vector<8x64xf32>
    %198 = math.exp %197 : vector<8x64xf32>
    %cst_50 = arith.constant 1.000000e+00 : f32
    %199 = vector.broadcast %cst_50 : f32 to vector<8x64xf32>
    %200 = arith.addf %199, %198 : vector<8x64xf32>
    %201 = arith.divf %199, %200 : vector<8x64xf32>
    %202 = vector.extract_strided_slice %201 {offsets = [0, 0], sizes = [8, 32], strides = [1, 1]} : vector<8x64xf32> to vector<8x32xf32>
    %203 = vector.extract_strided_slice %201 {offsets = [0, 32], sizes = [8, 32], strides = [1, 1]} : vector<8x64xf32> to vector<8x32xf32>
    %204 = vector.extract_strided_slice %189 {offsets = [0, 64], sizes = [8, 32], strides = [1, 1]} : vector<8x96xf32> to vector<8x32xf32>
    %205 = vector.extract_strided_slice %193 {offsets = [0, 64], sizes = [8, 32], strides = [1, 1]} : vector<8x96xf32> to vector<8x32xf32>
    %206 = arith.mulf %202, %205 : vector<8x32xf32>
    %207 = arith.addf %204, %206 : vector<8x32xf32>
    %208 = math.tanh %207 : vector<8x32xf32>
    %cst_51 = arith.constant 1.000000e+00 : f32
    %209 = vector.broadcast %cst_51 : f32 to vector<8x32xf32>
    %210 = arith.subf %209, %203 : vector<8x32xf32>
    %211 = arith.mulf %210, %208 : vector<8x32xf32>
    %212 = arith.mulf %203, %158 : vector<8x32xf32>
    %213 = arith.addf %211, %212 : vector<8x32xf32>
    %214 = arith.truncf %213 : vector<8x32xf32> to vector<8x32xbf16>
    %cst_52 = arith.constant dense<0.000000e+00> : vector<8x96xf32>
    %215 = tpu.matmul %214, %4, %cst_52 {dimension_numbers = #tpu.dot_dimension_numbers<[1], [0], [0], [1], [0, 0, 1, 1], [], []>} : vector<8x32xbf16>, vector<32x96xbf16>, vector<8x96xf32> -> vector<8x96xf32>
    %216 = vector.broadcast %7 : vector<1x96xf32> to vector<8x96xf32>
    %217 = arith.addf %215, %216 : vector<8x96xf32>
    %218 = vector.extract_strided_slice %217 {offsets = [0, 0], sizes = [8, 64], strides = [1, 1]} : vector<8x96xf32> to vector<8x64xf32>
    %219 = vector.extract_strided_slice %187 {offsets = [0, 0], sizes = [8, 64], strides = [1, 1]} : vector<8x96xf32> to vector<8x64xf32>
    %220 = arith.addf %218, %219 : vector<8x64xf32>
    %221 = arith.negf %220 : vector<8x64xf32>
    %222 = math.exp %221 : vector<8x64xf32>
    %cst_53 = arith.constant 1.000000e+00 : f32
    %223 = vector.broadcast %cst_53 : f32 to vector<8x64xf32>
    %224 = arith.addf %223, %222 : vector<8x64xf32>
    %225 = arith.divf %223, %224 : vector<8x64xf32>
    %226 = vector.extract_strided_slice %225 {offsets = [0, 0], sizes = [8, 32], strides = [1, 1]} : vector<8x64xf32> to vector<8x32xf32>
    %227 = vector.extract_strided_slice %225 {offsets = [0, 32], sizes = [8, 32], strides = [1, 1]} : vector<8x64xf32> to vector<8x32xf32>
    %228 = vector.extract_strided_slice %217 {offsets = [0, 64], sizes = [8, 32], strides = [1, 1]} : vector<8x96xf32> to vector<8x32xf32>
    %229 = vector.extract_strided_slice %187 {offsets = [0, 64], sizes = [8, 32], strides = [1, 1]} : vector<8x96xf32> to vector<8x32xf32>
    %230 = arith.mulf %226, %229 : vector<8x32xf32>
    %231 = arith.addf %228, %230 : vector<8x32xf32>
    %232 = math.tanh %231 : vector<8x32xf32>
    %cst_54 = arith.constant 1.000000e+00 : f32
    %233 = vector.broadcast %cst_54 : f32 to vector<8x32xf32>
    %234 = arith.subf %233, %227 : vector<8x32xf32>
    %235 = arith.mulf %234, %232 : vector<8x32xf32>
    %236 = arith.mulf %227, %182 : vector<8x32xf32>
    %237 = arith.addf %235, %236 : vector<8x32xf32>
    %c24 = arith.constant 24 : index
    %c0_55 = arith.constant 0 : index
    %238 = vector.load %arg18[%c24, %c0_55] : memref<64x32xf32, #tpu.memory_space<vmem>>, vector<8x32xf32>
    tpu.vector_store %arg18[%c24, %c0_55], %237 {strides = array<i32>} : memref<64x32xf32, #tpu.memory_space<vmem>>, vector<8x32xf32>,
    %239 = arith.truncf %237 : vector<8x32xf32> to vector<8x32xbf16>
    %cst_56 = arith.constant dense<0.000000e+00> : vector<8x96xf32>
    %240 = tpu.matmul %239, %5, %cst_56 {dimension_numbers = #tpu.dot_dimension_numbers<[1], [0], [0], [1], [0, 0, 1, 1], [], []>} : vector<8x32xbf16>, vector<32x96xbf16>, vector<8x96xf32> -> vector<8x96xf32>
    %241 = vector.broadcast %8 : vector<1x96xf32> to vector<8x96xf32>
    %242 = arith.addf %240, %241 : vector<8x96xf32>
    %243 = vector.extract_strided_slice %16 {offsets = [4, 0, 0], sizes = [1, 8, 96], strides = [1, 1, 1]} : vector<8x8x96xf32> to vector<1x8x96xf32>
    %244 = vector.shape_cast %243 : vector<1x8x96xf32> to vector<8x96xf32>
    %245 = arith.truncf %213 : vector<8x32xf32> to vector<8x32xbf16>
    %cst_57 = arith.constant dense<0.000000e+00> : vector<8x96xf32>
    %246 = tpu.matmul %245, %3, %cst_57 {dimension_numbers = #tpu.dot_dimension_numbers<[1], [0], [0], [1], [0, 0, 1, 1], [], []>} : vector<8x32xbf16>, vector<32x96xbf16>, vector<8x96xf32> -> vector<8x96xf32>
    %247 = vector.broadcast %6 : vector<1x96xf32> to vector<8x96xf32>
    %248 = arith.addf %246, %247 : vector<8x96xf32>
    %249 = vector.extract_strided_slice %244 {offsets = [0, 0], sizes = [8, 64], strides = [1, 1]} : vector<8x96xf32> to vector<8x64xf32>
    %250 = vector.extract_strided_slice %248 {offsets = [0, 0], sizes = [8, 64], strides = [1, 1]} : vector<8x96xf32> to vector<8x64xf32>
    %251 = arith.addf %249, %250 : vector<8x64xf32>
    %252 = arith.negf %251 : vector<8x64xf32>
    %253 = math.exp %252 : vector<8x64xf32>
    %cst_58 = arith.constant 1.000000e+00 : f32
    %254 = vector.broadcast %cst_58 : f32 to vector<8x64xf32>
    %255 = arith.addf %254, %253 : vector<8x64xf32>
    %256 = arith.divf %254, %255 : vector<8x64xf32>
    %257 = vector.extract_strided_slice %256 {offsets = [0, 0], sizes = [8, 32], strides = [1, 1]} : vector<8x64xf32> to vector<8x32xf32>
    %258 = vector.extract_strided_slice %256 {offsets = [0, 32], sizes = [8, 32], strides = [1, 1]} : vector<8x64xf32> to vector<8x32xf32>
    %259 = vector.extract_strided_slice %244 {offsets = [0, 64], sizes = [8, 32], strides = [1, 1]} : vector<8x96xf32> to vector<8x32xf32>
    %260 = vector.extract_strided_slice %248 {offsets = [0, 64], sizes = [8, 32], strides = [1, 1]} : vector<8x96xf32> to vector<8x32xf32>
    %261 = arith.mulf %257, %260 : vector<8x32xf32>
    %262 = arith.addf %259, %261 : vector<8x32xf32>
    %263 = math.tanh %262 : vector<8x32xf32>
    %cst_59 = arith.constant 1.000000e+00 : f32
    %264 = vector.broadcast %cst_59 : f32 to vector<8x32xf32>
    %265 = arith.subf %264, %258 : vector<8x32xf32>
    %266 = arith.mulf %265, %263 : vector<8x32xf32>
    %267 = arith.mulf %258, %213 : vector<8x32xf32>
    %268 = arith.addf %266, %267 : vector<8x32xf32>
    %269 = arith.truncf %268 : vector<8x32xf32> to vector<8x32xbf16>
    %cst_60 = arith.constant dense<0.000000e+00> : vector<8x96xf32>
    %270 = tpu.matmul %269, %4, %cst_60 {dimension_numbers = #tpu.dot_dimension_numbers<[1], [0], [0], [1], [0, 0, 1, 1], [], []>} : vector<8x32xbf16>, vector<32x96xbf16>, vector<8x96xf32> -> vector<8x96xf32>
    %271 = vector.broadcast %7 : vector<1x96xf32> to vector<8x96xf32>
    %272 = arith.addf %270, %271 : vector<8x96xf32>
    %273 = vector.extract_strided_slice %272 {offsets = [0, 0], sizes = [8, 64], strides = [1, 1]} : vector<8x96xf32> to vector<8x64xf32>
    %274 = vector.extract_strided_slice %242 {offsets = [0, 0], sizes = [8, 64], strides = [1, 1]} : vector<8x96xf32> to vector<8x64xf32>
    %275 = arith.addf %273, %274 : vector<8x64xf32>
    %276 = arith.negf %275 : vector<8x64xf32>
    %277 = math.exp %276 : vector<8x64xf32>
    %cst_61 = arith.constant 1.000000e+00 : f32
    %278 = vector.broadcast %cst_61 : f32 to vector<8x64xf32>
    %279 = arith.addf %278, %277 : vector<8x64xf32>
    %280 = arith.divf %278, %279 : vector<8x64xf32>
    %281 = vector.extract_strided_slice %280 {offsets = [0, 0], sizes = [8, 32], strides = [1, 1]} : vector<8x64xf32> to vector<8x32xf32>
    %282 = vector.extract_strided_slice %280 {offsets = [0, 32], sizes = [8, 32], strides = [1, 1]} : vector<8x64xf32> to vector<8x32xf32>
    %283 = vector.extract_strided_slice %272 {offsets = [0, 64], sizes = [8, 32], strides = [1, 1]} : vector<8x96xf32> to vector<8x32xf32>
    %284 = vector.extract_strided_slice %242 {offsets = [0, 64], sizes = [8, 32], strides = [1, 1]} : vector<8x96xf32> to vector<8x32xf32>
    %285 = arith.mulf %281, %284 : vector<8x32xf32>
    %286 = arith.addf %283, %285 : vector<8x32xf32>
    %287 = math.tanh %286 : vector<8x32xf32>
    %cst_62 = arith.constant 1.000000e+00 : f32
    %288 = vector.broadcast %cst_62 : f32 to vector<8x32xf32>
    %289 = arith.subf %288, %282 : vector<8x32xf32>
    %290 = arith.mulf %289, %287 : vector<8x32xf32>
    %291 = arith.mulf %282, %237 : vector<8x32xf32>
    %292 = arith.addf %290, %291 : vector<8x32xf32>
    %c32 = arith.constant 32 : index
    %c0_63 = arith.constant 0 : index
    %293 = vector.load %arg18[%c32, %c0_63] : memref<64x32xf32, #tpu.memory_space<vmem>>, vector<8x32xf32>
    tpu.vector_store %arg18[%c32, %c0_63], %292 {strides = array<i32>} : memref<64x32xf32, #tpu.memory_space<vmem>>, vector<8x32xf32>,
    %294 = arith.truncf %292 : vector<8x32xf32> to vector<8x32xbf16>
    %cst_64 = arith.constant dense<0.000000e+00> : vector<8x96xf32>
    %295 = tpu.matmul %294, %5, %cst_64 {dimension_numbers = #tpu.dot_dimension_numbers<[1], [0], [0], [1], [0, 0, 1, 1], [], []>} : vector<8x32xbf16>, vector<32x96xbf16>, vector<8x96xf32> -> vector<8x96xf32>
    %296 = vector.broadcast %8 : vector<1x96xf32> to vector<8x96xf32>
    %297 = arith.addf %295, %296 : vector<8x96xf32>
    %298 = vector.extract_strided_slice %16 {offsets = [5, 0, 0], sizes = [1, 8, 96], strides = [1, 1, 1]} : vector<8x8x96xf32> to vector<1x8x96xf32>
    %299 = vector.shape_cast %298 : vector<1x8x96xf32> to vector<8x96xf32>
    %300 = arith.truncf %268 : vector<8x32xf32> to vector<8x32xbf16>
    %cst_65 = arith.constant dense<0.000000e+00> : vector<8x96xf32>
    %301 = tpu.matmul %300, %3, %cst_65 {dimension_numbers = #tpu.dot_dimension_numbers<[1], [0], [0], [1], [0, 0, 1, 1], [], []>} : vector<8x32xbf16>, vector<32x96xbf16>, vector<8x96xf32> -> vector<8x96xf32>
    %302 = vector.broadcast %6 : vector<1x96xf32> to vector<8x96xf32>
    %303 = arith.addf %301, %302 : vector<8x96xf32>
    %304 = vector.extract_strided_slice %299 {offsets = [0, 0], sizes = [8, 64], strides = [1, 1]} : vector<8x96xf32> to vector<8x64xf32>
    %305 = vector.extract_strided_slice %303 {offsets = [0, 0], sizes = [8, 64], strides = [1, 1]} : vector<8x96xf32> to vector<8x64xf32>
    %306 = arith.addf %304, %305 : vector<8x64xf32>
    %307 = arith.negf %306 : vector<8x64xf32>
    %308 = math.exp %307 : vector<8x64xf32>
    %cst_66 = arith.constant 1.000000e+00 : f32
    %309 = vector.broadcast %cst_66 : f32 to vector<8x64xf32>
    %310 = arith.addf %309, %308 : vector<8x64xf32>
    %311 = arith.divf %309, %310 : vector<8x64xf32>
    %312 = vector.extract_strided_slice %311 {offsets = [0, 0], sizes = [8, 32], strides = [1, 1]} : vector<8x64xf32> to vector<8x32xf32>
    %313 = vector.extract_strided_slice %311 {offsets = [0, 32], sizes = [8, 32], strides = [1, 1]} : vector<8x64xf32> to vector<8x32xf32>
    %314 = vector.extract_strided_slice %299 {offsets = [0, 64], sizes = [8, 32], strides = [1, 1]} : vector<8x96xf32> to vector<8x32xf32>
    %315 = vector.extract_strided_slice %303 {offsets = [0, 64], sizes = [8, 32], strides = [1, 1]} : vector<8x96xf32> to vector<8x32xf32>
    %316 = arith.mulf %312, %315 : vector<8x32xf32>
    %317 = arith.addf %314, %316 : vector<8x32xf32>
    %318 = math.tanh %317 : vector<8x32xf32>
    %cst_67 = arith.constant 1.000000e+00 : f32
    %319 = vector.broadcast %cst_67 : f32 to vector<8x32xf32>
    %320 = arith.subf %319, %313 : vector<8x32xf32>
    %321 = arith.mulf %320, %318 : vector<8x32xf32>
    %322 = arith.mulf %313, %268 : vector<8x32xf32>
    %323 = arith.addf %321, %322 : vector<8x32xf32>
    %324 = arith.truncf %323 : vector<8x32xf32> to vector<8x32xbf16>
    %cst_68 = arith.constant dense<0.000000e+00> : vector<8x96xf32>
    %325 = tpu.matmul %324, %4, %cst_68 {dimension_numbers = #tpu.dot_dimension_numbers<[1], [0], [0], [1], [0, 0, 1, 1], [], []>} : vector<8x32xbf16>, vector<32x96xbf16>, vector<8x96xf32> -> vector<8x96xf32>
    %326 = vector.broadcast %7 : vector<1x96xf32> to vector<8x96xf32>
    %327 = arith.addf %325, %326 : vector<8x96xf32>
    %328 = vector.extract_strided_slice %327 {offsets = [0, 0], sizes = [8, 64], strides = [1, 1]} : vector<8x96xf32> to vector<8x64xf32>
    %329 = vector.extract_strided_slice %297 {offsets = [0, 0], sizes = [8, 64], strides = [1, 1]} : vector<8x96xf32> to vector<8x64xf32>
    %330 = arith.addf %328, %329 : vector<8x64xf32>
    %331 = arith.negf %330 : vector<8x64xf32>
    %332 = math.exp %331 : vector<8x64xf32>
    %cst_69 = arith.constant 1.000000e+00 : f32
    %333 = vector.broadcast %cst_69 : f32 to vector<8x64xf32>
    %334 = arith.addf %333, %332 : vector<8x64xf32>
    %335 = arith.divf %333, %334 : vector<8x64xf32>
    %336 = vector.extract_strided_slice %335 {offsets = [0, 0], sizes = [8, 32], strides = [1, 1]} : vector<8x64xf32> to vector<8x32xf32>
    %337 = vector.extract_strided_slice %335 {offsets = [0, 32], sizes = [8, 32], strides = [1, 1]} : vector<8x64xf32> to vector<8x32xf32>
    %338 = vector.extract_strided_slice %327 {offsets = [0, 64], sizes = [8, 32], strides = [1, 1]} : vector<8x96xf32> to vector<8x32xf32>
    %339 = vector.extract_strided_slice %297 {offsets = [0, 64], sizes = [8, 32], strides = [1, 1]} : vector<8x96xf32> to vector<8x32xf32>
    %340 = arith.mulf %336, %339 : vector<8x32xf32>
    %341 = arith.addf %338, %340 : vector<8x32xf32>
    %342 = math.tanh %341 : vector<8x32xf32>
    %cst_70 = arith.constant 1.000000e+00 : f32
    %343 = vector.broadcast %cst_70 : f32 to vector<8x32xf32>
    %344 = arith.subf %343, %337 : vector<8x32xf32>
    %345 = arith.mulf %344, %342 : vector<8x32xf32>
    %346 = arith.mulf %337, %292 : vector<8x32xf32>
    %347 = arith.addf %345, %346 : vector<8x32xf32>
    %c40 = arith.constant 40 : index
    %c0_71 = arith.constant 0 : index
    %348 = vector.load %arg18[%c40, %c0_71] : memref<64x32xf32, #tpu.memory_space<vmem>>, vector<8x32xf32>
    tpu.vector_store %arg18[%c40, %c0_71], %347 {strides = array<i32>} : memref<64x32xf32, #tpu.memory_space<vmem>>, vector<8x32xf32>,
    %349 = arith.truncf %347 : vector<8x32xf32> to vector<8x32xbf16>
    %cst_72 = arith.constant dense<0.000000e+00> : vector<8x96xf32>
    %350 = tpu.matmul %349, %5, %cst_72 {dimension_numbers = #tpu.dot_dimension_numbers<[1], [0], [0], [1], [0, 0, 1, 1], [], []>} : vector<8x32xbf16>, vector<32x96xbf16>, vector<8x96xf32> -> vector<8x96xf32>
    %351 = vector.broadcast %8 : vector<1x96xf32> to vector<8x96xf32>
    %352 = arith.addf %350, %351 : vector<8x96xf32>
    %353 = vector.extract_strided_slice %16 {offsets = [6, 0, 0], sizes = [1, 8, 96], strides = [1, 1, 1]} : vector<8x8x96xf32> to vector<1x8x96xf32>
    %354 = vector.shape_cast %353 : vector<1x8x96xf32> to vector<8x96xf32>
    %355 = arith.truncf %323 : vector<8x32xf32> to vector<8x32xbf16>
    %cst_73 = arith.constant dense<0.000000e+00> : vector<8x96xf32>
    %356 = tpu.matmul %355, %3, %cst_73 {dimension_numbers = #tpu.dot_dimension_numbers<[1], [0], [0], [1], [0, 0, 1, 1], [], []>} : vector<8x32xbf16>, vector<32x96xbf16>, vector<8x96xf32> -> vector<8x96xf32>
    %357 = vector.broadcast %6 : vector<1x96xf32> to vector<8x96xf32>
    %358 = arith.addf %356, %357 : vector<8x96xf32>
    %359 = vector.extract_strided_slice %354 {offsets = [0, 0], sizes = [8, 64], strides = [1, 1]} : vector<8x96xf32> to vector<8x64xf32>
    %360 = vector.extract_strided_slice %358 {offsets = [0, 0], sizes = [8, 64], strides = [1, 1]} : vector<8x96xf32> to vector<8x64xf32>
    %361 = arith.addf %359, %360 : vector<8x64xf32>
    %362 = arith.negf %361 : vector<8x64xf32>
    %363 = math.exp %362 : vector<8x64xf32>
    %cst_74 = arith.constant 1.000000e+00 : f32
    %364 = vector.broadcast %cst_74 : f32 to vector<8x64xf32>
    %365 = arith.addf %364, %363 : vector<8x64xf32>
    %366 = arith.divf %364, %365 : vector<8x64xf32>
    %367 = vector.extract_strided_slice %366 {offsets = [0, 0], sizes = [8, 32], strides = [1, 1]} : vector<8x64xf32> to vector<8x32xf32>
    %368 = vector.extract_strided_slice %366 {offsets = [0, 32], sizes = [8, 32], strides = [1, 1]} : vector<8x64xf32> to vector<8x32xf32>
    %369 = vector.extract_strided_slice %354 {offsets = [0, 64], sizes = [8, 32], strides = [1, 1]} : vector<8x96xf32> to vector<8x32xf32>
    %370 = vector.extract_strided_slice %358 {offsets = [0, 64], sizes = [8, 32], strides = [1, 1]} : vector<8x96xf32> to vector<8x32xf32>
    %371 = arith.mulf %367, %370 : vector<8x32xf32>
    %372 = arith.addf %369, %371 : vector<8x32xf32>
    %373 = math.tanh %372 : vector<8x32xf32>
    %cst_75 = arith.constant 1.000000e+00 : f32
    %374 = vector.broadcast %cst_75 : f32 to vector<8x32xf32>
    %375 = arith.subf %374, %368 : vector<8x32xf32>
    %376 = arith.mulf %375, %373 : vector<8x32xf32>
    %377 = arith.mulf %368, %323 : vector<8x32xf32>
    %378 = arith.addf %376, %377 : vector<8x32xf32>
    %379 = arith.truncf %378 : vector<8x32xf32> to vector<8x32xbf16>
    %cst_76 = arith.constant dense<0.000000e+00> : vector<8x96xf32>
    %380 = tpu.matmul %379, %4, %cst_76 {dimension_numbers = #tpu.dot_dimension_numbers<[1], [0], [0], [1], [0, 0, 1, 1], [], []>} : vector<8x32xbf16>, vector<32x96xbf16>, vector<8x96xf32> -> vector<8x96xf32>
    %381 = vector.broadcast %7 : vector<1x96xf32> to vector<8x96xf32>
    %382 = arith.addf %380, %381 : vector<8x96xf32>
    %383 = vector.extract_strided_slice %382 {offsets = [0, 0], sizes = [8, 64], strides = [1, 1]} : vector<8x96xf32> to vector<8x64xf32>
    %384 = vector.extract_strided_slice %352 {offsets = [0, 0], sizes = [8, 64], strides = [1, 1]} : vector<8x96xf32> to vector<8x64xf32>
    %385 = arith.addf %383, %384 : vector<8x64xf32>
    %386 = arith.negf %385 : vector<8x64xf32>
    %387 = math.exp %386 : vector<8x64xf32>
    %cst_77 = arith.constant 1.000000e+00 : f32
    %388 = vector.broadcast %cst_77 : f32 to vector<8x64xf32>
    %389 = arith.addf %388, %387 : vector<8x64xf32>
    %390 = arith.divf %388, %389 : vector<8x64xf32>
    %391 = vector.extract_strided_slice %390 {offsets = [0, 0], sizes = [8, 32], strides = [1, 1]} : vector<8x64xf32> to vector<8x32xf32>
    %392 = vector.extract_strided_slice %390 {offsets = [0, 32], sizes = [8, 32], strides = [1, 1]} : vector<8x64xf32> to vector<8x32xf32>
    %393 = vector.extract_strided_slice %382 {offsets = [0, 64], sizes = [8, 32], strides = [1, 1]} : vector<8x96xf32> to vector<8x32xf32>
    %394 = vector.extract_strided_slice %352 {offsets = [0, 64], sizes = [8, 32], strides = [1, 1]} : vector<8x96xf32> to vector<8x32xf32>
    %395 = arith.mulf %391, %394 : vector<8x32xf32>
    %396 = arith.addf %393, %395 : vector<8x32xf32>
    %397 = math.tanh %396 : vector<8x32xf32>
    %cst_78 = arith.constant 1.000000e+00 : f32
    %398 = vector.broadcast %cst_78 : f32 to vector<8x32xf32>
    %399 = arith.subf %398, %392 : vector<8x32xf32>
    %400 = arith.mulf %399, %397 : vector<8x32xf32>
    %401 = arith.mulf %392, %347 : vector<8x32xf32>
    %402 = arith.addf %400, %401 : vector<8x32xf32>
    %c48 = arith.constant 48 : index
    %c0_79 = arith.constant 0 : index
    %403 = vector.load %arg18[%c48, %c0_79] : memref<64x32xf32, #tpu.memory_space<vmem>>, vector<8x32xf32>
    tpu.vector_store %arg18[%c48, %c0_79], %402 {strides = array<i32>} : memref<64x32xf32, #tpu.memory_space<vmem>>, vector<8x32xf32>,
    %404 = arith.truncf %402 : vector<8x32xf32> to vector<8x32xbf16>
    %cst_80 = arith.constant dense<0.000000e+00> : vector<8x96xf32>
    %405 = tpu.matmul %404, %5, %cst_80 {dimension_numbers = #tpu.dot_dimension_numbers<[1], [0], [0], [1], [0, 0, 1, 1], [], []>} : vector<8x32xbf16>, vector<32x96xbf16>, vector<8x96xf32> -> vector<8x96xf32>
    %406 = vector.broadcast %8 : vector<1x96xf32> to vector<8x96xf32>
    %407 = arith.addf %405, %406 : vector<8x96xf32>
    %408 = vector.extract_strided_slice %16 {offsets = [7, 0, 0], sizes = [1, 8, 96], strides = [1, 1, 1]} : vector<8x8x96xf32> to vector<1x8x96xf32>
    %409 = vector.shape_cast %408 : vector<1x8x96xf32> to vector<8x96xf32>
    %410 = arith.truncf %378 : vector<8x32xf32> to vector<8x32xbf16>
    %cst_81 = arith.constant dense<0.000000e+00> : vector<8x96xf32>
    %411 = tpu.matmul %410, %3, %cst_81 {dimension_numbers = #tpu.dot_dimension_numbers<[1], [0], [0], [1], [0, 0, 1, 1], [], []>} : vector<8x32xbf16>, vector<32x96xbf16>, vector<8x96xf32> -> vector<8x96xf32>
    %412 = vector.broadcast %6 : vector<1x96xf32> to vector<8x96xf32>
    %413 = arith.addf %411, %412 : vector<8x96xf32>
    %414 = vector.extract_strided_slice %409 {offsets = [0, 0], sizes = [8, 64], strides = [1, 1]} : vector<8x96xf32> to vector<8x64xf32>
    %415 = vector.extract_strided_slice %413 {offsets = [0, 0], sizes = [8, 64], strides = [1, 1]} : vector<8x96xf32> to vector<8x64xf32>
    %416 = arith.addf %414, %415 : vector<8x64xf32>
    %417 = arith.negf %416 : vector<8x64xf32>
    %418 = math.exp %417 : vector<8x64xf32>
    %cst_82 = arith.constant 1.000000e+00 : f32
    %419 = vector.broadcast %cst_82 : f32 to vector<8x64xf32>
    %420 = arith.addf %419, %418 : vector<8x64xf32>
    %421 = arith.divf %419, %420 : vector<8x64xf32>
    %422 = vector.extract_strided_slice %421 {offsets = [0, 0], sizes = [8, 32], strides = [1, 1]} : vector<8x64xf32> to vector<8x32xf32>
    %423 = vector.extract_strided_slice %421 {offsets = [0, 32], sizes = [8, 32], strides = [1, 1]} : vector<8x64xf32> to vector<8x32xf32>
    %424 = vector.extract_strided_slice %409 {offsets = [0, 64], sizes = [8, 32], strides = [1, 1]} : vector<8x96xf32> to vector<8x32xf32>
    %425 = vector.extract_strided_slice %413 {offsets = [0, 64], sizes = [8, 32], strides = [1, 1]} : vector<8x96xf32> to vector<8x32xf32>
    %426 = arith.mulf %422, %425 : vector<8x32xf32>
    %427 = arith.addf %424, %426 : vector<8x32xf32>
    %428 = math.tanh %427 : vector<8x32xf32>
    %cst_83 = arith.constant 1.000000e+00 : f32
    %429 = vector.broadcast %cst_83 : f32 to vector<8x32xf32>
    %430 = arith.subf %429, %423 : vector<8x32xf32>
    %431 = arith.mulf %430, %428 : vector<8x32xf32>
    %432 = arith.mulf %423, %378 : vector<8x32xf32>
    %433 = arith.addf %431, %432 : vector<8x32xf32>
    %434 = arith.truncf %433 : vector<8x32xf32> to vector<8x32xbf16>
    %cst_84 = arith.constant dense<0.000000e+00> : vector<8x96xf32>
    %435 = tpu.matmul %434, %4, %cst_84 {dimension_numbers = #tpu.dot_dimension_numbers<[1], [0], [0], [1], [0, 0, 1, 1], [], []>} : vector<8x32xbf16>, vector<32x96xbf16>, vector<8x96xf32> -> vector<8x96xf32>
    %436 = vector.broadcast %7 : vector<1x96xf32> to vector<8x96xf32>
    %437 = arith.addf %435, %436 : vector<8x96xf32>
    %438 = vector.extract_strided_slice %437 {offsets = [0, 0], sizes = [8, 64], strides = [1, 1]} : vector<8x96xf32> to vector<8x64xf32>
    %439 = vector.extract_strided_slice %407 {offsets = [0, 0], sizes = [8, 64], strides = [1, 1]} : vector<8x96xf32> to vector<8x64xf32>
    %440 = arith.addf %438, %439 : vector<8x64xf32>
    %441 = arith.negf %440 : vector<8x64xf32>
    %442 = math.exp %441 : vector<8x64xf32>
    %cst_85 = arith.constant 1.000000e+00 : f32
    %443 = vector.broadcast %cst_85 : f32 to vector<8x64xf32>
    %444 = arith.addf %443, %442 : vector<8x64xf32>
    %445 = arith.divf %443, %444 : vector<8x64xf32>
    %446 = vector.extract_strided_slice %445 {offsets = [0, 0], sizes = [8, 32], strides = [1, 1]} : vector<8x64xf32> to vector<8x32xf32>
    %447 = vector.extract_strided_slice %445 {offsets = [0, 32], sizes = [8, 32], strides = [1, 1]} : vector<8x64xf32> to vector<8x32xf32>
    %448 = vector.extract_strided_slice %437 {offsets = [0, 64], sizes = [8, 32], strides = [1, 1]} : vector<8x96xf32> to vector<8x32xf32>
    %449 = vector.extract_strided_slice %407 {offsets = [0, 64], sizes = [8, 32], strides = [1, 1]} : vector<8x96xf32> to vector<8x32xf32>
    %450 = arith.mulf %446, %449 : vector<8x32xf32>
    %451 = arith.addf %448, %450 : vector<8x32xf32>
    %452 = math.tanh %451 : vector<8x32xf32>
    %cst_86 = arith.constant 1.000000e+00 : f32
    %453 = vector.broadcast %cst_86 : f32 to vector<8x32xf32>
    %454 = arith.subf %453, %447 : vector<8x32xf32>
    %455 = arith.mulf %454, %452 : vector<8x32xf32>
    %456 = arith.mulf %447, %402 : vector<8x32xf32>
    %457 = arith.addf %455, %456 : vector<8x32xf32>
    %c56 = arith.constant 56 : index
    %c0_87 = arith.constant 0 : index
    %458 = vector.load %arg18[%c56, %c0_87] : memref<64x32xf32, #tpu.memory_space<vmem>>, vector<8x32xf32>
    tpu.vector_store %arg18[%c56, %c0_87], %457 {strides = array<i32>} : memref<64x32xf32, #tpu.memory_space<vmem>>, vector<8x32xf32>,
    %c0_88 = arith.constant 0 : index
    %c0_89 = arith.constant 0 : index
    %459 = vector.load %arg18[%c0_88, %c0_89] : memref<64x32xf32, #tpu.memory_space<vmem>>, vector<64x32xf32>
    %460 = arith.truncf %459 : vector<64x32xf32> to vector<64x32xbf16>
    %c0_90 = arith.constant 0 : index
    %c0_91 = arith.constant 0 : index
    %461 = vector.load %arg12[%c0_90, %c0_91] : memref<32x16xbf16, #tpu.memory_space<vmem>>, vector<32x16xbf16>
    %cst_92 = arith.constant dense<0.000000e+00> : vector<64x16xf32>
    %462 = tpu.matmul %460, %461, %cst_92 {dimension_numbers = #tpu.dot_dimension_numbers<[1], [0], [0], [1], [0, 0, 1, 1], [], []>} : vector<64x32xbf16>, vector<32x16xbf16>, vector<64x16xf32> -> vector<64x16xf32>
    %c0_93 = arith.constant 0 : index
    %c0_94 = arith.constant 0 : index
    %463 = vector.load %arg13[%c0_93, %c0_94] : memref<1x16xf32, #tpu.memory_space<vmem>>, vector<1x16xf32>
    %464 = vector.broadcast %463 : vector<1x16xf32> to vector<64x16xf32>
    %465 = arith.addf %462, %464 : vector<64x16xf32>
    %466 = vector.shape_cast %465 : vector<64x16xf32> to vector<8x8x16xf32>
    %c0_95 = arith.constant 0 : index
    %c0_96 = arith.constant 0 : index
    %c0_97 = arith.constant 0 : index
    %467 = vector.load %arg14[%c0_95, %c0_96, %c0_97] : memref<8x8x16xf32, #tpu.memory_space<vmem>>, vector<8x8x16xf32>
    tpu.vector_store %arg14[%c0_95, %c0_96, %c0_97], %466 {strides = array<i32>} : memref<8x8x16xf32, #tpu.memory_space<vmem>>, vector<8x8x16xf32>,
    %c0_98 = arith.constant 0 : index
    %c0_99 = arith.constant 0 : index
    %468 = vector.load %arg16[%c0_98, %c0_99] : memref<8x32xf32, #tpu.memory_space<vmem>>, vector<8x32xf32>
    tpu.vector_store %arg16[%c0_98, %c0_99], %433 {strides = array<i32>} : memref<8x32xf32, #tpu.memory_space<vmem>>, vector<8x32xf32>,
    %c0_100 = arith.constant 0 : index
    %c0_101 = arith.constant 0 : index
    %469 = vector.load %arg17[%c0_100, %c0_101] : memref<8x32xf32, #tpu.memory_space<vmem>>, vector<8x32xf32>
    tpu.vector_store %arg17[%c0_100, %c0_101], %457 {strides = array<i32>} : memref<8x32xf32, #tpu.memory_space<vmem>>, vector<8x32xf32>,
    %c0_i32_102 = arith.constant 0 : i32
    %470 = arith.cmpi eq, %arg1, %c0_i32_102 : i32
    %471 = arith.extui %470 : i1 to i32
    %c0_i32_103 = arith.constant 0 : i32
    %472 = arith.cmpi ne, %471, %c0_i32_103 : i32
    scf.if %472 {
      %c0_104 = arith.constant 0 : index
      %c0_105 = arith.constant 0 : index
      %c0_106 = arith.constant 0 : index
      %473 = vector.load %arg15[%c0_104, %c0_105, %c0_106] : memref<2x8x32xf32, #tpu.memory_space<vmem>>, vector<1x8x32xf32>
      %474 = vector.shape_cast %473 : vector<1x8x32xf32> to vector<8x32xf32>
      %475 = vector.shape_cast %433 : vector<8x32xf32> to vector<1x8x32xf32>
      tpu.vector_store %arg15[%c0_104, %c0_105, %c0_106], %475 {strides = array<i32>} : memref<2x8x32xf32, #tpu.memory_space<vmem>>, vector<1x8x32xf32>,
      %c1 = arith.constant 1 : index
      %c0_107 = arith.constant 0 : index
      %c0_108 = arith.constant 0 : index
      %476 = vector.load %arg15[%c1, %c0_107, %c0_108] : memref<2x8x32xf32, #tpu.memory_space<vmem>>, vector<1x8x32xf32>
      %477 = vector.shape_cast %476 : vector<1x8x32xf32> to vector<8x32xf32>
      %478 = vector.shape_cast %457 : vector<8x32xf32> to vector<1x8x32xf32>
      tpu.vector_store %arg15[%c1, %c0_107, %c0_108], %478 {strides = array<i32>} : memref<2x8x32xf32, #tpu.memory_space<vmem>>, vector<1x8x32xf32>,
    } else {
    }
    return
  }
  func.func @transform_0(%arg0: i32, %arg1: i32) -> (i32, i32, i32) {
    %c0_i32 = arith.constant 0 : i32
    %c0_i32_0 = arith.constant 0 : i32
    return %arg1, %arg0, %c0_i32 : i32, i32, i32
  }
  func.func @transform_1(%arg0: i32, %arg1: i32) -> (i32, i32, i32) {
    %c0_i32 = arith.constant 0 : i32
    %c0_i32_0 = arith.constant 0 : i32
    %c0_i32_1 = arith.constant 0 : i32
    return %c0_i32, %arg0, %c0_i32_0 : i32, i32, i32
  }
  func.func @transform_2(%arg0: i32, %arg1: i32) -> (i32, i32) {
    %c0_i32 = arith.constant 0 : i32
    %c0_i32_0 = arith.constant 0 : i32
    %c0_i32_1 = arith.constant 0 : i32
    return %c0_i32, %c0_i32_0 : i32, i32
  }
  func.func @transform_3(%arg0: i32, %arg1: i32) -> (i32, i32) {
    %c0_i32 = arith.constant 0 : i32
    %c0_i32_0 = arith.constant 0 : i32
    %c0_i32_1 = arith.constant 0 : i32
    return %c0_i32, %c0_i32_0 : i32, i32
  }
  func.func @transform_4(%arg0: i32, %arg1: i32) -> (i32, i32) {
    %c0_i32 = arith.constant 0 : i32
    %c0_i32_0 = arith.constant 0 : i32
    %c0_i32_1 = arith.constant 0 : i32
    return %c0_i32, %c0_i32_0 : i32, i32
  }
  func.func @transform_5(%arg0: i32, %arg1: i32) -> (i32, i32) {
    %c0_i32 = arith.constant 0 : i32
    %c0_i32_0 = arith.constant 0 : i32
    %c0_i32_1 = arith.constant 0 : i32
    return %c0_i32, %c0_i32_0 : i32, i32
  }
  func.func @transform_6(%arg0: i32, %arg1: i32) -> (i32, i32) {
    %c0_i32 = arith.constant 0 : i32
    %c0_i32_0 = arith.constant 0 : i32
    %c0_i32_1 = arith.constant 0 : i32
    return %c0_i32, %c0_i32_0 : i32, i32
  }
  func.func @transform_7(%arg0: i32, %arg1: i32) -> (i32, i32) {
    %c0_i32 = arith.constant 0 : i32
    %c0_i32_0 = arith.constant 0 : i32
    %c0_i32_1 = arith.constant 0 : i32
    return %c0_i32, %c0_i32_0 : i32, i32
  }
  func.func @transform_8(%arg0: i32, %arg1: i32) -> (i32, i32) {
    %c0_i32 = arith.constant 0 : i32
    %c0_i32_0 = arith.constant 0 : i32
    %c0_i32_1 = arith.constant 0 : i32
    return %c0_i32, %c0_i32_0 : i32, i32
  }
  func.func @transform_9(%arg0: i32, %arg1: i32) -> (i32, i32) {
    %c0_i32 = arith.constant 0 : i32
    %c0_i32_0 = arith.constant 0 : i32
    %c0_i32_1 = arith.constant 0 : i32
    return %c0_i32, %c0_i32_0 : i32, i32
  }
  func.func @transform_10(%arg0: i32, %arg1: i32) -> (i32, i32) {
    %c0_i32 = arith.constant 0 : i32
    %c0_i32_0 = arith.constant 0 : i32
    %c0_i32_1 = arith.constant 0 : i32
    return %c0_i32, %c0_i32_0 : i32, i32
  }
  func.func @transform_11(%arg0: i32, %arg1: i32) -> (i32, i32) {
    %c0_i32 = arith.constant 0 : i32
    %c0_i32_0 = arith.constant 0 : i32
    %c0_i32_1 = arith.constant 0 : i32
    return %c0_i32, %c0_i32_0 : i32, i32
  }
  func.func @transform_12(%arg0: i32, %arg1: i32) -> (i32, i32, i32) {
    %c0_i32 = arith.constant 0 : i32
    %c0_i32_0 = arith.constant 0 : i32
    return %arg1, %arg0, %c0_i32 : i32, i32, i32
  }
  func.func @transform_13(%arg0: i32, %arg1: i32) -> (i32, i32, i32) {
    %c0_i32 = arith.constant 0 : i32
    %c0_i32_0 = arith.constant 0 : i32
    %c0_i32_1 = arith.constant 0 : i32
    return %c0_i32, %arg0, %c0_i32_0 : i32, i32, i32
  }
}

module attributes {stable_mosaic.version = 11 : i64} {
  func.func @decoder_kernel(%arg0: i32, %arg1: i32, %arg2: memref<8x8x16xbf16, #tpu.memory_space<vmem>>, %arg3: memref<2x8x32xf32, #tpu.memory_space<vmem>>, %arg4: memref<16x96xbf16, #tpu.memory_space<vmem>>, %arg5: memref<32x96xbf16, #tpu.memory_space<vmem>>, %arg6: memref<1x96xf32, #tpu.memory_space<vmem>>, %arg7: memref<1x96xf32, #tpu.memory_space<vmem>>, %arg8: memref<32x96xbf16, #tpu.memory_space<vmem>>, %arg9: memref<32x96xbf16, #tpu.memory_space<vmem>>, %arg10: memref<1x96xf32, #tpu.memory_space<vmem>>, %arg11: memref<1x96xf32, #tpu.memory_space<vmem>>, %arg12: memref<32x16xbf16, #tpu.memory_space<vmem>>, %arg13: memref<1x16xf32, #tpu.memory_space<vmem>>, %arg14: memref<8x8x16xf32, #tpu.memory_space<vmem>>, %arg15: memref<2x8x32xf32, #tpu.memory_space<vmem>>, %arg16: memref<8x32xf32, #tpu.memory_space<vmem>>, %arg17: memref<8x32xf32, #tpu.memory_space<vmem>>, %arg18: memref<64x32xf32, #tpu.memory_space<vmem>>) attributes {dimension_semantics = [#tpu.dimension_semantics<parallel>, #tpu.dimension_semantics<arbitrary>], iteration_bounds = array<i64: 1, 1>, scalar_prefetch = 0 : i64, scratch_operands = 3 : i64, tpu.core_type = #tpu.core_type<tc>, window_params = [{transform_indices = @transform_0, window_bounds = array<i64: 8, 8, 16>}, {transform_indices = @transform_1, window_bounds = array<i64: 2, 8, 32>}, {pipeline_mode = #tpu.pipeline_mode<synchronous>, transform_indices = @transform_2, window_bounds = array<i64: 16, 96>}, {pipeline_mode = #tpu.pipeline_mode<synchronous>, transform_indices = @transform_3, window_bounds = array<i64: 32, 96>}, {pipeline_mode = #tpu.pipeline_mode<synchronous>, transform_indices = @transform_4, window_bounds = array<i64: 1, 96>}, {pipeline_mode = #tpu.pipeline_mode<synchronous>, transform_indices = @transform_5, window_bounds = array<i64: 1, 96>}, {pipeline_mode = #tpu.pipeline_mode<synchronous>, transform_indices = @transform_6, window_bounds = array<i64: 32, 96>}, {pipeline_mode = #tpu.pipeline_mode<synchronous>, transform_indices = @transform_7, window_bounds = array<i64: 32, 96>}, {pipeline_mode = #tpu.pipeline_mode<synchronous>, transform_indices = @transform_8, window_bounds = array<i64: 1, 96>}, {pipeline_mode = #tpu.pipeline_mode<synchronous>, transform_indices = @transform_9, window_bounds = array<i64: 1, 96>}, {pipeline_mode = #tpu.pipeline_mode<synchronous>, transform_indices = @transform_10, window_bounds = array<i64: 32, 16>}, {pipeline_mode = #tpu.pipeline_mode<synchronous>, transform_indices = @transform_11, window_bounds = array<i64: 1, 16>}, {transform_indices = @transform_12, window_bounds = array<i64: 8, 8, 16>}, {transform_indices = @transform_13, window_bounds = array<i64: 2, 8, 32>}]} {
    %c0_i32 = arith.constant 0 : i32
    %0 = arith.cmpi eq, %arg1, %c0_i32 : i32
    %1 = arith.extui %0 : i1 to i32
    %c0_i32_0 = arith.constant 0 : i32
    %2 = arith.cmpi ne, %1, %c0_i32_0 : i32
    scf.if %2 {
      %c0_104 = arith.constant 0 : index
      %c0_105 = arith.constant 0 : index
      %c0_106 = arith.constant 0 : index
      %473 = vector.load %arg3[%c0_104, %c0_105, %c0_106] : memref<2x8x32xf32, #tpu.memory_space<vmem>>, vector<1x8x32xf32>
      %474 = vector.shape_cast %473 : vector<1x8x32xf32> to vector<8x32xf32>
      %c0_107 = arith.constant 0 : index
      %c0_108 = arith.constant 0 : index
      %475 = vector.load %arg16[%c0_107, %c0_108] : memref<8x32xf32, #tpu.memory_space<vmem>>, vector<8x32xf32>
      tpu.vector_store %arg16[%c0_107, %c0_108], %474 {strides = array<i32>} : memref<8x32xf32, #tpu.memory_space<vmem>>, vector<8x32xf32>,
      %c1 = arith.constant 1 : index
      %c0_109 = arith.constant 0 : index
      %c0_110 = arith.constant 0 : index
      %476 = vector.load %arg3[%c1, %c0_109, %c0_110] : memref<2x8x32xf32, #tpu.memory_space<vmem>>, vector<1x8x32xf32>
      %477 = vector.shape_cast %476 : vector<1x8x32xf32> to vector<8x32xf32>
      %c0_111 = arith.constant 0 : index
      %c0_112 = arith.constant 0 : index
      %478 = vector.load %arg17[%c0_111, %c0_112] : memref<8x32xf32, #tpu.memory_space<vmem>>, vector<8x32xf32>
      tpu.vector_store %arg17[%c0_111, %c0_112], %477 {strides = array<i32>} : memref<8x32xf32, #tpu.memory_space<vmem>>, vector<8x32xf32>,
    } else {
    }
    %c0 = arith.constant 0 : index
    %c0_1 = arith.constant 0 : index
    %3 = vector.load %arg5[%c0, %c0_1] : memref<32x96xbf16, #tpu.memory_space<vmem>>, vector<32x96xbf16>
    %c0_2 = arith.constant 0 : index
    %c0_3 = arith.constant 0 : index
    %4 = vector.load %arg8[%c0_2, %c0_3] : memref<32x96xbf16, #tpu.memory_space<vmem>>, vector<32x96xbf16>
    %c0_4 = arith.constant 0 : index
    %c0_5 = arith.constant 0 : index
    %5 = vector.load %arg9[%c0_4, %c0_5] : memref<32x96xbf16, #tpu.memory_space<vmem>>, vector<32x96xbf16>
    %c0_6 = arith.constant 0 : index
    %c0_7 = arith.constant 0 : index
    %6 = vector.load %arg7[%c0_6, %c0_7] : memref<1x96xf32, #tpu.memory_space<vmem>>, vector<1x96xf32>
    %c0_8 = arith.constant 0 : index
    %c0_9 = arith.constant 0 : index
    %7 = vector.load %arg10[%c0_8, %c0_9] : memref<1x96xf32, #tpu.memory_space<vmem>>, vector<1x96xf32>
    %c0_10 = arith.constant 0 : index
    %c0_11 = arith.constant 0 : index
    %8 = vector.load %arg11[%c0_10, %c0_11] : memref<1x96xf32, #tpu.memory_space<vmem>>, vector<1x96xf32>
    %c0_12 = arith.constant 0 : index
    %c0_13 = arith.constant 0 : index
    %c0_14 = arith.constant 0 : index
    %9 = vector.load %arg2[%c0_12, %c0_13, %c0_14] : memref<8x8x16xbf16, #tpu.memory_space<vmem>>, vector<8x8x16xbf16>
    %10 = vector.shape_cast %9 : vector<8x8x16xbf16> to vector<64x16xbf16>
    %c0_15 = arith.constant 0 : index
    %c0_16 = arith.constant 0 : index
    %11 = vector.load %arg4[%c0_15, %c0_16] : memref<16x96xbf16, #tpu.memory_space<vmem>>, vector<16x96xbf16>
    %cst = arith.constant dense<0.000000e+00> : vector<64x96xf32>
    %12 = tpu.matmul %10, %11, %cst {dimension_numbers = #tpu.dot_dimension_numbers<[1], [0], [0], [1], [0, 0, 1, 1], [], []>} : vector<64x16xbf16>, vector<16x96xbf16>, vector<64x96xf32> -> vector<64x96xf32>
    %c0_17 = arith.constant 0 : index
    %c0_18 = arith.constant 0 : index
    %13 = vector.load %arg6[%c0_17, %c0_18] : memref<1x96xf32, #tpu.memory_space<vmem>>, vector<1x96xf32>
    %14 = vector.broadcast %13 : vector<1x96xf32> to vector<64x96xf32>
    %15 = arith.addf %12, %14 : vector<64x96xf32>
    %16 = vector.shape_cast %15 : vector<64x96xf32> to vector<8x8x96xf32>
    %c0_19 = arith.constant 0 : index
    %c0_20 = arith.constant 0 : index
    %17 = vector.load %arg16[%c0_19, %c0_20] : memref<8x32xf32, #tpu.memory_space<vmem>>, vector<8x32xf32>
    %c0_21 = arith.constant 0 : index
    %c0_22 = arith.constant 0 : index
    %18 = vector.load %arg17[%c0_21, %c0_22] : memref<8x32xf32, #tpu.memory_space<vmem>>, vector<8x32xf32>
    %19 = arith.truncf %18 : vector<8x32xf32> to vector<8x32xbf16>
    %cst_23 = arith.constant dense<0.000000e+00> : vector<8x96xf32>
    %20 = tpu.matmul %19, %5, %cst_23 {dimension_numbers = #tpu.dot_dimension_numbers<[1], [0], [0], [1], [0, 0, 1, 1], [], []>} : vector<8x32xbf16>, vector<32x96xbf16>, vector<8x96xf32> -> vector<8x96xf32>
    %21 = vector.broadcast %8 : vector<1x96xf32> to vector<8x96xf32>
    %22 = arith.addf %20, %21 : vector<8x96xf32>
    %23 = vector.extract_strided_slice %16 {offsets = [0, 0, 0], sizes = [1, 8, 96], strides = [1, 1, 1]} : vector<8x8x96xf32> to vector<1x8x96xf32>
    %24 = vector.shape_cast %23 : vector<1x8x96xf32> to vector<8x96xf32>
    %25 = arith.truncf %17 : vector<8x32xf32> to vector<8x32xbf16>
    %cst_24 = arith.constant dense<0.000000e+00> : vector<8x96xf32>
    %26 = tpu.matmul %25, %3, %cst_24 {dimension_numbers = #tpu.dot_dimension_numbers<[1], [0], [0], [1], [0, 0, 1, 1], [], []>} : vector<8x32xbf16>, vector<32x96xbf16>, vector<8x96xf32> -> vector<8x96xf32>
    %27 = vector.broadcast %6 : vector<1x96xf32> to vector<8x96xf32>
    %28 = arith.addf %26, %27 : vector<8x96xf32>
    %29 = vector.extract_strided_slice %24 {offsets = [0, 0], sizes = [8, 64], strides = [1, 1]} : vector<8x96xf32> to vector<8x64xf32>
    %30 = vector.extract_strided_slice %28 {offsets = [0, 0], sizes = [8, 64], strides = [1, 1]} : vector<8x96xf32> to vector<8x64xf32>
    %31 = arith.addf %29, %30 : vector<8x64xf32>
    %32 = arith.negf %31 : vector<8x64xf32>
    %33 = math.exp %32 : vector<8x64xf32>
    %cst_25 = arith.constant 1.000000e+00 : f32
    %34 = vector.broadcast %cst_25 : f32 to vector<8x64xf32>
    %35 = arith.addf %34, %33 : vector<8x64xf32>
    %36 = arith.divf %34, %35 : vector<8x64xf32>
    %37 = vector.extract_strided_slice %36 {offsets = [0, 0], sizes = [8, 32], strides = [1, 1]} : vector<8x64xf32> to vector<8x32xf32>
    %38 = vector.extract_strided_slice %36 {offsets = [0, 32], sizes = [8, 32], strides = [1, 1]} : vector<8x64xf32> to vector<8x32xf32>
    %39 = vector.extract_strided_slice %24 {offsets = [0, 64], sizes = [8, 32], strides = [1, 1]} : vector<8x96xf32> to vector<8x32xf32>
    %40 = vector.extract_strided_slice %28 {offsets = [0, 64], sizes = [8, 32], strides = [1, 1]} : vector<8x96xf32> to vector<8x32xf32>
    %41 = arith.mulf %37, %40 : vector<8x32xf32>
    %42 = arith.addf %39, %41 : vector<8x32xf32>
    %43 = math.tanh %42 : vector<8x32xf32>
    %cst_26 = arith.constant 1.000000e+00 : f32
    %44 = vector.broadcast %cst_26 : f32 to vector<8x32xf32>
    %45 = arith.subf %44, %38 : vector<8x32xf32>
    %46 = arith.mulf %45, %43 : vector<8x32xf32>
    %47 = arith.mulf %38, %17 : vector<8x32xf32>
    %48 = arith.addf %46, %47 : vector<8x32xf32>
    %49 = arith.truncf %48 : vector<8x32xf32> to vector<8x32xbf16>
    %cst_27 = arith.constant dense<0.000000e+00> : vector<8x96xf32>
    %50 = tpu.matmul %49, %4, %cst_27 {dimension_numbers = #tpu.dot_dimension_numbers<[1], [0], [0], [1], [0, 0, 1, 1], [], []>} : vector<8x32xbf16>, vector<32x96xbf16>, vector<8x96xf32> -> vector<8x96xf32>
    %51 = vector.broadcast %7 : vector<1x96xf32> to vector<8x96xf32>
    %52 = arith.addf %50, %51 : vector<8x96xf32>
    %53 = vector.extract_strided_slice %52 {offsets = [0, 0], sizes = [8, 64], strides = [1, 1]} : vector<8x96xf32> to vector<8x64xf32>
    %54 = vector.extract_strided_slice %22 {offsets = [0, 0], sizes = [8, 64], strides = [1, 1]} : vector<8x96xf32> to vector<8x64xf32>
    %55 = arith.addf %53, %54 : vector<8x64xf32>
    %56 = arith.negf %55 : vector<8x64xf32>
    %57 = math.exp %56 : vector<8x64xf32>
    %cst_28 = arith.constant 1.000000e+00 : f32
    %58 = vector.broadcast %cst_28 : f32 to vector<8x64xf32>
    %59 = arith.addf %58, %57 : vector<8x64xf32>
    %60 = arith.divf %58, %59 : vector<8x64xf32>
    %61 = vector.extract_strided_slice %60 {offsets = [0, 0], sizes = [8, 32], strides = [1, 1]} : vector<8x64xf32> to vector<8x32xf32>
    %62 = vector.extract_strided_slice %60 {offsets = [0, 32], sizes = [8, 32], strides = [1, 1]} : vector<8x64xf32> to vector<8x32xf32>
    %63 = vector.extract_strided_slice %52 {offsets = [0, 64], sizes = [8, 32], strides = [1, 1]} : vector<8x96xf32> to vector<8x32xf32>
    %64 = vector.extract_strided_slice %22 {offsets = [0, 64], sizes = [8, 32], strides = [1, 1]} : vector<8x96xf32> to vector<8x32xf32>
    %65 = arith.mulf %61, %64 : vector<8x32xf32>
    %66 = arith.addf %63, %65 : vector<8x32xf32>
    %67 = math.tanh %66 : vector<8x32xf32>
    %cst_29 = arith.constant 1.000000e+00 : f32
    %68 = vector.broadcast %cst_29 : f32 to vector<8x32xf32>
    %69 = arith.subf %68, %62 : vector<8x32xf32>
    %70 = arith.mulf %69, %67 : vector<8x32xf32>
    %71 = arith.mulf %62, %18 : vector<8x32xf32>
    %72 = arith.addf %70, %71 : vector<8x32xf32>
    %c0_30 = arith.constant 0 : index
    %c0_31 = arith.constant 0 : index
    %73 = vector.load %arg18[%c0_30, %c0_31] : memref<64x32xf32, #tpu.memory_space<vmem>>, vector<8x32xf32>
    tpu.vector_store %arg18[%c0_30, %c0_31], %72 {strides = array<i32>} : memref<64x32xf32, #tpu.memory_space<vmem>>, vector<8x32xf32>,
    %74 = arith.truncf %72 : vector<8x32xf32> to vector<8x32xbf16>
    %cst_32 = arith.constant dense<0.000000e+00> : vector<8x96xf32>
    %75 = tpu.matmul %74, %5, %cst_32 {dimension_numbers = #tpu.dot_dimension_numbers<[1], [0], [0], [1], [0, 0, 1, 1], [], []>} : vector<8x32xbf16>, vector<32x96xbf16>, vector<8x96xf32> -> vector<8x96xf32>
    %76 = vector.broadcast %8 : vector<1x96xf32> to vector<8x96xf32>
    %77 = arith.addf %75, %76 : vector<8x96xf32>
    %78 = vector.extract_strided_slice %16 {offsets = [1, 0, 0], sizes = [1, 8, 96], strides = [1, 1, 1]} : vector<8x8x96xf32> to vector<1x8x96xf32>
    %79 = vector.shape_cast %78 : vector<1x8x96xf32> to vector<8x96xf32>
    %80 = arith.truncf %48 : vector<8x32xf32> to vector<8x32xbf16>
    %cst_33 = arith.constant dense<0.000000e+00> : vector<8x96xf32>
    %81 = tpu.matmul %80, %3, %cst_33 {dimension_numbers = #tpu.dot_dimension_numbers<[1], [0], [0], [1], [0, 0, 1, 1], [], []>} : vector<8x32xbf16>, vector<32x96xbf16>, vector<8x96xf32> -> vector<8x96xf32>
    %82 = vector.broadcast %6 : vector<1x96xf32> to vector<8x96xf32>
    %83 = arith.addf %81, %82 : vector<8x96xf32>
    %84 = vector.extract_strided_slice %79 {offsets = [0, 0], sizes = [8, 64], strides = [1, 1]} : vector<8x96xf32> to vector<8x64xf32>
    %85 = vector.extract_strided_slice %83 {offsets = [0, 0], sizes = [8, 64], strides = [1, 1]} : vector<8x96xf32> to vector<8x64xf32>
    %86 = arith.addf %84, %85 : vector<8x64xf32>
    %87 = arith.negf %86 : vector<8x64xf32>
    %88 = math.exp %87 : vector<8x64xf32>
    %cst_34 = arith.constant 1.000000e+00 : f32
    %89 = vector.broadcast %cst_34 : f32 to vector<8x64xf32>
    %90 = arith.addf %89, %88 : vector<8x64xf32>
    %91 = arith.divf %89, %90 : vector<8x64xf32>
    %92 = vector.extract_strided_slice %91 {offsets = [0, 0], sizes = [8, 32], strides = [1, 1]} : vector<8x64xf32> to vector<8x32xf32>
    %93 = vector.extract_strided_slice %91 {offsets = [0, 32], sizes = [8, 32], strides = [1, 1]} : vector<8x64xf32> to vector<8x32xf32>
    %94 = vector.extract_strided_slice %79 {offsets = [0, 64], sizes = [8, 32], strides = [1, 1]} : vector<8x96xf32> to vector<8x32xf32>
    %95 = vector.extract_strided_slice %83 {offsets = [0, 64], sizes = [8, 32], strides = [1, 1]} : vector<8x96xf32> to vector<8x32xf32>
    %96 = arith.mulf %92, %95 : vector<8x32xf32>
    %97 = arith.addf %94, %96 : vector<8x32xf32>
    %98 = math.tanh %97 : vector<8x32xf32>
    %cst_35 = arith.constant 1.000000e+00 : f32
    %99 = vector.broadcast %cst_35 : f32 to vector<8x32xf32>
    %100 = arith.subf %99, %93 : vector<8x32xf32>
    %101 = arith.mulf %100, %98 : vector<8x32xf32>
    %102 = arith.mulf %93, %48 : vector<8x32xf32>
    %103 = arith.addf %101, %102 : vector<8x32xf32>
    %104 = arith.truncf %103 : vector<8x32xf32> to vector<8x32xbf16>
    %cst_36 = arith.constant dense<0.000000e+00> : vector<8x96xf32>
    %105 = tpu.matmul %104, %4, %cst_36 {dimension_numbers = #tpu.dot_dimension_numbers<[1], [0], [0], [1], [0, 0, 1, 1], [], []>} : vector<8x32xbf16>, vector<32x96xbf16>, vector<8x96xf32> -> vector<8x96xf32>
    %106 = vector.broadcast %7 : vector<1x96xf32> to vector<8x96xf32>
    %107 = arith.addf %105, %106 : vector<8x96xf32>
    %108 = vector.extract_strided_slice %107 {offsets = [0, 0], sizes = [8, 64], strides = [1, 1]} : vector<8x96xf32> to vector<8x64xf32>
    %109 = vector.extract_strided_slice %77 {offsets = [0, 0], sizes = [8, 64], strides = [1, 1]} : vector<8x96xf32> to vector<8x64xf32>
    %110 = arith.addf %108, %109 : vector<8x64xf32>
    %111 = arith.negf %110 : vector<8x64xf32>
    %112 = math.exp %111 : vector<8x64xf32>
    %cst_37 = arith.constant 1.000000e+00 : f32
    %113 = vector.broadcast %cst_37 : f32 to vector<8x64xf32>
    %114 = arith.addf %113, %112 : vector<8x64xf32>
    %115 = arith.divf %113, %114 : vector<8x64xf32>
    %116 = vector.extract_strided_slice %115 {offsets = [0, 0], sizes = [8, 32], strides = [1, 1]} : vector<8x64xf32> to vector<8x32xf32>
    %117 = vector.extract_strided_slice %115 {offsets = [0, 32], sizes = [8, 32], strides = [1, 1]} : vector<8x64xf32> to vector<8x32xf32>
    %118 = vector.extract_strided_slice %107 {offsets = [0, 64], sizes = [8, 32], strides = [1, 1]} : vector<8x96xf32> to vector<8x32xf32>
    %119 = vector.extract_strided_slice %77 {offsets = [0, 64], sizes = [8, 32], strides = [1, 1]} : vector<8x96xf32> to vector<8x32xf32>
    %120 = arith.mulf %116, %119 : vector<8x32xf32>
    %121 = arith.addf %118, %120 : vector<8x32xf32>
    %122 = math.tanh %121 : vector<8x32xf32>
    %cst_38 = arith.constant 1.000000e+00 : f32
    %123 = vector.broadcast %cst_38 : f32 to vector<8x32xf32>
    %124 = arith.subf %123, %117 : vector<8x32xf32>
    %125 = arith.mulf %124, %122 : vector<8x32xf32>
    %126 = arith.mulf %117, %72 : vector<8x32xf32>
    %127 = arith.addf %125, %126 : vector<8x32xf32>
    %c8 = arith.constant 8 : index
    %c0_39 = arith.constant 0 : index
    %128 = vector.load %arg18[%c8, %c0_39] : memref<64x32xf32, #tpu.memory_space<vmem>>, vector<8x32xf32>
    tpu.vector_store %arg18[%c8, %c0_39], %127 {strides = array<i32>} : memref<64x32xf32, #tpu.memory_space<vmem>>, vector<8x32xf32>,
    %129 = arith.truncf %127 : vector<8x32xf32> to vector<8x32xbf16>
    %cst_40 = arith.constant dense<0.000000e+00> : vector<8x96xf32>
    %130 = tpu.matmul %129, %5, %cst_40 {dimension_numbers = #tpu.dot_dimension_numbers<[1], [0], [0], [1], [0, 0, 1, 1], [], []>} : vector<8x32xbf16>, vector<32x96xbf16>, vector<8x96xf32> -> vector<8x96xf32>
    %131 = vector.broadcast %8 : vector<1x96xf32> to vector<8x96xf32>
    %132 = arith.addf %130, %131 : vector<8x96xf32>
    %133 = vector.extract_strided_slice %16 {offsets = [2, 0, 0], sizes = [1, 8, 96], strides = [1, 1, 1]} : vector<8x8x96xf32> to vector<1x8x96xf32>
    %134 = vector.shape_cast %133 : vector<1x8x96xf32> to vector<8x96xf32>
    %135 = arith.truncf %103 : vector<8x32xf32> to vector<8x32xbf16>
    %cst_41 = arith.constant dense<0.000000e+00> : vector<8x96xf32>
    %136 = tpu.matmul %135, %3, %cst_41 {dimension_numbers = #tpu.dot_dimension_numbers<[1], [0], [0], [1], [0, 0, 1, 1], [], []>} : vector<8x32xbf16>, vector<32x96xbf16>, vector<8x96xf32> -> vector<8x96xf32>
    %137 = vector.broadcast %6 : vector<1x96xf32> to vector<8x96xf32>
    %138 = arith.addf %136, %137 : vector<8x96xf32>
    %139 = vector.extract_strided_slice %134 {offsets = [0, 0], sizes = [8, 64], strides = [1, 1]} : vector<8x96xf32> to vector<8x64xf32>
    %140 = vector.extract_strided_slice %138 {offsets = [0, 0], sizes = [8, 64], strides = [1, 1]} : vector<8x96xf32> to vector<8x64xf32>
    %141 = arith.addf %139, %140 : vector<8x64xf32>
    %142 = arith.negf %141 : vector<8x64xf32>
    %143 = math.exp %142 : vector<8x64xf32>
    %cst_42 = arith.constant 1.000000e+00 : f32
    %144 = vector.broadcast %cst_42 : f32 to vector<8x64xf32>
    %145 = arith.addf %144, %143 : vector<8x64xf32>
    %146 = arith.divf %144, %145 : vector<8x64xf32>
    %147 = vector.extract_strided_slice %146 {offsets = [0, 0], sizes = [8, 32], strides = [1, 1]} : vector<8x64xf32> to vector<8x32xf32>
    %148 = vector.extract_strided_slice %146 {offsets = [0, 32], sizes = [8, 32], strides = [1, 1]} : vector<8x64xf32> to vector<8x32xf32>
    %149 = vector.extract_strided_slice %134 {offsets = [0, 64], sizes = [8, 32], strides = [1, 1]} : vector<8x96xf32> to vector<8x32xf32>
    %150 = vector.extract_strided_slice %138 {offsets = [0, 64], sizes = [8, 32], strides = [1, 1]} : vector<8x96xf32> to vector<8x32xf32>
    %151 = arith.mulf %147, %150 : vector<8x32xf32>
    %152 = arith.addf %149, %151 : vector<8x32xf32>
    %153 = math.tanh %152 : vector<8x32xf32>
    %cst_43 = arith.constant 1.000000e+00 : f32
    %154 = vector.broadcast %cst_43 : f32 to vector<8x32xf32>
    %155 = arith.subf %154, %148 : vector<8x32xf32>
    %156 = arith.mulf %155, %153 : vector<8x32xf32>
    %157 = arith.mulf %148, %103 : vector<8x32xf32>
    %158 = arith.addf %156, %157 : vector<8x32xf32>
    %159 = arith.truncf %158 : vector<8x32xf32> to vector<8x32xbf16>
    %cst_44 = arith.constant dense<0.000000e+00> : vector<8x96xf32>
    %160 = tpu.matmul %159, %4, %cst_44 {dimension_numbers = #tpu.dot_dimension_numbers<[1], [0], [0], [1], [0, 0, 1, 1], [], []>} : vector<8x32xbf16>, vector<32x96xbf16>, vector<8x96xf32> -> vector<8x96xf32>
    %161 = vector.broadcast %7 : vector<1x96xf32> to vector<8x96xf32>
    %162 = arith.addf %160, %161 : vector<8x96xf32>
    %163 = vector.extract_strided_slice %162 {offsets = [0, 0], sizes = [8, 64], strides = [1, 1]} : vector<8x96xf32> to vector<8x64xf32>
    %164 = vector.extract_strided_slice %132 {offsets = [0, 0], sizes = [8, 64], strides = [1, 1]} : vector<8x96xf32> to vector<8x64xf32>
    %165 = arith.addf %163, %164 : vector<8x64xf32>
    %166 = arith.negf %165 : vector<8x64xf32>
    %167 = math.exp %166 : vector<8x64xf32>
    %cst_45 = arith.constant 1.000000e+00 : f32
    %168 = vector.broadcast %cst_45 : f32 to vector<8x64xf32>
    %169 = arith.addf %168, %167 : vector<8x64xf32>
    %170 = arith.divf %168, %169 : vector<8x64xf32>
    %171 = vector.extract_strided_slice %170 {offsets = [0, 0], sizes = [8, 32], strides = [1, 1]} : vector<8x64xf32> to vector<8x32xf32>
    %172 = vector.extract_strided_slice %170 {offsets = [0, 32], sizes = [8, 32], strides = [1, 1]} : vector<8x64xf32> to vector<8x32xf32>
    %173 = vector.extract_strided_slice %162 {offsets = [0, 64], sizes = [8, 32], strides = [1, 1]} : vector<8x96xf32> to vector<8x32xf32>
    %174 = vector.extract_strided_slice %132 {offsets = [0, 64], sizes = [8, 32], strides = [1, 1]} : vector<8x96xf32> to vector<8x32xf32>
    %175 = arith.mulf %171, %174 : vector<8x32xf32>
    %176 = arith.addf %173, %175 : vector<8x32xf32>
    %177 = math.tanh %176 : vector<8x32xf32>
    %cst_46 = arith.constant 1.000000e+00 : f32
    %178 = vector.broadcast %cst_46 : f32 to vector<8x32xf32>
    %179 = arith.subf %178, %172 : vector<8x32xf32>
    %180 = arith.mulf %179, %177 : vector<8x32xf32>
    %181 = arith.mulf %172, %127 : vector<8x32xf32>
    %182 = arith.addf %180, %181 : vector<8x32xf32>
    %c16 = arith.constant 16 : index
    %c0_47 = arith.constant 0 : index
    %183 = vector.load %arg18[%c16, %c0_47] : memref<64x32xf32, #tpu.memory_space<vmem>>, vector<8x32xf32>
    tpu.vector_store %arg18[%c16, %c0_47], %182 {strides = array<i32>} : memref<64x32xf32, #tpu.memory_space<vmem>>, vector<8x32xf32>,
    %184 = arith.truncf %182 : vector<8x32xf32> to vector<8x32xbf16>
    %cst_48 = arith.constant dense<0.000000e+00> : vector<8x96xf32>
    %185 = tpu.matmul %184, %5, %cst_48 {dimension_numbers = #tpu.dot_dimension_numbers<[1], [0], [0], [1], [0, 0, 1, 1], [], []>} : vector<8x32xbf16>, vector<32x96xbf16>, vector<8x96xf32> -> vector<8x96xf32>
    %186 = vector.broadcast %8 : vector<1x96xf32> to vector<8x96xf32>
    %187 = arith.addf %185, %186 : vector<8x96xf32>
    %188 = vector.extract_strided_slice %16 {offsets = [3, 0, 0], sizes = [1, 8, 96], strides = [1, 1, 1]} : vector<8x8x96xf32> to vector<1x8x96xf32>
    %189 = vector.shape_cast %188 : vector<1x8x96xf32> to vector<8x96xf32>
    %190 = arith.truncf %158 : vector<8x32xf32> to vector<8x32xbf16>
    %cst_49 = arith.constant dense<0.000000e+00> : vector<8x96xf32>
    %191 = tpu.matmul %190, %3, %cst_49 {dimension_numbers = #tpu.dot_dimension_numbers<[1], [0], [0], [1], [0, 0, 1, 1], [], []>} : vector<8x32xbf16>, vector<32x96xbf16>, vector<8x96xf32> -> vector<8x96xf32>
    %192 = vector.broadcast %6 : vector<1x96xf32> to vector<8x96xf32>
    %193 = arith.addf %191, %192 : vector<8x96xf32>
    %194 = vector.extract_strided_slice %189 {offsets = [0, 0], sizes = [8, 64], strides = [1, 1]} : vector<8x96xf32> to vector<8x64xf32>
    %195 = vector.extract_strided_slice %193 {offsets = [0, 0], sizes = [8, 64], strides = [1, 1]} : vector<8x96xf32> to vector<8x64xf32>
    %196 = arith.addf %194, %195 : vector<8x64xf32>
    %197 = arith.negf %196 : vector<8x64xf32>
    %198 = math.exp %197 : vector<8x64xf32>
    %cst_50 = arith.constant 1.000000e+00 : f32
    %199 = vector.broadcast %cst_50 : f32 to vector<8x64xf32>
    %200 = arith.addf %199, %198 : vector<8x64xf32>
    %201 = arith.divf %199, %200 : vector<8x64xf32>
    %202 = vector.extract_strided_slice %201 {offsets = [0, 0], sizes = [8, 32], strides = [1, 1]} : vector<8x64xf32> to vector<8x32xf32>
    %203 = vector.extract_strided_slice %201 {offsets = [0, 32], sizes = [8, 32], strides = [1, 1]} : vector<8x64xf32> to vector<8x32xf32>
    %204 = vector.extract_strided_slice %189 {offsets = [0, 64], sizes = [8, 32], strides = [1, 1]} : vector<8x96xf32> to vector<8x32xf32>
    %205 = vector.extract_strided_slice %193 {offsets = [0, 64], sizes = [8, 32], strides = [1, 1]} : vector<8x96xf32> to vector<8x32xf32>
    %206 = arith.mulf %202, %205 : vector<8x32xf32>
    %207 = arith.addf %204, %206 : vector<8x32xf32>
    %208 = math.tanh %207 : vector<8x32xf32>
    %cst_51 = arith.constant 1.000000e+00 : f32
    %209 = vector.broadcast %cst_51 : f32 to vector<8x32xf32>
    %210 = arith.subf %209, %203 : vector<8x32xf32>
    %211 = arith.mulf %210, %208 : vector<8x32xf32>
    %212 = arith.mulf %203, %158 : vector<8x32xf32>
    %213 = arith.addf %211, %212 : vector<8x32xf32>
    %214 = arith.truncf %213 : vector<8x32xf32> to vector<8x32xbf16>
    %cst_52 = arith.constant dense<0.000000e+00> : vector<8x96xf32>
    %215 = tpu.matmul %214, %4, %cst_52 {dimension_numbers = #tpu.dot_dimension_numbers<[1], [0], [0], [1], [0, 0, 1, 1], [], []>} : vector<8x32xbf16>, vector<32x96xbf16>, vector<8x96xf32> -> vector<8x96xf32>
    %216 = vector.broadcast %7 : vector<1x96xf32> to vector<8x96xf32>
    %217 = arith.addf %215, %216 : vector<8x96xf32>
    %218 = vector.extract_strided_slice %217 {offsets = [0, 0], sizes = [8, 64], strides = [1, 1]} : vector<8x96xf32> to vector<8x64xf32>
    %219 = vector.extract_strided_slice %187 {offsets = [0, 0], sizes = [8, 64], strides = [1, 1]} : vector<8x96xf32> to vector<8x64xf32>
    %220 = arith.addf %218, %219 : vector<8x64xf32>
    %221 = arith.negf %220 : vector<8x64xf32>
    %222 = math.exp %221 : vector<8x64xf32>
    %cst_53 = arith.constant 1.000000e+00 : f32
    %223 = vector.broadcast %cst_53 : f32 to vector<8x64xf32>
    %224 = arith.addf %223, %222 : vector<8x64xf32>
    %225 = arith.divf %223, %224 : vector<8x64xf32>
    %226 = vector.extract_strided_slice %225 {offsets = [0, 0], sizes = [8, 32], strides = [1, 1]} : vector<8x64xf32> to vector<8x32xf32>
    %227 = vector.extract_strided_slice %225 {offsets = [0, 32], sizes = [8, 32], strides = [1, 1]} : vector<8x64xf32> to vector<8x32xf32>
    %228 = vector.extract_strided_slice %217 {offsets = [0, 64], sizes = [8, 32], strides = [1, 1]} : vector<8x96xf32> to vector<8x32xf32>
    %229 = vector.extract_strided_slice %187 {offsets = [0, 64], sizes = [8, 32], strides = [1, 1]} : vector<8x96xf32> to vector<8x32xf32>
    %230 = arith.mulf %226, %229 : vector<8x32xf32>
    %231 = arith.addf %228, %230 : vector<8x32xf32>
    %232 = math.tanh %231 : vector<8x32xf32>
    %cst_54 = arith.constant 1.000000e+00 : f32
    %233 = vector.broadcast %cst_54 : f32 to vector<8x32xf32>
    %234 = arith.subf %233, %227 : vector<8x32xf32>
    %235 = arith.mulf %234, %232 : vector<8x32xf32>
    %236 = arith.mulf %227, %182 : vector<8x32xf32>
    %237 = arith.addf %235, %236 : vector<8x32xf32>
    %c24 = arith.constant 24 : index
    %c0_55 = arith.constant 0 : index
    %238 = vector.load %arg18[%c24, %c0_55] : memref<64x32xf32, #tpu.memory_space<vmem>>, vector<8x32xf32>
    tpu.vector_store %arg18[%c24, %c0_55], %237 {strides = array<i32>} : memref<64x32xf32, #tpu.memory_space<vmem>>, vector<8x32xf32>,
    %239 = arith.truncf %237 : vector<8x32xf32> to vector<8x32xbf16>
    %cst_56 = arith.constant dense<0.000000e+00> : vector<8x96xf32>
    %240 = tpu.matmul %239, %5, %cst_56 {dimension_numbers = #tpu.dot_dimension_numbers<[1], [0], [0], [1], [0, 0, 1, 1], [], []>} : vector<8x32xbf16>, vector<32x96xbf16>, vector<8x96xf32> -> vector<8x96xf32>
    %241 = vector.broadcast %8 : vector<1x96xf32> to vector<8x96xf32>
    %242 = arith.addf %240, %241 : vector<8x96xf32>
    %243 = vector.extract_strided_slice %16 {offsets = [4, 0, 0], sizes = [1, 8, 96], strides = [1, 1, 1]} : vector<8x8x96xf32> to vector<1x8x96xf32>
    %244 = vector.shape_cast %243 : vector<1x8x96xf32> to vector<8x96xf32>
    %245 = arith.truncf %213 : vector<8x32xf32> to vector<8x32xbf16>
    %cst_57 = arith.constant dense<0.000000e+00> : vector<8x96xf32>
    %246 = tpu.matmul %245, %3, %cst_57 {dimension_numbers = #tpu.dot_dimension_numbers<[1], [0], [0], [1], [0, 0, 1, 1], [], []>} : vector<8x32xbf16>, vector<32x96xbf16>, vector<8x96xf32> -> vector<8x96xf32>
    %247 = vector.broadcast %6 : vector<1x96xf32> to vector<8x96xf32>
    %248 = arith.addf %246, %247 : vector<8x96xf32>
    %249 = vector.extract_strided_slice %244 {offsets = [0, 0], sizes = [8, 64], strides = [1, 1]} : vector<8x96xf32> to vector<8x64xf32>
    %250 = vector.extract_strided_slice %248 {offsets = [0, 0], sizes = [8, 64], strides = [1, 1]} : vector<8x96xf32> to vector<8x64xf32>
    %251 = arith.addf %249, %250 : vector<8x64xf32>
    %252 = arith.negf %251 : vector<8x64xf32>
    %253 = math.exp %252 : vector<8x64xf32>
    %cst_58 = arith.constant 1.000000e+00 : f32
    %254 = vector.broadcast %cst_58 : f32 to vector<8x64xf32>
    %255 = arith.addf %254, %253 : vector<8x64xf32>
    %256 = arith.divf %254, %255 : vector<8x64xf32>
    %257 = vector.extract_strided_slice %256 {offsets = [0, 0], sizes = [8, 32], strides = [1, 1]} : vector<8x64xf32> to vector<8x32xf32>
    %258 = vector.extract_strided_slice %256 {offsets = [0, 32], sizes = [8, 32], strides = [1, 1]} : vector<8x64xf32> to vector<8x32xf32>
    %259 = vector.extract_strided_slice %244 {offsets = [0, 64], sizes = [8, 32], strides = [1, 1]} : vector<8x96xf32> to vector<8x32xf32>
    %260 = vector.extract_strided_slice %248 {offsets = [0, 64], sizes = [8, 32], strides = [1, 1]} : vector<8x96xf32> to vector<8x32xf32>
    %261 = arith.mulf %257, %260 : vector<8x32xf32>
    %262 = arith.addf %259, %261 : vector<8x32xf32>
    %263 = math.tanh %262 : vector<8x32xf32>
    %cst_59 = arith.constant 1.000000e+00 : f32
    %264 = vector.broadcast %cst_59 : f32 to vector<8x32xf32>
    %265 = arith.subf %264, %258 : vector<8x32xf32>
    %266 = arith.mulf %265, %263 : vector<8x32xf32>
    %267 = arith.mulf %258, %213 : vector<8x32xf32>
    %268 = arith.addf %266, %267 : vector<8x32xf32>
    %269 = arith.truncf %268 : vector<8x32xf32> to vector<8x32xbf16>
    %cst_60 = arith.constant dense<0.000000e+00> : vector<8x96xf32>
    %270 = tpu.matmul %269, %4, %cst_60 {dimension_numbers = #tpu.dot_dimension_numbers<[1], [0], [0], [1], [0, 0, 1, 1], [], []>} : vector<8x32xbf16>, vector<32x96xbf16>, vector<8x96xf32> -> vector<8x96xf32>
    %271 = vector.broadcast %7 : vector<1x96xf32> to vector<8x96xf32>
    %272 = arith.addf %270, %271 : vector<8x96xf32>
    %273 = vector.extract_strided_slice %272 {offsets = [0, 0], sizes = [8, 64], strides = [1, 1]} : vector<8x96xf32> to vector<8x64xf32>
    %274 = vector.extract_strided_slice %242 {offsets = [0, 0], sizes = [8, 64], strides = [1, 1]} : vector<8x96xf32> to vector<8x64xf32>
    %275 = arith.addf %273, %274 : vector<8x64xf32>
    %276 = arith.negf %275 : vector<8x64xf32>
    %277 = math.exp %276 : vector<8x64xf32>
    %cst_61 = arith.constant 1.000000e+00 : f32
    %278 = vector.broadcast %cst_61 : f32 to vector<8x64xf32>
    %279 = arith.addf %278, %277 : vector<8x64xf32>
    %280 = arith.divf %278, %279 : vector<8x64xf32>
    %281 = vector.extract_strided_slice %280 {offsets = [0, 0], sizes = [8, 32], strides = [1, 1]} : vector<8x64xf32> to vector<8x32xf32>
    %282 = vector.extract_strided_slice %280 {offsets = [0, 32], sizes = [8, 32], strides = [1, 1]} : vector<8x64xf32> to vector<8x32xf32>
    %283 = vector.extract_strided_slice %272 {offsets = [0, 64], sizes = [8, 32], strides = [1, 1]} : vector<8x96xf32> to vector<8x32xf32>
    %284 = vector.extract_strided_slice %242 {offsets = [0, 64], sizes = [8, 32], strides = [1, 1]} : vector<8x96xf32> to vector<8x32xf32>
    %285 = arith.mulf %281, %284 : vector<8x32xf32>
    %286 = arith.addf %283, %285 : vector<8x32xf32>
    %287 = math.tanh %286 : vector<8x32xf32>
    %cst_62 = arith.constant 1.000000e+00 : f32
    %288 = vector.broadcast %cst_62 : f32 to vector<8x32xf32>
    %289 = arith.subf %288, %282 : vector<8x32xf32>
    %290 = arith.mulf %289, %287 : vector<8x32xf32>
    %291 = arith.mulf %282, %237 : vector<8x32xf32>
    %292 = arith.addf %290, %291 : vector<8x32xf32>
    %c32 = arith.constant 32 : index
    %c0_63 = arith.constant 0 : index
    %293 = vector.load %arg18[%c32, %c0_63] : memref<64x32xf32, #tpu.memory_space<vmem>>, vector<8x32xf32>
    tpu.vector_store %arg18[%c32, %c0_63], %292 {strides = array<i32>} : memref<64x32xf32, #tpu.memory_space<vmem>>, vector<8x32xf32>,
    %294 = arith.truncf %292 : vector<8x32xf32> to vector<8x32xbf16>
    %cst_64 = arith.constant dense<0.000000e+00> : vector<8x96xf32>
    %295 = tpu.matmul %294, %5, %cst_64 {dimension_numbers = #tpu.dot_dimension_numbers<[1], [0], [0], [1], [0, 0, 1, 1], [], []>} : vector<8x32xbf16>, vector<32x96xbf16>, vector<8x96xf32> -> vector<8x96xf32>
    %296 = vector.broadcast %8 : vector<1x96xf32> to vector<8x96xf32>
    %297 = arith.addf %295, %296 : vector<8x96xf32>
    %298 = vector.extract_strided_slice %16 {offsets = [5, 0, 0], sizes = [1, 8, 96], strides = [1, 1, 1]} : vector<8x8x96xf32> to vector<1x8x96xf32>
    %299 = vector.shape_cast %298 : vector<1x8x96xf32> to vector<8x96xf32>
    %300 = arith.truncf %268 : vector<8x32xf32> to vector<8x32xbf16>
    %cst_65 = arith.constant dense<0.000000e+00> : vector<8x96xf32>
    %301 = tpu.matmul %300, %3, %cst_65 {dimension_numbers = #tpu.dot_dimension_numbers<[1], [0], [0], [1], [0, 0, 1, 1], [], []>} : vector<8x32xbf16>, vector<32x96xbf16>, vector<8x96xf32> -> vector<8x96xf32>
    %302 = vector.broadcast %6 : vector<1x96xf32> to vector<8x96xf32>
    %303 = arith.addf %301, %302 : vector<8x96xf32>
    %304 = vector.extract_strided_slice %299 {offsets = [0, 0], sizes = [8, 64], strides = [1, 1]} : vector<8x96xf32> to vector<8x64xf32>
    %305 = vector.extract_strided_slice %303 {offsets = [0, 0], sizes = [8, 64], strides = [1, 1]} : vector<8x96xf32> to vector<8x64xf32>
    %306 = arith.addf %304, %305 : vector<8x64xf32>
    %307 = arith.negf %306 : vector<8x64xf32>
    %308 = math.exp %307 : vector<8x64xf32>
    %cst_66 = arith.constant 1.000000e+00 : f32
    %309 = vector.broadcast %cst_66 : f32 to vector<8x64xf32>
    %310 = arith.addf %309, %308 : vector<8x64xf32>
    %311 = arith.divf %309, %310 : vector<8x64xf32>
    %312 = vector.extract_strided_slice %311 {offsets = [0, 0], sizes = [8, 32], strides = [1, 1]} : vector<8x64xf32> to vector<8x32xf32>
    %313 = vector.extract_strided_slice %311 {offsets = [0, 32], sizes = [8, 32], strides = [1, 1]} : vector<8x64xf32> to vector<8x32xf32>
    %314 = vector.extract_strided_slice %299 {offsets = [0, 64], sizes = [8, 32], strides = [1, 1]} : vector<8x96xf32> to vector<8x32xf32>
    %315 = vector.extract_strided_slice %303 {offsets = [0, 64], sizes = [8, 32], strides = [1, 1]} : vector<8x96xf32> to vector<8x32xf32>
    %316 = arith.mulf %312, %315 : vector<8x32xf32>
    %317 = arith.addf %314, %316 : vector<8x32xf32>
    %318 = math.tanh %317 : vector<8x32xf32>
    %cst_67 = arith.constant 1.000000e+00 : f32
    %319 = vector.broadcast %cst_67 : f32 to vector<8x32xf32>
    %320 = arith.subf %319, %313 : vector<8x32xf32>
    %321 = arith.mulf %320, %318 : vector<8x32xf32>
    %322 = arith.mulf %313, %268 : vector<8x32xf32>
    %323 = arith.addf %321, %322 : vector<8x32xf32>
    %324 = arith.truncf %323 : vector<8x32xf32> to vector<8x32xbf16>
    %cst_68 = arith.constant dense<0.000000e+00> : vector<8x96xf32>
    %325 = tpu.matmul %324, %4, %cst_68 {dimension_numbers = #tpu.dot_dimension_numbers<[1], [0], [0], [1], [0, 0, 1, 1], [], []>} : vector<8x32xbf16>, vector<32x96xbf16>, vector<8x96xf32> -> vector<8x96xf32>
    %326 = vector.broadcast %7 : vector<1x96xf32> to vector<8x96xf32>
    %327 = arith.addf %325, %326 : vector<8x96xf32>
    %328 = vector.extract_strided_slice %327 {offsets = [0, 0], sizes = [8, 64], strides = [1, 1]} : vector<8x96xf32> to vector<8x64xf32>
    %329 = vector.extract_strided_slice %297 {offsets = [0, 0], sizes = [8, 64], strides = [1, 1]} : vector<8x96xf32> to vector<8x64xf32>
    %330 = arith.addf %328, %329 : vector<8x64xf32>
    %331 = arith.negf %330 : vector<8x64xf32>
    %332 = math.exp %331 : vector<8x64xf32>
    %cst_69 = arith.constant 1.000000e+00 : f32
    %333 = vector.broadcast %cst_69 : f32 to vector<8x64xf32>
    %334 = arith.addf %333, %332 : vector<8x64xf32>
    %335 = arith.divf %333, %334 : vector<8x64xf32>
    %336 = vector.extract_strided_slice %335 {offsets = [0, 0], sizes = [8, 32], strides = [1, 1]} : vector<8x64xf32> to vector<8x32xf32>
    %337 = vector.extract_strided_slice %335 {offsets = [0, 32], sizes = [8, 32], strides = [1, 1]} : vector<8x64xf32> to vector<8x32xf32>
    %338 = vector.extract_strided_slice %327 {offsets = [0, 64], sizes = [8, 32], strides = [1, 1]} : vector<8x96xf32> to vector<8x32xf32>
    %339 = vector.extract_strided_slice %297 {offsets = [0, 64], sizes = [8, 32], strides = [1, 1]} : vector<8x96xf32> to vector<8x32xf32>
    %340 = arith.mulf %336, %339 : vector<8x32xf32>
    %341 = arith.addf %338, %340 : vector<8x32xf32>
    %342 = math.tanh %341 : vector<8x32xf32>
    %cst_70 = arith.constant 1.000000e+00 : f32
    %343 = vector.broadcast %cst_70 : f32 to vector<8x32xf32>
    %344 = arith.subf %343, %337 : vector<8x32xf32>
    %345 = arith.mulf %344, %342 : vector<8x32xf32>
    %346 = arith.mulf %337, %292 : vector<8x32xf32>
    %347 = arith.addf %345, %346 : vector<8x32xf32>
    %c40 = arith.constant 40 : index
    %c0_71 = arith.constant 0 : index
    %348 = vector.load %arg18[%c40, %c0_71] : memref<64x32xf32, #tpu.memory_space<vmem>>, vector<8x32xf32>
    tpu.vector_store %arg18[%c40, %c0_71], %347 {strides = array<i32>} : memref<64x32xf32, #tpu.memory_space<vmem>>, vector<8x32xf32>,
    %349 = arith.truncf %347 : vector<8x32xf32> to vector<8x32xbf16>
    %cst_72 = arith.constant dense<0.000000e+00> : vector<8x96xf32>
    %350 = tpu.matmul %349, %5, %cst_72 {dimension_numbers = #tpu.dot_dimension_numbers<[1], [0], [0], [1], [0, 0, 1, 1], [], []>} : vector<8x32xbf16>, vector<32x96xbf16>, vector<8x96xf32> -> vector<8x96xf32>
    %351 = vector.broadcast %8 : vector<1x96xf32> to vector<8x96xf32>
    %352 = arith.addf %350, %351 : vector<8x96xf32>
    %353 = vector.extract_strided_slice %16 {offsets = [6, 0, 0], sizes = [1, 8, 96], strides = [1, 1, 1]} : vector<8x8x96xf32> to vector<1x8x96xf32>
    %354 = vector.shape_cast %353 : vector<1x8x96xf32> to vector<8x96xf32>
    %355 = arith.truncf %323 : vector<8x32xf32> to vector<8x32xbf16>
    %cst_73 = arith.constant dense<0.000000e+00> : vector<8x96xf32>
    %356 = tpu.matmul %355, %3, %cst_73 {dimension_numbers = #tpu.dot_dimension_numbers<[1], [0], [0], [1], [0, 0, 1, 1], [], []>} : vector<8x32xbf16>, vector<32x96xbf16>, vector<8x96xf32> -> vector<8x96xf32>
    %357 = vector.broadcast %6 : vector<1x96xf32> to vector<8x96xf32>
    %358 = arith.addf %356, %357 : vector<8x96xf32>
    %359 = vector.extract_strided_slice %354 {offsets = [0, 0], sizes = [8, 64], strides = [1, 1]} : vector<8x96xf32> to vector<8x64xf32>
    %360 = vector.extract_strided_slice %358 {offsets = [0, 0], sizes = [8, 64], strides = [1, 1]} : vector<8x96xf32> to vector<8x64xf32>
    %361 = arith.addf %359, %360 : vector<8x64xf32>
    %362 = arith.negf %361 : vector<8x64xf32>
    %363 = math.exp %362 : vector<8x64xf32>
    %cst_74 = arith.constant 1.000000e+00 : f32
    %364 = vector.broadcast %cst_74 : f32 to vector<8x64xf32>
    %365 = arith.addf %364, %363 : vector<8x64xf32>
    %366 = arith.divf %364, %365 : vector<8x64xf32>
    %367 = vector.extract_strided_slice %366 {offsets = [0, 0], sizes = [8, 32], strides = [1, 1]} : vector<8x64xf32> to vector<8x32xf32>
    %368 = vector.extract_strided_slice %366 {offsets = [0, 32], sizes = [8, 32], strides = [1, 1]} : vector<8x64xf32> to vector<8x32xf32>
    %369 = vector.extract_strided_slice %354 {offsets = [0, 64], sizes = [8, 32], strides = [1, 1]} : vector<8x96xf32> to vector<8x32xf32>
    %370 = vector.extract_strided_slice %358 {offsets = [0, 64], sizes = [8, 32], strides = [1, 1]} : vector<8x96xf32> to vector<8x32xf32>
    %371 = arith.mulf %367, %370 : vector<8x32xf32>
    %372 = arith.addf %369, %371 : vector<8x32xf32>
    %373 = math.tanh %372 : vector<8x32xf32>
    %cst_75 = arith.constant 1.000000e+00 : f32
    %374 = vector.broadcast %cst_75 : f32 to vector<8x32xf32>
    %375 = arith.subf %374, %368 : vector<8x32xf32>
    %376 = arith.mulf %375, %373 : vector<8x32xf32>
    %377 = arith.mulf %368, %323 : vector<8x32xf32>
    %378 = arith.addf %376, %377 : vector<8x32xf32>
    %379 = arith.truncf %378 : vector<8x32xf32> to vector<8x32xbf16>
    %cst_76 = arith.constant dense<0.000000e+00> : vector<8x96xf32>
    %380 = tpu.matmul %379, %4, %cst_76 {dimension_numbers = #tpu.dot_dimension_numbers<[1], [0], [0], [1], [0, 0, 1, 1], [], []>} : vector<8x32xbf16>, vector<32x96xbf16>, vector<8x96xf32> -> vector<8x96xf32>
    %381 = vector.broadcast %7 : vector<1x96xf32> to vector<8x96xf32>
    %382 = arith.addf %380, %381 : vector<8x96xf32>
    %383 = vector.extract_strided_slice %382 {offsets = [0, 0], sizes = [8, 64], strides = [1, 1]} : vector<8x96xf32> to vector<8x64xf32>
    %384 = vector.extract_strided_slice %352 {offsets = [0, 0], sizes = [8, 64], strides = [1, 1]} : vector<8x96xf32> to vector<8x64xf32>
    %385 = arith.addf %383, %384 : vector<8x64xf32>
    %386 = arith.negf %385 : vector<8x64xf32>
    %387 = math.exp %386 : vector<8x64xf32>
    %cst_77 = arith.constant 1.000000e+00 : f32
    %388 = vector.broadcast %cst_77 : f32 to vector<8x64xf32>
    %389 = arith.addf %388, %387 : vector<8x64xf32>
    %390 = arith.divf %388, %389 : vector<8x64xf32>
    %391 = vector.extract_strided_slice %390 {offsets = [0, 0], sizes = [8, 32], strides = [1, 1]} : vector<8x64xf32> to vector<8x32xf32>
    %392 = vector.extract_strided_slice %390 {offsets = [0, 32], sizes = [8, 32], strides = [1, 1]} : vector<8x64xf32> to vector<8x32xf32>
    %393 = vector.extract_strided_slice %382 {offsets = [0, 64], sizes = [8, 32], strides = [1, 1]} : vector<8x96xf32> to vector<8x32xf32>
    %394 = vector.extract_strided_slice %352 {offsets = [0, 64], sizes = [8, 32], strides = [1, 1]} : vector<8x96xf32> to vector<8x32xf32>
    %395 = arith.mulf %391, %394 : vector<8x32xf32>
    %396 = arith.addf %393, %395 : vector<8x32xf32>
    %397 = math.tanh %396 : vector<8x32xf32>
    %cst_78 = arith.constant 1.000000e+00 : f32
    %398 = vector.broadcast %cst_78 : f32 to vector<8x32xf32>
    %399 = arith.subf %398, %392 : vector<8x32xf32>
    %400 = arith.mulf %399, %397 : vector<8x32xf32>
    %401 = arith.mulf %392, %347 : vector<8x32xf32>
    %402 = arith.addf %400, %401 : vector<8x32xf32>
    %c48 = arith.constant 48 : index
    %c0_79 = arith.constant 0 : index
    %403 = vector.load %arg18[%c48, %c0_79] : memref<64x32xf32, #tpu.memory_space<vmem>>, vector<8x32xf32>
    tpu.vector_store %arg18[%c48, %c0_79], %402 {strides = array<i32>} : memref<64x32xf32, #tpu.memory_space<vmem>>, vector<8x32xf32>,
    %404 = arith.truncf %402 : vector<8x32xf32> to vector<8x32xbf16>
    %cst_80 = arith.constant dense<0.000000e+00> : vector<8x96xf32>
    %405 = tpu.matmul %404, %5, %cst_80 {dimension_numbers = #tpu.dot_dimension_numbers<[1], [0], [0], [1], [0, 0, 1, 1], [], []>} : vector<8x32xbf16>, vector<32x96xbf16>, vector<8x96xf32> -> vector<8x96xf32>
    %406 = vector.broadcast %8 : vector<1x96xf32> to vector<8x96xf32>
    %407 = arith.addf %405, %406 : vector<8x96xf32>
    %408 = vector.extract_strided_slice %16 {offsets = [7, 0, 0], sizes = [1, 8, 96], strides = [1, 1, 1]} : vector<8x8x96xf32> to vector<1x8x96xf32>
    %409 = vector.shape_cast %408 : vector<1x8x96xf32> to vector<8x96xf32>
    %410 = arith.truncf %378 : vector<8x32xf32> to vector<8x32xbf16>
    %cst_81 = arith.constant dense<0.000000e+00> : vector<8x96xf32>
    %411 = tpu.matmul %410, %3, %cst_81 {dimension_numbers = #tpu.dot_dimension_numbers<[1], [0], [0], [1], [0, 0, 1, 1], [], []>} : vector<8x32xbf16>, vector<32x96xbf16>, vector<8x96xf32> -> vector<8x96xf32>
    %412 = vector.broadcast %6 : vector<1x96xf32> to vector<8x96xf32>
    %413 = arith.addf %411, %412 : vector<8x96xf32>
    %414 = vector.extract_strided_slice %409 {offsets = [0, 0], sizes = [8, 64], strides = [1, 1]} : vector<8x96xf32> to vector<8x64xf32>
    %415 = vector.extract_strided_slice %413 {offsets = [0, 0], sizes = [8, 64], strides = [1, 1]} : vector<8x96xf32> to vector<8x64xf32>
    %416 = arith.addf %414, %415 : vector<8x64xf32>
    %417 = arith.negf %416 : vector<8x64xf32>
    %418 = math.exp %417 : vector<8x64xf32>
    %cst_82 = arith.constant 1.000000e+00 : f32
    %419 = vector.broadcast %cst_82 : f32 to vector<8x64xf32>
    %420 = arith.addf %419, %418 : vector<8x64xf32>
    %421 = arith.divf %419, %420 : vector<8x64xf32>
    %422 = vector.extract_strided_slice %421 {offsets = [0, 0], sizes = [8, 32], strides = [1, 1]} : vector<8x64xf32> to vector<8x32xf32>
    %423 = vector.extract_strided_slice %421 {offsets = [0, 32], sizes = [8, 32], strides = [1, 1]} : vector<8x64xf32> to vector<8x32xf32>
    %424 = vector.extract_strided_slice %409 {offsets = [0, 64], sizes = [8, 32], strides = [1, 1]} : vector<8x96xf32> to vector<8x32xf32>
    %425 = vector.extract_strided_slice %413 {offsets = [0, 64], sizes = [8, 32], strides = [1, 1]} : vector<8x96xf32> to vector<8x32xf32>
    %426 = arith.mulf %422, %425 : vector<8x32xf32>
    %427 = arith.addf %424, %426 : vector<8x32xf32>
    %428 = math.tanh %427 : vector<8x32xf32>
    %cst_83 = arith.constant 1.000000e+00 : f32
    %429 = vector.broadcast %cst_83 : f32 to vector<8x32xf32>
    %430 = arith.subf %429, %423 : vector<8x32xf32>
    %431 = arith.mulf %430, %428 : vector<8x32xf32>
    %432 = arith.mulf %423, %378 : vector<8x32xf32>
    %433 = arith.addf %431, %432 : vector<8x32xf32>
    %434 = arith.truncf %433 : vector<8x32xf32> to vector<8x32xbf16>
    %cst_84 = arith.constant dense<0.000000e+00> : vector<8x96xf32>
    %435 = tpu.matmul %434, %4, %cst_84 {dimension_numbers = #tpu.dot_dimension_numbers<[1], [0], [0], [1], [0, 0, 1, 1], [], []>} : vector<8x32xbf16>, vector<32x96xbf16>, vector<8x96xf32> -> vector<8x96xf32>
    %436 = vector.broadcast %7 : vector<1x96xf32> to vector<8x96xf32>
    %437 = arith.addf %435, %436 : vector<8x96xf32>
    %438 = vector.extract_strided_slice %437 {offsets = [0, 0], sizes = [8, 64], strides = [1, 1]} : vector<8x96xf32> to vector<8x64xf32>
    %439 = vector.extract_strided_slice %407 {offsets = [0, 0], sizes = [8, 64], strides = [1, 1]} : vector<8x96xf32> to vector<8x64xf32>
    %440 = arith.addf %438, %439 : vector<8x64xf32>
    %441 = arith.negf %440 : vector<8x64xf32>
    %442 = math.exp %441 : vector<8x64xf32>
    %cst_85 = arith.constant 1.000000e+00 : f32
    %443 = vector.broadcast %cst_85 : f32 to vector<8x64xf32>
    %444 = arith.addf %443, %442 : vector<8x64xf32>
    %445 = arith.divf %443, %444 : vector<8x64xf32>
    %446 = vector.extract_strided_slice %445 {offsets = [0, 0], sizes = [8, 32], strides = [1, 1]} : vector<8x64xf32> to vector<8x32xf32>
    %447 = vector.extract_strided_slice %445 {offsets = [0, 32], sizes = [8, 32], strides = [1, 1]} : vector<8x64xf32> to vector<8x32xf32>
    %448 = vector.extract_strided_slice %437 {offsets = [0, 64], sizes = [8, 32], strides = [1, 1]} : vector<8x96xf32> to vector<8x32xf32>
    %449 = vector.extract_strided_slice %407 {offsets = [0, 64], sizes = [8, 32], strides = [1, 1]} : vector<8x96xf32> to vector<8x32xf32>
    %450 = arith.mulf %446, %449 : vector<8x32xf32>
    %451 = arith.addf %448, %450 : vector<8x32xf32>
    %452 = math.tanh %451 : vector<8x32xf32>
    %cst_86 = arith.constant 1.000000e+00 : f32
    %453 = vector.broadcast %cst_86 : f32 to vector<8x32xf32>
    %454 = arith.subf %453, %447 : vector<8x32xf32>
    %455 = arith.mulf %454, %452 : vector<8x32xf32>
    %456 = arith.mulf %447, %402 : vector<8x32xf32>
    %457 = arith.addf %455, %456 : vector<8x32xf32>
    %c56 = arith.constant 56 : index
    %c0_87 = arith.constant 0 : index
    %458 = vector.load %arg18[%c56, %c0_87] : memref<64x32xf32, #tpu.memory_space<vmem>>, vector<8x32xf32>
    tpu.vector_store %arg18[%c56, %c0_87], %457 {strides = array<i32>} : memref<64x32xf32, #tpu.memory_space<vmem>>, vector<8x32xf32>,
    %c0_88 = arith.constant 0 : index
    %c0_89 = arith.constant 0 : index
    %459 = vector.load %arg18[%c0_88, %c0_89] : memref<64x32xf32, #tpu.memory_space<vmem>>, vector<64x32xf32>
    %460 = arith.truncf %459 : vector<64x32xf32> to vector<64x32xbf16>
    %c0_90 = arith.constant 0 : index
    %c0_91 = arith.constant 0 : index
    %461 = vector.load %arg12[%c0_90, %c0_91] : memref<32x16xbf16, #tpu.memory_space<vmem>>, vector<32x16xbf16>
    %cst_92 = arith.constant dense<0.000000e+00> : vector<64x16xf32>
    %462 = tpu.matmul %460, %461, %cst_92 {dimension_numbers = #tpu.dot_dimension_numbers<[1], [0], [0], [1], [0, 0, 1, 1], [], []>} : vector<64x32xbf16>, vector<32x16xbf16>, vector<64x16xf32> -> vector<64x16xf32>
    %c0_93 = arith.constant 0 : index
    %c0_94 = arith.constant 0 : index
    %463 = vector.load %arg13[%c0_93, %c0_94] : memref<1x16xf32, #tpu.memory_space<vmem>>, vector<1x16xf32>
    %464 = vector.broadcast %463 : vector<1x16xf32> to vector<64x16xf32>
    %465 = arith.addf %462, %464 : vector<64x16xf32>
    %466 = vector.shape_cast %465 : vector<64x16xf32> to vector<8x8x16xf32>
    %c0_95 = arith.constant 0 : index
    %c0_96 = arith.constant 0 : index
    %c0_97 = arith.constant 0 : index
    %467 = vector.load %arg14[%c0_95, %c0_96, %c0_97] : memref<8x8x16xf32, #tpu.memory_space<vmem>>, vector<8x8x16xf32>
    tpu.vector_store %arg14[%c0_95, %c0_96, %c0_97], %466 {strides = array<i32>} : memref<8x8x16xf32, #tpu.memory_space<vmem>>, vector<8x8x16xf32>,
    %c0_98 = arith.constant 0 : index
    %c0_99 = arith.constant 0 : index
    %468 = vector.load %arg16[%c0_98, %c0_99] : memref<8x32xf32, #tpu.memory_space<vmem>>, vector<8x32xf32>
    tpu.vector_store %arg16[%c0_98, %c0_99], %433 {strides = array<i32>} : memref<8x32xf32, #tpu.memory_space<vmem>>, vector<8x32xf32>,
    %c0_100 = arith.constant 0 : index
    %c0_101 = arith.constant 0 : index
    %469 = vector.load %arg17[%c0_100, %c0_101] : memref<8x32xf32, #tpu.memory_space<vmem>>, vector<8x32xf32>
    tpu.vector_store %arg17[%c0_100, %c0_101], %457 {strides = array<i32>} : memref<8x32xf32, #tpu.memory_space<vmem>>, vector<8x32xf32>,
    %c0_i32_102 = arith.constant 0 : i32
    %470 = arith.cmpi eq, %arg1, %c0_i32_102 : i32
    %471 = arith.extui %470 : i1 to i32
    %c0_i32_103 = arith.constant 0 : i32
    %472 = arith.cmpi ne, %471, %c0_i32_103 : i32
    scf.if %472 {
      %c0_104 = arith.constant 0 : index
      %c0_105 = arith.constant 0 : index
      %c0_106 = arith.constant 0 : index
      %473 = vector.load %arg15[%c0_104, %c0_105, %c0_106] : memref<2x8x32xf32, #tpu.memory_space<vmem>>, vector<1x8x32xf32>
      %474 = vector.shape_cast %473 : vector<1x8x32xf32> to vector<8x32xf32>
      %475 = vector.shape_cast %433 : vector<8x32xf32> to vector<1x8x32xf32>
      tpu.vector_store %arg15[%c0_104, %c0_105, %c0_106], %475 {strides = array<i32>} : memref<2x8x32xf32, #tpu.memory_space<vmem>>, vector<1x8x32xf32>,
      %c1 = arith.constant 1 : index
      %c0_107 = arith.constant 0 : index
      %c0_108 = arith.constant 0 : index
      %476 = vector.load %arg15[%c1, %c0_107, %c0_108] : memref<2x8x32xf32, #tpu.memory_space<vmem>>, vector<1x8x32xf32>
      %477 = vector.shape_cast %476 : vector<1x8x32xf32> to vector<8x32xf32>
      %478 = vector.shape_cast %457 : vector<8x32xf32> to vector<1x8x32xf32>
      tpu.vector_store %arg15[%c1, %c0_107, %c0_108], %478 {strides = array<i32>} : memref<2x8x32xf32, #tpu.memory_space<vmem>>, vector<1x8x32xf32>,
    } else {
    }
    return
  }
  func.func @transform_0(%arg0: i32, %arg1: i32) -> (i32, i32, i32) {
    %c0_i32 = arith.constant 0 : i32
    %c0_i32_0 = arith.constant 0 : i32
    return %arg1, %arg0, %c0_i32 : i32, i32, i32
  }
  func.func @transform_1(%arg0: i32, %arg1: i32) -> (i32, i32, i32) {
    %c0_i32 = arith.constant 0 : i32
    %c0_i32_0 = arith.constant 0 : i32
    %c0_i32_1 = arith.constant 0 : i32
    return %c0_i32, %arg0, %c0_i32_0 : i32, i32, i32
  }
  func.func @transform_2(%arg0: i32, %arg1: i32) -> (i32, i32) {
    %c0_i32 = arith.constant 0 : i32
    %c0_i32_0 = arith.constant 0 : i32
    %c0_i32_1 = arith.constant 0 : i32
    return %c0_i32, %c0_i32_0 : i32, i32
  }
  func.func @transform_3(%arg0: i32, %arg1: i32) -> (i32, i32) {
    %c0_i32 = arith.constant 0 : i32
    %c0_i32_0 = arith.constant 0 : i32
    %c0_i32_1 = arith.constant 0 : i32
    return %c0_i32, %c0_i32_0 : i32, i32
  }
  func.func @transform_4(%arg0: i32, %arg1: i32) -> (i32, i32) {
    %c0_i32 = arith.constant 0 : i32
    %c0_i32_0 = arith.constant 0 : i32
    %c0_i32_1 = arith.constant 0 : i32
    return %c0_i32, %c0_i32_0 : i32, i32
  }
  func.func @transform_5(%arg0: i32, %arg1: i32) -> (i32, i32) {
    %c0_i32 = arith.constant 0 : i32
    %c0_i32_0 = arith.constant 0 : i32
    %c0_i32_1 = arith.constant 0 : i32
    return %c0_i32, %c0_i32_0 : i32, i32
  }
  func.func @transform_6(%arg0: i32, %arg1: i32) -> (i32, i32) {
    %c0_i32 = arith.constant 0 : i32
    %c0_i32_0 = arith.constant 0 : i32
    %c0_i32_1 = arith.constant 0 : i32
    return %c0_i32, %c0_i32_0 : i32, i32
  }
  func.func @transform_7(%arg0: i32, %arg1: i32) -> (i32, i32) {
    %c0_i32 = arith.constant 0 : i32
    %c0_i32_0 = arith.constant 0 : i32
    %c0_i32_1 = arith.constant 0 : i32
    return %c0_i32, %c0_i32_0 : i32, i32
  }
  func.func @transform_8(%arg0: i32, %arg1: i32) -> (i32, i32) {
    %c0_i32 = arith.constant 0 : i32
    %c0_i32_0 = arith.constant 0 : i32
    %c0_i32_1 = arith.constant 0 : i32
    return %c0_i32, %c0_i32_0 : i32, i32
  }
  func.func @transform_9(%arg0: i32, %arg1: i32) -> (i32, i32) {
    %c0_i32 = arith.constant 0 : i32
    %c0_i32_0 = arith.constant 0 : i32
    %c0_i32_1 = arith.constant 0 : i32
    return %c0_i32, %c0_i32_0 : i32, i32
  }
  func.func @transform_10(%arg0: i32, %arg1: i32) -> (i32, i32) {
    %c0_i32 = arith.constant 0 : i32
    %c0_i32_0 = arith.constant 0 : i32
    %c0_i32_1 = arith.constant 0 : i32
    return %c0_i32, %c0_i32_0 : i32, i32
  }
  func.func @transform_11(%arg0: i32, %arg1: i32) -> (i32, i32) {
    %c0_i32 = arith.constant 0 : i32
    %c0_i32_0 = arith.constant 0 : i32
    %c0_i32_1 = arith.constant 0 : i32
    return %c0_i32, %c0_i32_0 : i32, i32
  }
  func.func @transform_12(%arg0: i32, %arg1: i32) -> (i32, i32, i32) {
    %c0_i32 = arith.constant 0 : i32
    %c0_i32_0 = arith.constant 0 : i32
    return %arg1, %arg0, %c0_i32 : i32, i32, i32
  }
  func.func @transform_13(%arg0: i32, %arg1: i32) -> (i32, i32, i32) {
    %c0_i32 = arith.constant 0 : i32
    %c0_i32_0 = arith.constant 0 : i32
    %c0_i32_1 = arith.constant 0 : i32
    return %c0_i32, %arg0, %c0_i32_0 : i32, i32, i32
  }
}

</mosaic_0001>

<bundles_post_ra>
// kernel: tpu_custom_call.1
= control target key start
LH: loop header
LB: loop body
LE: loop exit
PB: predicated region body
PF: predicated region fallthrough
CT: control target
= control target key end

     0   :  { %19 = vsyncpa [#allocation6], 0  ;;  %s3356_s0 = inlined_call_operand.hbm [shape: bf16[8,8,16], index: 0, kind: input, shape index: {}]   ;;  %s3357_s1 = inlined_call_operand.vmem [shape: f32[2,8,32], index: 1, kind: input, shape index: {}]   ;;  %s3358_s2 = inlined_call_operand.hbm [shape: bf16[16,96], index: 2, kind: input, shape index: {}]   ;;  %s3359_s3 = inlined_call_operand.hbm [shape: bf16[32,96], index: 3, kind: input, shape index: {}]   ;;  %s3360_s4 = inlined_call_operand.hbm [shape: f32[1,96], index: 4, kind: input, shape index: {}]   ;;  %s3361_s5 = inlined_call_operand.hbm [shape: f32[1,96], index: 5, kind: input, shape index: {}]   ;;  %s3362_s6 = inlined_call_operand.vmem [shape: bf16[32,96], index: 6, kind: input, shape index: {}]   ;;  %s3363_s7 = inlined_call_operand.hbm [shape: bf16[32,96], index: 7, kind: input, shape index: {}]   ;;  %s3364_s8 = inlined_call_operand.hbm [shape: f32[1,96], index: 8, kind: input, shape index: {}]   ;;  %s3365_s9 = inlined_call_operand.hbm [shape: f32[1,96], index: 9, kind: input, shape index: {}]   ;;  %s3366_s10 = inlined_call_operand.vmem [shape: bf16[32,16], index: 10, kind: input, shape index: {}]   ;;  %s3367_s11 = inlined_call_operand.vmem [shape: f32[1,16], index: 11, kind: input, shape index: {}]   ;;  %s3368_s12 = inlined_call_operand.hbm [shape: f32[8,8,16], index: 12, kind: output, shape index: {0}]   ;;  %s3369_s13 = inlined_call_operand.hbm [shape: f32[2,8,32], index: 13, kind: output, shape index: {1}]  }
   0x1   :  { %20 = vsyncpa [#allocation9], 0 }
   0x2   :  { %21 = vsyncpa [#allocation12], 0 }
   0x3   :  { %22 = vsyncpa [#allocation15], 0 }
   0x4   :  { %23 = vsyncpa [#allocation18], 0 }
   0x5   :  { %24 = vsyncpa [#allocation7], 0 }
   0x6   :  { %25 = vsyncpa [#allocation21], 0  ;;  %s2772_s25 = smov [#allocation8]   ;;  %s2773_s27 = smov [#allocation11]  }
   0x7   :  { %s45_s26 = sshll.u32 %s2772_s25, 4  ;;  %s70_s28 = sshll.u32 %s2773_s27, 4  ;;  %s46_s26 = int_to_ptr.vmem [resolvable:$true] %s45_s26  ;;  %s71_s28 = int_to_ptr.vmem [resolvable:$true] %s70_s28 }
   0x8   :  { %s2566_s29 = scalar_lea.vmem %s46_s26, 128  ;;  %p2571_p1 = scmp.lt.s32.totalorder %s46_s26, %s46_s26 }
   0x9   :  { %p2567_p0 = scmp.ne.s32.totalorder %s46_s26, %s2566_s29  ;;  %p2572_p2 = scmp.lt.s32.totalorder %s2566_s29, %s2566_s29 }
   0xb   :  { %p2573_p3 = por %p2572_p2, %p2571_p1 }
   0xd   :  { %p2574_p4 = pnand %p2573_p3, %p2567_p0 }
   0xf   :  { %2577 = shalt.err (!%p2574_p4)
}
  0x10   :  { %s2774_s30 = smov 64   ;;  %s2775_s14 = smov 4  }
  0x11   :  { %51 = dma.hbm_to_vmem [thread:$0]  %s3358_s2, 128, %s46_s26, [#allocation9], %s2774_s30, %s2774_s30, %s2775_s14  }
  0x12   :  { %s2586_s17 = scalar_lea.vmem %s71_s28, 16  ;;  %s2590_s18 = scalar_lea.vmem %s71_s28, 32 }
  0x13   :  { %p2587_p5 = scmp.ne.s32.totalorder %s71_s28, %s2586_s17  ;;  %p2591_p6 = scmp.lt.s32.totalorder %s71_s28, %s71_s28 }
  0x14   :  { %p2592_p7 = scmp.lt.s32.totalorder %s2590_s18, %s2586_s17 }
  0x16   :  { %p2593_p8 = por %p2592_p7, %p2591_p6 }
  0x18   :  { %p2594_p9 = pnand %p2593_p8, %p2587_p5 }
  0x1a   :  { %2597 = shalt.err (!%p2594_p9)
}
  0x1b   :  { %73 = dma.hbm_to_vmem [thread:$0]  %s3360_s4, 16, %s71_s28, [#allocation12]  }
  0x1c   :  { %s2776_s21 = smov [#allocation14]   ;;  %s2777_s23 = smov [#allocation5]  }
  0x1d   :  { %s91_s22 = sshll.u32 %s2776_s21, 4  ;;  %s31_s24 = sshll.u32 %s2777_s23, 4  ;;  %s92_s22 = int_to_ptr.vmem [resolvable:$true] %s91_s22  ;;  %s32_s24 = int_to_ptr.vmem [resolvable:$true] %s31_s24 }
  0x1e   :  { %s2606_s25 = scalar_lea.vmem %s92_s22, 256  ;;  %p2611_p11 = scmp.lt.s32.totalorder %s92_s22, %s92_s22 }
  0x1f   :  { %p2607_p10 = scmp.ne.s32.totalorder %s92_s22, %s2606_s25  ;;  %p2612_p12 = scmp.lt.s32.totalorder %s2606_s25, %s2606_s25 }
  0x21   :  { %p2613_p13 = por %p2612_p12, %p2611_p11 }
  0x23   :  { %p2614_p0 = pnand %p2613_p13, %p2607_p10 }
  0x25   :  { %2617 = shalt.err (!%p2614_p0)
}
  0x26   :  { %97 = dma.hbm_to_vmem [thread:$0]  %s3363_s7, 256, %s92_s22, [#allocation15], %s2774_s30, %s2774_s30, %s2775_s14  }
  0x27   :  { %s2626_s4 = scalar_lea.vmem %s32_s24, 512  ;;  %p2631_p2 = scmp.lt.s32.totalorder %s32_s24, %s32_s24 }
  0x28   :  { %p2627_p1 = scmp.ne.s32.totalorder %s32_s24, %s2626_s4  ;;  %p2632_p3 = scmp.lt.s32.totalorder %s2626_s4, %s2626_s4 }
  0x2a   :  { %p2633_p4 = por %p2632_p3, %p2631_p2 }
  0x2c   :  { %p2634_p5 = pnand %p2633_p4, %p2627_p1 }
  0x2e   :  { %2637 = shalt.err (!%p2634_p5)
}
  0x2f   :  { %37 = dma.hbm_to_vmem [thread:$0]  %s3356_s0, 512, %s32_s24, [#allocation6], %s2774_s30, %s2774_s30, %s2775_s14  }
  0x30   :  { %s2778_s29 = smov [#allocation10]   ;;  %s2779_s16 = smov [#allocation13]  }
  0x31   :  { %s57_s15 = sshll.u32 %s2778_s29, 4  ;;  %s80_s17 = sshll.u32 %s2779_s16, 4  ;;  %s58_s15 = int_to_ptr.vmem [resolvable:$true] %s57_s15  ;;  %s81_s17 = int_to_ptr.vmem [resolvable:$true] %s80_s17 }
  0x32   :  { %s2646_s7 = scalar_lea.vmem %s58_s15, 256  ;;  %p2651_p7 = scmp.lt.s32.totalorder %s58_s15, %s58_s15 }
  0x33   :  { %p2647_p6 = scmp.ne.s32.totalorder %s58_s15, %s2646_s7  ;;  %p2652_p8 = scmp.lt.s32.totalorder %s2646_s7, %s2646_s7 }
  0x35   :  { %p2653_p9 = por %p2652_p8, %p2651_p7 }
  0x37   :  { %p2654_p10 = pnand %p2653_p9, %p2647_p6 }
  0x39   :  { %2657 = shalt.err (!%p2654_p10)
}
  0x3a   :  { %63 = dma.hbm_to_vmem [thread:$0]  %s3359_s3, 256, %s58_s15, [#allocation9], %s2774_s30, %s2774_s30, %s2775_s14  }
  0x3b   :  { %s2666_s0 = scalar_lea.vmem %s81_s17, 16  ;;  %s2670_s20 = scalar_lea.vmem %s81_s17, 32 }
  0x3c   :  { %p2667_p11 = scmp.ne.s32.totalorder %s81_s17, %s2666_s0  ;;  %p2671_p12 = scmp.lt.s32.totalorder %s81_s17, %s81_s17 }
  0x3d   :  { %p2672_p13 = scmp.lt.s32.totalorder %s2670_s20, %s2666_s0 }
  0x3f   :  { %p2673_p0 = por %p2672_p13, %p2671_p12 }
  0x41   :  { %p2674_p1 = pnand %p2673_p0, %p2667_p11 }
  0x43   :  { %2677 = shalt.err (!%p2674_p1)
}
  0x44   :  { %83 = dma.hbm_to_vmem [thread:$0]  %s3361_s5, 16, %s81_s17, [#allocation12]  }
  0x45   :  { %s2780_s23 = smov [#allocation16]   ;;  %s2781_s25 = smov [#allocation17]  }
  0x46   :  { %s104_s24 = sshll.u32 %s2780_s23, 4  ;;  %s114_s2 = sshll.u32 %s2781_s25, 4  ;;  %s105_s24 = int_to_ptr.vmem [resolvable:$true] %s104_s24  ;;  %s115_s2 = int_to_ptr.vmem [resolvable:$true] %s114_s2 }
  0x47   :  { %s2686_s26 = scalar_lea.vmem %s105_s24, 16  ;;  %s2690_s3 = scalar_lea.vmem %s105_s24, 32 }
  0x48   :  { %p2687_p2 = scmp.ne.s32.totalorder %s105_s24, %s2686_s26  ;;  %p2691_p3 = scmp.lt.s32.totalorder %s105_s24, %s105_s24 }
  0x49   :  { %p2692_p4 = scmp.lt.s32.totalorder %s2690_s3, %s2686_s26 }
  0x4b   :  { %p2693_p5 = por %p2692_p4, %p2691_p3 }
  0x4d   :  { %p2694_p6 = pnand %p2693_p5, %p2687_p2 }
  0x4f   :  { %2697 = shalt.err (!%p2694_p6)
}
  0x50   :  { %107 = dma.hbm_to_vmem [thread:$0]  %s3364_s8, 16, %s105_s24, [#allocation15]  }
  0x51   :  { %s2706_s27 = scalar_lea.vmem %s115_s2, 16  ;;  %s2710_s5 = scalar_lea.vmem %s115_s2, 32 }
  0x52   :  { %p2707_p7 = scmp.ne.s32.totalorder %s115_s2, %s2706_s27  ;;  %p2711_p8 = scmp.lt.s32.totalorder %s115_s2, %s115_s2 }
  0x53   :  { %p2712_p9 = scmp.lt.s32.totalorder %s2710_s5, %s2706_s27 }
  0x55   :  { %p2713_p10 = por %p2712_p9, %p2711_p8 }
  0x57   :  { %p2714_p11 = pnand %p2713_p10, %p2707_p7 }
  0x59   :  { %2717 = shalt.err (!%p2714_p11)
}
  0x5a   :  { %117 = dma.hbm_to_vmem [thread:$0]  %s3365_s9, 16, %s115_s2, [#allocation18]  }
  0x5b   :  { %2758 = dma.done.wait [#allocation6], 512  }
  0x5c   :  { %2759 = vsyncadd [#allocation6], 4294966784 }
  0x5d   :  { %2760 = dma.done.wait [#allocation9], 384  }
  0x5e   :  { %2761 = vsyncadd [#allocation9], 4294966912 }
  0x5f   :  { %2762 = dma.done.wait [#allocation12], 32  }
  0x60   :  { %2763 = vsyncadd [#allocation12], 4294967264 }
  0x61   :  { %2764 = dma.done.wait [#allocation15], 272  }
  0x62   :  { %2765 = vsyncadd [#allocation15], 4294967024 }
  0x63   :  { %2766 = dma.done.wait [#allocation18], 16  }
  0x64   :  { %2767 = vsyncadd [#allocation18], 4294967280  ;;  %v2440_v0 = vld [vmem:[#allocation8] sm:$0xff]   ;;  %vm215_vm0 = vcmask 130048   ;;  %v2441_v1 = vld [vmem:[#allocation5 + $0x10] sm:$0xff]   ;;  %vm152_vm1 = vcmask 261120  }
  0x65   :  { %2420 = vmatprep.subr.bf16.mxu1 %v2440_v0  ;;  %v2442_v2 = vld [vmem:[#allocation5 + $0x18] sm:$0xff]   ;;  %2206 = vmatprep.subr.bf16.mxu0 %v2440_v0  ;;  %v2897_v3 = vld [vmem:[#allocation14 + $0x8] sm:$0xff]   ;;  %v2782_v4 = vmov 0.0   ;;  %vm2783_vm2 = vmmov 0   ;;  %v151_v9 = vld [vmem:[%s3357_s1] sm:$0xff]  ;;  %s2784_s19 = smov 96  }
  0x66   :  { %2421 = vmatpush3.bf16.msra.mxu1 %v2440_v0  ;;  %2212 = vmatprep.mubr.msk.bf16.mxu1 %vm215_vm0, %v2441_v1  ;;  %v2056_v5 = vld [vmem:[%s3357_s1 + $0x8] sm:$0xff]  ;;  %v2447_v7 = vld [vmem:[#allocation5] sm:$0xff]   ;;  %v2448_v8 = vld [vmem:[#allocation5 + $0x8] sm:$0xff]   ;;  %153 = vst.msk [vmem:[#allocation2] sm:$0xff] %vm152_vm1, %v151_v9  ;;  %s2785_s0 = smov 32  }
  0x67   :  { %2216 = vmatprep.subr.bf16.mxu1 %v2782_v4  ;;  %2207 = vmatpush3.bf16.msra.mxu0 %v2440_v0  ;;  %156 = vst.msk [vmem:[#allocation3] sm:$0xff] %vm152_vm1, %v2056_v5  ;;  %v2907_v6 = vld [vmem:[#allocation14] sm:$0xff]   ;;  %v2924_v11 = vld [vmem:[#allocation10 + $0x8] sm:$0xff]   ;;  %v2930_v13 = vld [vmem:[#allocation10] sm:$0xff]  }
  0x68   :  { %2232 = vmatprep.subr.bf16.mxu0 %v2782_v4  ;;  %2208 = vmatprep.mubr.msk.bf16.mxu0 %vm215_vm0, %v2447_v7  ;;  %v2944_v16 = vld [vmem:[#allocation11] ss:$0 sm:$0xff]  ;;  %v2964_v34 = vld [vmem:[#allocation13] ss:$0 sm:$0xff]  ;;  %v2979_v52 = vld [vmem:[%s3362_s6] sm:$0xff]  }
  0x69   :  { %2213 = vmatmul.mubr.msk.bf16.vlgmr.msra.gmra.mxu1 %vm215_vm0, %v2442_v2  ;;  %v2973_v50 = vld [vmem:[%s3362_s6 + $0x8] sm:$0xff]   ;;  %v2983_v53 = vld [vmem:[#allocation17] ss:$0 sm:$0xff]  ;;  %v3009_v0 = vld [vmem:[#allocation16] ss:$0 sm:$0xff] }
  0x6a   :  { %2217 = vmatpush3.bf16.msra.mxu1 %v2897_v3  ;;  %2220 = vmatprep.mubr.msk.bf16.mxu1 %vm2783_vm2, %v2782_v4 }
  0x6b   :  { %2218 = vmatprep.subr.bf16.mxu1 %v2782_v4  ;;  %2209 = vmatmul.mubr.msk.bf16.vlgmr.msra.gmra.mxu0 %vm215_vm0, %v2448_v8 }
  0x6c   :  { %2236 = vmatprep.mubr.msk.bf16.mxu0 %vm2783_vm2, %v2782_v4  ;;  %2233 = vmatpush3.bf16.msra.mxu0 %v2973_v50 }
  0x6d   :  { %v293_v14 = vld [vmem:[#allocation2] sm:$0xff]  ;;  %2234 = vmatprep.subr.bf16.mxu0 %v2782_v4 }
  0x6e   :  { %2219 = vmatpush3.bf16.msra.mxu1 %v2907_v6  ;;  %v2922_v10 = vld [vmem:[#allocation3] sm:$0xff]  ;;  %v358_v15 = vpack.c.bf16 %v293_v14, %v293_v14 }
  0x6f   :  { %2224 = vmatprep.subr.bf16.mxu1 %v2782_v4  ;;  %v295_v12 = vpack.c.bf16 %v2922_v10, %v2922_v10 }
  0x70   :  { %2235 = vmatpush3.bf16.msra.mxu0 %v2979_v52 }
  0x71   :  { %2221 = vmatmul.mubr.msk.bf16.vlgmr.msra.gmra.mxu1 %vm152_vm1, %v295_v12  ;;  %2248 = vmatprep.subr.bf16.mxu0 %v2782_v4 }
  0x72   :  { %2225 = vmatpush3.bf16.msra.mxu1 %v2924_v11  ;;  %2228 = vmatprep.mubr.msk.bf16.mxu1 %vm2783_vm2, %v2782_v4 }
  0x73   :  { %2226 = vmatprep.subr.bf16.mxu1 %v2782_v4 }
  0x76   :  { %2227 = vmatpush3.bf16.msra.mxu1 %v2930_v13 }
  0x77   :  { %2240 = vmatprep.subr.bf16.mxu1 %v2782_v4 }
  0x79   :  { %2229 = vmatmul.mubr.msk.bf16.vlgmr.msra.gmra.mxu1 %vm152_vm1, %v358_v15 }
  0x7a   :  { %2241 = vmatpush3.bf16.msra.mxu1 %v2897_v3  ;;  %2244 = vmatprep.mubr.msk.bf16.mxu1 %vm2783_vm2, %v2782_v4 }
  0x7b   :  { %2242 = vmatprep.subr.bf16.mxu1 %v2782_v4 }
  0x7e   :  { %2243 = vmatpush3.bf16.msra.mxu1 %v2907_v6 }
  0x7f   :  { %2256 = vmatprep.subr.bf16.mxu1 %v2782_v4 }
 0x129   :  { %v2214_v17 = vpop.f32.mrf.mxu1 }
 0x12a   :  { %v2947_v18 = vadd.f32 %v2214_v17, %v2944_v16 }
 0x12b   :  { %v278_v19 = vpop.f32.mrf.mxu1  ;;  %v2210_v23 = vpop.f32.mrf.mxu0 }
 0x12c   :  { %v2950_v20 = vadd.f32 %v2944_v16, %v278_v19  ;;  %v2956_v25 = vadd.f32 %v2210_v23, %v2944_v16 }
 0x12d   :  { %v2215_v21 = vpop.f32.mrf.mxu1  ;;  %v262_v27 = vpop.f32.mrf.mxu0 }
 0x12e   :  { %v2953_v22 = vadd.f32 %v2215_v21, %v2944_v16  ;;  %v263_v40 = vadd.f32 %v2944_v16, %v262_v27 }
 0x12f   :  { %v281_v24 = vpop.f32.mrf.mxu1  ;;  %v2211_v28 = vpop.f32.mrf.mxu0 }
 0x130   :  { %v2959_v26 = vadd.f32 %v2944_v16, %v281_v24  ;;  %v2962_v30 = vadd.f32 %v2211_v28, %v2944_v16 }
 0x131   :  { %v352_v29 = vpop.f32.mrf.mxu1  ;;  %v265_v63 = vpop.f32.mrf.mxu0 }
 0x132   :  { %v353_v54 = vadd.f32 %v2983_v53, %v352_v29 }
 0x133   :  { %v2222_v31 = vpop.f32.mrf.mxu1 }
 0x134   :  { %v266_v31 = vadd.f32 %v2944_v16, %v265_v63 }
 0x135   :  { %v355_v32 = vpop.f32.mrf.mxu1 }
 0x137   :  { %v2223_v33 = vpop.f32.mrf.mxu1 }
 0x139   :  { %v414_v35 = vpop.f32.mrf.mxu1 }
 0x13a   :  { %v415_v36 = vadd.f32 %v2964_v34, %v414_v35 }
 0x13b   :  { %v2230_v37 = vpop.f32.mrf.mxu1 }
 0x13c   :  { %428 = vrot.lane.b32.xlu0 %v415_v36, %s2774_s30  ;;  %v420_v41 = vadd.f32 %v415_v36, %v263_v40 }
 0x13d   :  { %v417_v38 = vpop.f32.mrf.mxu1 }
 0x13e   :  { %v2075_v42 = vmul.f32 -1.442695, %v420_v41 }
 0x13f   :  { %v2231_v39 = vpop.f32.mrf.mxu1 }
 0x140   :  { %2453 = vpow2.f32 %v2075_v42 }
 0x14d   :  { %v2454_v43 = vpop.eup %2453 }
 0x14e   :  { %v424_v44 = vadd.f32 1.0, %v2454_v43 }
 0x150   :  { %2455 = vrcp.f32 %v424_v44 }
 0x15d   :  { %v2456_v45 = vpop.eup %2455 }
 0x15e   :  { %v438_v56 = vsub.f32 1.0, %v2456_v45 }
 0x1ae   :  { %v429_v46 = vpop.permute.xlu0 %428 }
 0x1af   :  { %v431_v47 = vmul.f32 %v2456_v45, %v429_v46 }
 0x1b1   :  { %433 = vrot.lane.b32.xlu0 %v431_v47, %s2774_s30 }
 0x223   :  { %v434_v48 = vpop.permute.xlu0 %433 }
 0x224   :  { %v436_v49 = vadd.f32 %v434_v48, %v263_v40 }
 0x226   :  { %2457 = vtanh.f32 %v436_v49 }
 0x233   :  { %v2458_v51 = vpop.eup %2457 }
 0x234   :  { %440 = vrot.lane.b32.xlu1 %v2458_v51, %s2784_s19 }
 0x238   :  { %445 = vrot.lane.b32.xlu1 %v293_v14, %s2785_s0 }
 0x23c   :  { %523 = vrot.lane.b32.xlu1 %v353_v54, %s2774_s30 }
 0x2a6   :  { %v441_v55 = vpop.permute.xlu1 %440 }
 0x2a7   :  { %v443_v58 = vmul.f32 %v441_v55, %v438_v56 }
 0x2aa   :  { %v446_v57 = vpop.permute.xlu1 %445 }
 0x2ab   :  { %v448_v59 = vmul.f32 %v2456_v45, %v446_v57 }
 0x2ad   :  { %v2990_v60 = vadd.f32 %v448_v59, %v443_v58 }
 0x2ae   :  { %v524_v28 = vpop.permute.xlu1 %523 }
 0x2af   :  { %v450_v61 = vpack.c.bf16 %v2990_v60, %v2990_v60 }
 0x2b1   :  { %458 = vrot.lane.b32.xlu0 %v450_v61, %s2784_s19 }
 0x323   :  { %v459_v62 = vpop.permute.xlu0 %458 }
 0x324   :  { %2237 = vmatmul.mubr.msk.bf16.vlgmr.msra.gmra.mxu0 %vm152_vm1, %v459_v62 }
 0x325   :  { %2249 = vmatpush3.bf16.msra.mxu0 %v2924_v11  ;;  %2252 = vmatprep.mubr.msk.bf16.mxu0 %vm2783_vm2, %v2782_v4 }
 0x326   :  { %2250 = vmatprep.subr.bf16.mxu0 %v2782_v4 }
 0x329   :  { %2251 = vmatpush3.bf16.msra.mxu0 %v2930_v13 }
 0x32a   :  { %2264 = vmatprep.subr.bf16.mxu0 %v2782_v4 }
 0x32c   :  { %2253 = vmatmul.mubr.msk.bf16.vlgmr.msra.gmra.mxu0 %vm152_vm1, %v459_v62 }
 0x32d   :  { %2265 = vmatpush3.bf16.msra.mxu0 %v2897_v3  ;;  %2268 = vmatprep.mubr.msk.bf16.mxu0 %vm2783_vm2, %v2782_v4 }
 0x32e   :  { %2266 = vmatprep.subr.bf16.mxu0 %v2782_v4 }
 0x331   :  { %2267 = vmatpush3.bf16.msra.mxu0 %v2907_v6 }
 0x332   :  { %2280 = vmatprep.subr.bf16.mxu0 %v2782_v4 }
 0x3e4   :  { %v509_v1 = vpop.f32.mrf.mxu0 }
 0x3e5   :  { %v510_v2 = vadd.f32 %v3009_v0, %v509_v1 }
 0x3e6   :  { %v2238_v5 = vpop.f32.mrf.mxu0 }
 0x3e7   :  { %v515_v7 = vadd.f32 %v510_v2, %v353_v54 }
 0x3e8   :  { %v512_v8 = vpop.f32.mrf.mxu0 }
 0x3e9   :  { %v2080_v9 = vmul.f32 -1.442695, %v515_v7 }
 0x3ea   :  { %v2239_v12 = vpop.f32.mrf.mxu0 }
 0x3eb   :  { %2459 = vpow2.f32 %v2080_v9 }
 0x3ec   :  { %v631_v14 = vpop.f32.mrf.mxu0 }
 0x3ed   :  { %v632_v15 = vadd.f32 %v2964_v34, %v631_v14 }
 0x3ee   :  { %v2254_v17 = vpop.f32.mrf.mxu0 }
 0x3ef   :  { %645 = vrot.lane.b32.xlu0 %v632_v15, %s2774_s30  ;;  %v637_v32 = vadd.f32 %v632_v15, %v266_v31 }
 0x3f0   :  { %v634_v19 = vpop.f32.mrf.mxu0 }
 0x3f1   :  { %v2083_v33 = vmul.f32 -1.442695, %v637_v32 }
 0x3f2   :  { %v2255_v21 = vpop.f32.mrf.mxu0 }
 0x3f8   :  { %v2460_v23 = vpop.eup %2459 }
 0x3f9   :  { %v519_v24 = vadd.f32 1.0, %v2460_v23 }
 0x3fb   :  { %2461 = vrcp.f32 %v519_v24 }
 0x3fc   :  { %2463 = vpow2.f32 %v2083_v33 }
 0x408   :  { %v2462_v27 = vpop.eup %2461 }
 0x409   :  { %v526_v29 = vmul.f32 %v2462_v27, %v524_v28  ;;  %v2464_v35 = vpop.eup %2463  ;;  %v533_v46 = vsub.f32 1.0, %v2462_v27 }
 0x40a   :  { %v641_v36 = vadd.f32 1.0, %v2464_v35 }
 0x40b   :  { %528 = vrot.lane.b32.xlu1 %v526_v29, %s2774_s30 }
 0x40c   :  { %2465 = vrcp.f32 %v641_v36 }
 0x419   :  { %v2466_v37 = vpop.eup %2465 }
 0x41a   :  { %v655_v54 = vsub.f32 1.0, %v2466_v37  ;;  %v661_v56 = vmul.f32 %v2466_v37, %v2990_v60 }
 0x461   :  { %v646_v38 = vpop.permute.xlu0 %645 }
 0x462   :  { %v648_v39 = vmul.f32 %v2466_v37, %v646_v38 }
 0x464   :  { %650 = vrot.lane.b32.xlu0 %v648_v39, %s2774_s30 }
 0x468   :  { %540 = vrot.lane.b32.xlu0 %v2922_v10, %s2785_s0 }
 0x47d   :  { %v529_v40 = vpop.permute.xlu1 %528 }
 0x47e   :  { %v531_v41 = vadd.f32 %v529_v40, %v510_v2 }
 0x480   :  { %2467 = vtanh.f32 %v531_v41 }
 0x48d   :  { %v2468_v42 = vpop.eup %2467 }
 0x48e   :  { %535 = vrot.lane.b32.xlu1 %v2468_v42, %s2784_s19 }
 0x4d6   :  { %v651_v16 = vpop.permute.xlu0 %650 }
 0x4d7   :  { %v653_v43 = vadd.f32 %v651_v16, %v266_v31 }
 0x4d9   :  { %2469 = vtanh.f32 %v653_v43 }
 0x4da   :  { %v541_v45 = vpop.permute.xlu0 %540 }
 0x4db   :  { %v543_v48 = vmul.f32 %v2462_v27, %v541_v45 }
 0x4e6   :  { %v2470_v44 = vpop.eup %2469 }
 0x4e7   :  { %657 = vrot.lane.b32.xlu1 %v2470_v44, %s2784_s19 }
 0x500   :  { %v536_v47 = vpop.permute.xlu1 %535 }
 0x501   :  { %v538_v49 = vmul.f32 %v536_v47, %v533_v46 }
 0x503   :  { %v3021_v51 = vadd.f32 %v543_v48, %v538_v49 }
 0x505   :  { %v550_v10 = vpack.c.bf16 %v3021_v51, %v3021_v51 }
 0x507   :  { %552 = vrot.lane.b32.xlu0 %v550_v10, %s2784_s19 }
 0x559   :  { %v658_v55 = vpop.permute.xlu1 %657 }
 0x55a   :  { %v660_v57 = vmul.f32 %v658_v55, %v655_v54 }
 0x55c   :  { %v3027_v58 = vadd.f32 %v661_v56, %v660_v57 }
 0x55e   :  { %v663_v59 = vpack.c.bf16 %v3027_v58, %v3027_v58 }
 0x560   :  { %665 = vrot.lane.b32.xlu1 %v663_v59, %s2784_s19 }
 0x579   :  { %v553_v61 = vpop.permute.xlu0 %552 }
 0x57a   :  { %2245 = vmatmul.mubr.msk.bf16.vlgmr.msra.gmra.mxu1 %vm152_vm1, %v553_v61 }
 0x57b   :  { %2257 = vmatpush3.bf16.msra.mxu1 %v2973_v50  ;;  %2260 = vmatprep.mubr.msk.bf16.mxu1 %vm2783_vm2, %v2782_v4 }
 0x57c   :  { %2258 = vmatprep.subr.bf16.mxu1 %v2782_v4 }
 0x57f   :  { %2259 = vmatpush3.bf16.msra.mxu1 %v2979_v52 }
 0x580   :  { %2272 = vmatprep.subr.bf16.mxu1 %v2782_v4 }
 0x5d2   :  { %v666_v60 = vpop.permute.xlu1 %665 }
 0x5d3   :  { %2261 = vmatmul.mubr.msk.bf16.vlgmr.msra.gmra.mxu1 %vm152_vm1, %v666_v60 }
 0x5d4   :  { %2273 = vmatpush3.bf16.msra.mxu1 %v2924_v11  ;;  %2276 = vmatprep.mubr.msk.bf16.mxu1 %vm2783_vm2, %v2782_v4 }
 0x5d5   :  { %2274 = vmatprep.subr.bf16.mxu1 %v2782_v4 }
 0x5d8   :  { %2275 = vmatpush3.bf16.msra.mxu1 %v2930_v13 }
 0x5d9   :  { %2288 = vmatprep.subr.bf16.mxu1 %v2782_v4 }
 0x5db   :  { %2277 = vmatmul.mubr.msk.bf16.vlgmr.msra.gmra.mxu1 %vm152_vm1, %v666_v60 }
 0x5dc   :  { %2289 = vmatpush3.bf16.msra.mxu1 %v2897_v3  ;;  %2292 = vmatprep.mubr.msk.bf16.mxu1 %vm2783_vm2, %v2782_v4 }
 0x5dd   :  { %2290 = vmatprep.subr.bf16.mxu1 %v2782_v4 }
 0x5e0   :  { %2291 = vmatpush3.bf16.msra.mxu1 %v2907_v6 }
 0x5e1   :  { %2304 = vmatprep.subr.bf16.mxu1 %v2782_v4 }
 0x63a   :  { %v591_v62 = vpop.f32.mrf.mxu1 }
 0x63b   :  { %v592_v63 = vadd.f32 %v2983_v53, %v591_v62 }
 0x63c   :  { %v2246_v1 = vpop.f32.mrf.mxu1 }
 0x63d   :  { %718 = vrot.lane.b32.xlu0 %v592_v63, %s2774_s30 }
 0x63e   :  { %v594_v2 = vpop.f32.mrf.mxu1 }
 0x640   :  { %v2247_v5 = vpop.f32.mrf.mxu1 }
 0x693   :  { %v704_v7 = vpop.f32.mrf.mxu1 }
 0x694   :  { %v705_v8 = vadd.f32 %v3009_v0, %v704_v7 }
 0x695   :  { %v2262_v9 = vpop.f32.mrf.mxu1 }
 0x696   :  { %v710_v12 = vadd.f32 %v705_v8, %v592_v63 }
 0x697   :  { %v707_v14 = vpop.f32.mrf.mxu1 }
 0x698   :  { %v2085_v15 = vmul.f32 -1.442695, %v710_v12 }
 0x699   :  { %v2263_v17 = vpop.f32.mrf.mxu1 }
 0x69a   :  { %2471 = vpow2.f32 %v2085_v15 }
 0x69b   :  { %v822_v19 = vpop.f32.mrf.mxu1 }
 0x69c   :  { %v823_v21 = vadd.f32 %v2964_v34, %v822_v19 }
 0x69d   :  { %v2278_v23 = vpop.f32.mrf.mxu1 }
 0x69e   :  { %836 = vrot.lane.b32.xlu1 %v823_v21, %s2774_s30  ;;  %v828_v35 = vadd.f32 %v823_v21, %v2956_v25 }
 0x69f   :  { %v825_v24 = vpop.f32.mrf.mxu1 }
 0x6a0   :  { %v2088_v36 = vmul.f32 -1.442695, %v828_v35 }
 0x6a1   :  { %v2279_v27 = vpop.f32.mrf.mxu1 }
 0x6a7   :  { %v2472_v28 = vpop.eup %2471 }
 0x6a8   :  { %v714_v29 = vadd.f32 1.0, %v2472_v28 }
 0x6aa   :  { %2473 = vrcp.f32 %v714_v29 }
 0x6ab   :  { %2475 = vpow2.f32 %v2088_v36 }
 0x6af   :  { %v719_v32 = vpop.permute.xlu0 %718 }
 0x6b7   :  { %v2474_v31 = vpop.eup %2473 }
 0x6b8   :  { %v721_v33 = vmul.f32 %v2474_v31, %v719_v32  ;;  %v2476_v37 = vpop.eup %2475  ;;  %v728_v47 = vsub.f32 1.0, %v2474_v31  ;;  %v734_v49 = vmul.f32 %v2474_v31, %v3021_v51 }
 0x6b9   :  { %v832_v38 = vadd.f32 1.0, %v2476_v37 }
 0x6ba   :  { %723 = vrot.lane.b32.xlu0 %v721_v33, %s2774_s30 }
 0x6bb   :  { %2477 = vrcp.f32 %v832_v38 }
 0x6c8   :  { %v2478_v39 = vpop.eup %2477 }
 0x6c9   :  { %v846_v56 = vsub.f32 1.0, %v2478_v39 }
 0x710   :  { %v837_v40 = vpop.permute.xlu1 %836 }
 0x711   :  { %v839_v41 = vmul.f32 %v2478_v39, %v837_v40 }
 0x713   :  { %841 = vrot.lane.b32.xlu1 %v839_v41, %s2774_s30 }
 0x72c   :  { %v724_v42 = vpop.permute.xlu0 %723 }
 0x72d   :  { %v726_v16 = vadd.f32 %v724_v42, %v705_v8 }
 0x72f   :  { %2479 = vtanh.f32 %v726_v16 }
 0x73c   :  { %v2480_v43 = vpop.eup %2479 }
 0x73d   :  { %730 = vrot.lane.b32.xlu0 %v2480_v43, %s2784_s19 }
 0x785   :  { %v842_v44 = vpop.permute.xlu1 %841 }
 0x786   :  { %v844_v45 = vadd.f32 %v842_v44, %v2956_v25  ;;  %v852_v25 = vmul.f32 %v2478_v39, %v3027_v58 }
 0x788   :  { %2481 = vtanh.f32 %v844_v45 }
 0x795   :  { %v2482_v46 = vpop.eup %2481 }
 0x796   :  { %848 = vrot.lane.b32.xlu1 %v2482_v46, %s2784_s19 }
 0x7af   :  { %v731_v48 = vpop.permute.xlu0 %730 }
 0x7b0   :  { %v733_v10 = vmul.f32 %v731_v48, %v728_v47 }
 0x7b2   :  { %v3065_v54 = vadd.f32 %v734_v49, %v733_v10 }
 0x7b4   :  { %v741_v55 = vpack.c.bf16 %v3065_v54, %v3065_v54 }
 0x7b6   :  { %743 = vrot.lane.b32.xlu0 %v741_v55, %s2784_s19 }
 0x808   :  { %v849_v57 = vpop.permute.xlu1 %848 }
 0x809   :  { %v851_v59 = vmul.f32 %v849_v57, %v846_v56 }
 0x80b   :  { %v3071_v61 = vadd.f32 %v852_v25, %v851_v59 }
 0x80d   :  { %v854_v60 = vpack.c.bf16 %v3071_v61, %v3071_v61 }
 0x80f   :  { %856 = vrot.lane.b32.xlu1 %v854_v60, %s2784_s19 }
 0x828   :  { %v744_v62 = vpop.permute.xlu0 %743 }
 0x829   :  { %2269 = vmatmul.mubr.msk.bf16.vlgmr.msra.gmra.mxu0 %vm152_vm1, %v744_v62 }
 0x82a   :  { %2281 = vmatpush3.bf16.msra.mxu0 %v2973_v50  ;;  %2284 = vmatprep.mubr.msk.bf16.mxu0 %vm2783_vm2, %v2782_v4 }
 0x82b   :  { %2282 = vmatprep.subr.bf16.mxu0 %v2782_v4 }
 0x82e   :  { %2283 = vmatpush3.bf16.msra.mxu0 %v2979_v52 }
 0x82f   :  { %2296 = vmatprep.subr.bf16.mxu0 %v2782_v4 }
 0x881   :  { %v857_v58 = vpop.permute.xlu1 %856 }
 0x882   :  { %2285 = vmatmul.mubr.msk.bf16.vlgmr.msra.gmra.mxu0 %vm152_vm1, %v857_v58 }
 0x883   :  { %2297 = vmatpush3.bf16.msra.mxu0 %v2924_v11  ;;  %2300 = vmatprep.mubr.msk.bf16.mxu0 %vm2783_vm2, %v2782_v4 }
 0x884   :  { %2298 = vmatprep.subr.bf16.mxu0 %v2782_v4 }
 0x887   :  { %2299 = vmatpush3.bf16.msra.mxu0 %v2930_v13 }
 0x888   :  { %2312 = vmatprep.subr.bf16.mxu0 %v2782_v4 }
 0x88a   :  { %2301 = vmatmul.mubr.msk.bf16.vlgmr.msra.gmra.mxu0 %vm152_vm1, %v857_v58 }
 0x88b   :  { %2313 = vmatpush3.bf16.msra.mxu0 %v2897_v3  ;;  %2316 = vmatprep.mubr.msk.bf16.mxu0 %vm2783_vm2, %v2782_v4 }
 0x88c   :  { %2314 = vmatprep.subr.bf16.mxu0 %v2782_v4 }
 0x88f   :  { %2315 = vmatpush3.bf16.msra.mxu0 %v2907_v6 }
 0x890   :  { %2328 = vmatprep.subr.bf16.mxu0 %v2782_v4 }
 0x8e9   :  { %v782_v63 = vpop.f32.mrf.mxu0 }
 0x8ea   :  { %v783_v1 = vadd.f32 %v2983_v53, %v782_v63 }
 0x8eb   :  { %v2270_v2 = vpop.f32.mrf.mxu0 }
 0x8ec   :  { %909 = vrot.lane.b32.xlu0 %v783_v1, %s2774_s30 }
 0x8ed   :  { %v785_v5 = vpop.f32.mrf.mxu0 }
 0x8ef   :  { %v2271_v7 = vpop.f32.mrf.mxu0 }
 0x942   :  { %v895_v8 = vpop.f32.mrf.mxu0 }
 0x943   :  { %v896_v9 = vadd.f32 %v3009_v0, %v895_v8 }
 0x944   :  { %v2286_v12 = vpop.f32.mrf.mxu0 }
 0x945   :  { %v901_v14 = vadd.f32 %v896_v9, %v783_v1 }
 0x946   :  { %v898_v15 = vpop.f32.mrf.mxu0 }
 0x947   :  { %v2090_v17 = vmul.f32 -1.442695, %v901_v14 }
 0x948   :  { %v2287_v19 = vpop.f32.mrf.mxu0 }
 0x949   :  { %2483 = vpow2.f32 %v2090_v17 }
 0x94a   :  { %v1013_v21 = vpop.f32.mrf.mxu0 }
 0x94b   :  { %v1014_v23 = vadd.f32 %v2964_v34, %v1013_v21 }
 0x94c   :  { %v2302_v24 = vpop.f32.mrf.mxu0 }
 0x94d   :  { %1027 = vrot.lane.b32.xlu1 %v1014_v23, %s2774_s30  ;;  %v1019_v36 = vadd.f32 %v1014_v23, %v2962_v30 }
 0x94e   :  { %v1016_v27 = vpop.f32.mrf.mxu0 }
 0x94f   :  { %v2093_v37 = vmul.f32 -1.442695, %v1019_v36 }
 0x950   :  { %v2303_v28 = vpop.f32.mrf.mxu0 }
 0x956   :  { %v2484_v29 = vpop.eup %2483 }
 0x957   :  { %v905_v31 = vadd.f32 1.0, %v2484_v29 }
 0x959   :  { %2485 = vrcp.f32 %v905_v31 }
 0x95a   :  { %2487 = vpow2.f32 %v2093_v37 }
 0x95e   :  { %v910_v33 = vpop.permute.xlu0 %909 }
 0x966   :  { %v2486_v32 = vpop.eup %2485 }
 0x967   :  { %v912_v35 = vmul.f32 %v2486_v32, %v910_v33  ;;  %v2488_v38 = vpop.eup %2487  ;;  %v919_v48 = vsub.f32 1.0, %v2486_v32  ;;  %v925_v10 = vmul.f32 %v2486_v32, %v3065_v54 }
 0x968   :  { %v1023_v39 = vadd.f32 1.0, %v2488_v38 }
 0x969   :  { %914 = vrot.lane.b32.xlu0 %v912_v35, %s2774_s30 }
 0x96a   :  { %2489 = vrcp.f32 %v1023_v39 }
 0x977   :  { %v2490_v40 = vpop.eup %2489 }
 0x978   :  { %v1037_v25 = vsub.f32 1.0, %v2490_v40 }
 0x9bf   :  { %v1028_v41 = vpop.permute.xlu1 %1027 }
 0x9c0   :  { %v1030_v42 = vmul.f32 %v2490_v40, %v1028_v41 }
 0x9c2   :  { %1032 = vrot.lane.b32.xlu1 %v1030_v42, %s2774_s30 }
 0x9db   :  { %v915_v16 = vpop.permute.xlu0 %914 }
 0x9dc   :  { %v917_v43 = vadd.f32 %v915_v16, %v896_v9 }
 0x9de   :  { %2491 = vtanh.f32 %v917_v43 }
 0x9eb   :  { %v2492_v44 = vpop.eup %2491 }
 0x9ec   :  { %921 = vrot.lane.b32.xlu0 %v2492_v44, %s2784_s19 }
 0xa34   :  { %v1033_v45 = vpop.permute.xlu1 %1032 }
 0xa35   :  { %v1035_v46 = vadd.f32 %v1033_v45, %v2962_v30  ;;  %v1043_v30 = vmul.f32 %v2490_v40, %v3071_v61 }
 0xa37   :  { %2493 = vtanh.f32 %v1035_v46 }
 0xa44   :  { %v2494_v47 = vpop.eup %2493 }
 0xa45   :  { %1039 = vrot.lane.b32.xlu1 %v2494_v47, %s2784_s19 }
 0xa5e   :  { %v922_v49 = vpop.permute.xlu0 %921 }
 0xa5f   :  { %v924_v55 = vmul.f32 %v922_v49, %v919_v48 }
 0xa61   :  { %v3109_v56 = vadd.f32 %v925_v10, %v924_v55 }
 0xa63   :  { %v932_v57 = vpack.c.bf16 %v3109_v56, %v3109_v56 }
 0xa65   :  { %934 = vrot.lane.b32.xlu0 %v932_v57, %s2784_s19 }
 0xab7   :  { %v1040_v59 = vpop.permute.xlu1 %1039 }
 0xab8   :  { %v1042_v60 = vmul.f32 %v1040_v59, %v1037_v25 }
 0xaba   :  { %v3115_v62 = vadd.f32 %v1043_v30, %v1042_v60 }
 0xabc   :  { %v1045_v58 = vpack.c.bf16 %v3115_v62, %v3115_v62 }
 0xabe   :  { %1047 = vrot.lane.b32.xlu1 %v1045_v58, %s2784_s19 }
 0xad7   :  { %v935_v63 = vpop.permute.xlu0 %934 }
 0xad8   :  { %2293 = vmatmul.mubr.msk.bf16.vlgmr.msra.gmra.mxu1 %vm152_vm1, %v935_v63 }
 0xad9   :  { %2305 = vmatpush3.bf16.msra.mxu1 %v2973_v50  ;;  %2308 = vmatprep.mubr.msk.bf16.mxu1 %vm2783_vm2, %v2782_v4 }
 0xada   :  { %2306 = vmatprep.subr.bf16.mxu1 %v2782_v4 }
 0xadd   :  { %2307 = vmatpush3.bf16.msra.mxu1 %v2979_v52 }
 0xade   :  { %2320 = vmatprep.subr.bf16.mxu1 %v2782_v4 }
 0xb30   :  { %v1048_v61 = vpop.permute.xlu1 %1047 }
 0xb31   :  { %2309 = vmatmul.mubr.msk.bf16.vlgmr.msra.gmra.mxu1 %vm152_vm1, %v1048_v61 }
 0xb32   :  { %2321 = vmatpush3.bf16.msra.mxu1 %v2924_v11  ;;  %2324 = vmatprep.mubr.msk.bf16.mxu1 %vm2783_vm2, %v2782_v4 }
 0xb33   :  { %2322 = vmatprep.subr.bf16.mxu1 %v2782_v4 }
 0xb36   :  { %2323 = vmatpush3.bf16.msra.mxu1 %v2930_v13 }
 0xb37   :  { %2336 = vmatprep.subr.bf16.mxu1 %v2782_v4 }
 0xb39   :  { %2325 = vmatmul.mubr.msk.bf16.vlgmr.msra.gmra.mxu1 %vm152_vm1, %v1048_v61 }
 0xb3a   :  { %2337 = vmatpush3.bf16.msra.mxu1 %v2897_v3  ;;  %2340 = vmatprep.mubr.msk.bf16.mxu1 %vm2783_vm2, %v2782_v4 }
 0xb3b   :  { %2338 = vmatprep.subr.bf16.mxu1 %v2782_v4 }
 0xb3e   :  { %2339 = vmatpush3.bf16.msra.mxu1 %v2907_v6 }
 0xb3f   :  { %2352 = vmatprep.subr.bf16.mxu1 %v2782_v4 }
 0xb98   :  { %v973_v1 = vpop.f32.mrf.mxu1 }
 0xb99   :  { %v974_v2 = vadd.f32 %v2983_v53, %v973_v1 }
 0xb9a   :  { %v2294_v5 = vpop.f32.mrf.mxu1 }
 0xb9b   :  { %1100 = vrot.lane.b32.xlu0 %v974_v2, %s2774_s30 }
 0xb9c   :  { %v976_v7 = vpop.f32.mrf.mxu1 }
 0xb9e   :  { %v2295_v8 = vpop.f32.mrf.mxu1 }
 0xbf1   :  { %v1086_v9 = vpop.f32.mrf.mxu1 }
 0xbf2   :  { %v1087_v12 = vadd.f32 %v3009_v0, %v1086_v9 }
 0xbf3   :  { %v2310_v14 = vpop.f32.mrf.mxu1 }
 0xbf4   :  { %v1092_v15 = vadd.f32 %v1087_v12, %v974_v2 }
 0xbf5   :  { %v1089_v17 = vpop.f32.mrf.mxu1 }
 0xbf6   :  { %v2095_v19 = vmul.f32 -1.442695, %v1092_v15 }
 0xbf7   :  { %v2311_v21 = vpop.f32.mrf.mxu1 }
 0xbf8   :  { %2495 = vpow2.f32 %v2095_v19 }
 0xbf9   :  { %v1204_v23 = vpop.f32.mrf.mxu1 }
 0xbfa   :  { %v1205_v24 = vadd.f32 %v2964_v34, %v1204_v23 }
 0xbfb   :  { %v2326_v27 = vpop.f32.mrf.mxu1 }
 0xbfc   :  { %1218 = vrot.lane.b32.xlu1 %v1205_v24, %s2774_s30  ;;  %v1210_v37 = vadd.f32 %v1205_v24, %v2950_v20 }
 0xbfd   :  { %v1207_v28 = vpop.f32.mrf.mxu1 }
 0xbfe   :  { %v2098_v38 = vmul.f32 -1.442695, %v1210_v37 }
 0xbff   :  { %v2327_v29 = vpop.f32.mrf.mxu1 }
 0xc05   :  { %v2496_v31 = vpop.eup %2495 }
 0xc06   :  { %v1096_v32 = vadd.f32 1.0, %v2496_v31 }
 0xc08   :  { %2497 = vrcp.f32 %v1096_v32 }
 0xc09   :  { %2499 = vpow2.f32 %v2098_v38 }
 0xc0d   :  { %v1101_v35 = vpop.permute.xlu0 %1100 }
 0xc15   :  { %v2498_v33 = vpop.eup %2497 }
 0xc16   :  { %v1103_v36 = vmul.f32 %v2498_v33, %v1101_v35  ;;  %v2500_v39 = vpop.eup %2499  ;;  %v1110_v49 = vsub.f32 1.0, %v2498_v33  ;;  %v1116_v55 = vmul.f32 %v2498_v33, %v3109_v56 }
 0xc17   :  { %v1214_v40 = vadd.f32 1.0, %v2500_v39 }
 0xc18   :  { %1105 = vrot.lane.b32.xlu0 %v1103_v36, %s2774_s30 }
 0xc19   :  { %2501 = vrcp.f32 %v1214_v40 }
 0xc26   :  { %v2502_v41 = vpop.eup %2501 }
 0xc27   :  { %v1228_v30 = vsub.f32 1.0, %v2502_v41 }
 0xc6e   :  { %v1219_v42 = vpop.permute.xlu1 %1218 }
 0xc6f   :  { %v1221_v16 = vmul.f32 %v2502_v41, %v1219_v42 }
 0xc71   :  { %1223 = vrot.lane.b32.xlu1 %v1221_v16, %s2774_s30 }
 0xc8a   :  { %v1106_v43 = vpop.permute.xlu0 %1105 }
 0xc8b   :  { %v1108_v44 = vadd.f32 %v1106_v43, %v1087_v12 }
 0xc8d   :  { %2503 = vtanh.f32 %v1108_v44 }
 0xc9a   :  { %v2504_v45 = vpop.eup %2503 }
 0xc9b   :  { %1112 = vrot.lane.b32.xlu0 %v2504_v45, %s2784_s19 }
 0xce3   :  { %v1224_v46 = vpop.permute.xlu1 %1223 }
 0xce4   :  { %v1226_v47 = vadd.f32 %v1224_v46, %v2950_v20  ;;  %v1234_v20 = vmul.f32 %v2502_v41, %v3115_v62 }
 0xce6   :  { %2505 = vtanh.f32 %v1226_v47 }
 0xcf3   :  { %v2506_v48 = vpop.eup %2505 }
 0xcf4   :  { %1230 = vrot.lane.b32.xlu1 %v2506_v48, %s2784_s19 }
 0xd0d   :  { %v1113_v10 = vpop.permute.xlu0 %1112 }
 0xd0e   :  { %v1115_v57 = vmul.f32 %v1113_v10, %v1110_v49 }
 0xd10   :  { %v3153_v25 = vadd.f32 %v1116_v55, %v1115_v57 }
 0xd12   :  { %v1123_v59 = vpack.c.bf16 %v3153_v25, %v3153_v25 }
 0xd14   :  { %1125 = vrot.lane.b32.xlu0 %v1123_v59, %s2784_s19 }
 0xd66   :  { %v1231_v60 = vpop.permute.xlu1 %1230 }
 0xd67   :  { %v1233_v58 = vmul.f32 %v1231_v60, %v1228_v30 }
 0xd69   :  { %v3159_v63 = vadd.f32 %v1234_v20, %v1233_v58 }
 0xd6b   :  { %v1236_v61 = vpack.c.bf16 %v3159_v63, %v3159_v63 }
 0xd6d   :  { %1238 = vrot.lane.b32.xlu1 %v1236_v61, %s2784_s19 }
 0xd86   :  { %v1126_v1 = vpop.permute.xlu0 %1125 }
 0xd87   :  { %2317 = vmatmul.mubr.msk.bf16.vlgmr.msra.gmra.mxu0 %vm152_vm1, %v1126_v1 }
 0xd88   :  { %2329 = vmatpush3.bf16.msra.mxu0 %v2973_v50  ;;  %2332 = vmatprep.mubr.msk.bf16.mxu0 %vm2783_vm2, %v2782_v4 }
 0xd89   :  { %2330 = vmatprep.subr.bf16.mxu0 %v2782_v4 }
 0xd8c   :  { %2331 = vmatpush3.bf16.msra.mxu0 %v2979_v52 }
 0xd8d   :  { %2344 = vmatprep.subr.bf16.mxu0 %v2782_v4 }
 0xddf   :  { %v1239_v62 = vpop.permute.xlu1 %1238 }
 0xde0   :  { %2333 = vmatmul.mubr.msk.bf16.vlgmr.msra.gmra.mxu0 %vm152_vm1, %v1239_v62 }
 0xde1   :  { %2345 = vmatpush3.bf16.msra.mxu0 %v2924_v11  ;;  %2348 = vmatprep.mubr.msk.bf16.mxu0 %vm2783_vm2, %v2782_v4 }
 0xde2   :  { %2346 = vmatprep.subr.bf16.mxu0 %v2782_v4 }
 0xde5   :  { %2347 = vmatpush3.bf16.msra.mxu0 %v2930_v13 }
 0xde6   :  { %2360 = vmatprep.subr.bf16.mxu0 %v2782_v4 }
 0xde8   :  { %2349 = vmatmul.mubr.msk.bf16.vlgmr.msra.gmra.mxu0 %vm152_vm1, %v1239_v62  ;;  %v2549_v62 = vld [vmem:[#allocation14 + $0x8] sm:$0xff]  }
 0xde9   :  { %2361 = vmatpush3.bf16.msra.mxu0 %v2897_v3  ;;  %2364 = vmatprep.mubr.msk.bf16.mxu0 %vm2783_vm2, %v2782_v4 }
 0xdea   :  { %2362 = vmatprep.subr.bf16.mxu0 %v2782_v4 }
 0xded   :  { %2363 = vmatpush3.bf16.msra.mxu0 %v2907_v6 }
 0xdee   :  { %2376 = vmatprep.subr.bf16.mxu0 %v2782_v4 }
 0xe47   :  { %v1164_v2 = vpop.f32.mrf.mxu0 }
 0xe48   :  { %v1165_v5 = vadd.f32 %v2983_v53, %v1164_v2  ;;  %v2550_v2 = vld [vmem:[#allocation14] sm:$0xff]  }
 0xe49   :  { %v2318_v7 = vpop.f32.mrf.mxu0 }
 0xe4a   :  { %1291 = vrot.lane.b32.xlu0 %v1165_v5, %s2774_s30 }
 0xe4b   :  { %v1167_v8 = vpop.f32.mrf.mxu0 }
 0xe4d   :  { %v2319_v9 = vpop.f32.mrf.mxu0 }
 0xea0   :  { %v1277_v12 = vpop.f32.mrf.mxu0 }
 0xea1   :  { %v1278_v3 = vadd.f32 %v3009_v0, %v1277_v12 }
 0xea2   :  { %v2334_v14 = vpop.f32.mrf.mxu0 }
 0xea3   :  { %v1283_v15 = vadd.f32 %v1278_v3, %v1165_v5 }
 0xea4   :  { %v1280_v17 = vpop.f32.mrf.mxu0 }
 0xea5   :  { %v2100_v19 = vmul.f32 -1.442695, %v1283_v15 }
 0xea6   :  { %v2335_v21 = vpop.f32.mrf.mxu0 }
 0xea7   :  { %2507 = vpow2.f32 %v2100_v19 }
 0xea8   :  { %v1395_v6 = vpop.f32.mrf.mxu0 }
 0xea9   :  { %v1396_v23 = vadd.f32 %v2964_v34, %v1395_v6 }
 0xeaa   :  { %v2350_v24 = vpop.f32.mrf.mxu0 }
 0xeab   :  { %1409 = vrot.lane.b32.xlu1 %v1396_v23, %s2774_s30  ;;  %v1401_v36 = vadd.f32 %v1396_v23, %v2959_v26 }
 0xeac   :  { %v1398_v27 = vpop.f32.mrf.mxu0 }
 0xead   :  { %v2103_v37 = vmul.f32 -1.442695, %v1401_v36 }
 0xeae   :  { %v2351_v28 = vpop.f32.mrf.mxu0 }
 0xeb4   :  { %v2508_v29 = vpop.eup %2507 }
 0xeb5   :  { %v1287_v31 = vadd.f32 1.0, %v2508_v29 }
 0xeb7   :  { %2509 = vrcp.f32 %v1287_v31 }
 0xeb8   :  { %2511 = vpow2.f32 %v2103_v37 }
 0xebc   :  { %v1292_v33 = vpop.permute.xlu0 %1291 }
 0xec4   :  { %v2510_v32 = vpop.eup %2509 }
 0xec5   :  { %v1294_v35 = vmul.f32 %v2510_v32, %v1292_v33  ;;  %v2512_v38 = vpop.eup %2511  ;;  %v1301_v48 = vsub.f32 1.0, %v2510_v32  ;;  %v1307_v10 = vmul.f32 %v2510_v32, %v3153_v25 }
 0xec6   :  { %v1405_v39 = vadd.f32 1.0, %v2512_v38 }
 0xec7   :  { %1296 = vrot.lane.b32.xlu0 %v1294_v35, %s2774_s30 }
 0xec8   :  { %2513 = vrcp.f32 %v1405_v39 }
 0xed5   :  { %v2514_v40 = vpop.eup %2513 }
 0xed6   :  { %v1419_v30 = vsub.f32 1.0, %v2514_v40 }
 0xf1d   :  { %v1410_v41 = vpop.permute.xlu1 %1409 }
 0xf1e   :  { %v1412_v42 = vmul.f32 %v2514_v40, %v1410_v41 }
 0xf20   :  { %1414 = vrot.lane.b32.xlu1 %v1412_v42, %s2774_s30 }
 0xf39   :  { %v1297_v16 = vpop.permute.xlu0 %1296 }
 0xf3a   :  { %v1299_v43 = vadd.f32 %v1297_v16, %v1278_v3 }
 0xf3c   :  { %2515 = vtanh.f32 %v1299_v43 }
 0xf49   :  { %v2516_v44 = vpop.eup %2515 }
 0xf4a   :  { %1303 = vrot.lane.b32.xlu0 %v2516_v44, %s2784_s19 }
 0xf92   :  { %v1415_v45 = vpop.permute.xlu1 %1414 }
 0xf93   :  { %v1417_v46 = vadd.f32 %v1415_v45, %v2959_v26  ;;  %v1425_v26 = vmul.f32 %v2514_v40, %v3159_v63 }
 0xf95   :  { %2517 = vtanh.f32 %v1417_v46 }
 0xfa2   :  { %v2518_v47 = vpop.eup %2517 }
 0xfa3   :  { %1421 = vrot.lane.b32.xlu1 %v2518_v47, %s2784_s19 }
 0xfbc   :  { %v1304_v49 = vpop.permute.xlu0 %1303 }
 0xfbd   :  { %v1306_v55 = vmul.f32 %v1304_v49, %v1301_v48 }
 0xfbf   :  { %v3197_v57 = vadd.f32 %v1307_v10, %v1306_v55 }
 0xfc1   :  { %v1314_v59 = vpack.c.bf16 %v3197_v57, %v3197_v57 }
 0xfc3   :  { %1316 = vrot.lane.b32.xlu0 %v1314_v59, %s2784_s19 }
0x1015   :  { %v1422_v60 = vpop.permute.xlu1 %1421 }
0x1016   :  { %v1424_v20 = vmul.f32 %v1422_v60, %v1419_v30 }
0x1018   :  { %v3203_v58 = vadd.f32 %v1425_v26, %v1424_v20 }
0x101a   :  { %v1427_v61 = vpack.c.bf16 %v3203_v58, %v3203_v58 }
0x101c   :  { %1429 = vrot.lane.b32.xlu1 %v1427_v61, %s2784_s19 }
0x1035   :  { %v1317_v1 = vpop.permute.xlu0 %1316 }
0x1036   :  { %2341 = vmatmul.mubr.msk.bf16.vlgmr.msra.gmra.mxu1 %vm152_vm1, %v1317_v1  ;;  %v2551_v1 = vld [vmem:[#allocation10 + $0x8] sm:$0xff]  }
0x1037   :  { %2353 = vmatpush3.bf16.msra.mxu1 %v2973_v50  ;;  %2356 = vmatprep.mubr.msk.bf16.mxu1 %vm2783_vm2, %v2782_v4 }
0x1038   :  { %2354 = vmatprep.subr.bf16.mxu1 %v2782_v4 }
0x103b   :  { %2355 = vmatpush3.bf16.msra.mxu1 %v2979_v52 }
0x103c   :  { %2368 = vmatprep.subr.bf16.mxu1 %v2782_v4 }
0x108e   :  { %v1430_v63 = vpop.permute.xlu1 %1429 }
0x108f   :  { %2357 = vmatmul.mubr.msk.bf16.vlgmr.msra.gmra.mxu1 %vm152_vm1, %v1430_v63 }
0x1090   :  { %2369 = vmatpush3.bf16.msra.mxu1 %v2924_v11  ;;  %2372 = vmatprep.mubr.msk.bf16.mxu1 %vm2783_vm2, %v2782_v4 }
0x1091   :  { %2370 = vmatprep.subr.bf16.mxu1 %v2782_v4 }
0x1094   :  { %2371 = vmatpush3.bf16.msra.mxu1 %v2930_v13 }
0x1095   :  { %2384 = vmatprep.subr.bf16.mxu1 %v2782_v4 }
0x1097   :  { %2373 = vmatmul.mubr.msk.bf16.vlgmr.msra.gmra.mxu1 %vm152_vm1, %v1430_v63 }
0x1098   :  { %2385 = vmatpush3.bf16.msra.mxu1 %v2549_v62  ;;  %2388 = vmatprep.mubr.msk.bf16.mxu1 %vm2783_vm2, %v2782_v4 }
0x1099   :  { %2386 = vmatprep.subr.bf16.mxu1 %v2782_v4 }
0x109c   :  { %2387 = vmatpush3.bf16.msra.mxu1 %v2550_v2 }
0x109d   :  { %2400 = vmatprep.subr.bf16.mxu1 %v2782_v4 }
0x10f6   :  { %v1355_v11 = vpop.f32.mrf.mxu1 }
0x10f7   :  { %v1356_v5 = vadd.f32 %v2983_v53, %v1355_v11 }
0x10f8   :  { %v2342_v7 = vpop.f32.mrf.mxu1 }
0x10f9   :  { %1482 = vrot.lane.b32.xlu0 %v1356_v5, %s2774_s30 }
0x10fa   :  { %v1358_v13 = vpop.f32.mrf.mxu1 }
0x10fc   :  { %v2343_v8 = vpop.f32.mrf.mxu1 }
0x114f   :  { %v1468_v9 = vpop.f32.mrf.mxu1 }
0x1150   :  { %v1469_v12 = vadd.f32 %v3009_v0, %v1468_v9 }
0x1151   :  { %v2358_v3 = vpop.f32.mrf.mxu1 }
0x1152   :  { %v1474_v14 = vadd.f32 %v1469_v12, %v1356_v5 }
0x1153   :  { %v1471_v15 = vpop.f32.mrf.mxu1 }
0x1154   :  { %v2105_v17 = vmul.f32 -1.442695, %v1474_v14  ;;  %v2553_v15 = vld [vmem:[#allocation13] ss:$0 sm:$0xff] }
0x1155   :  { %v2359_v19 = vpop.f32.mrf.mxu1 }
0x1156   :  { %2519 = vpow2.f32 %v2105_v17 }
0x1157   :  { %v1586_v21 = vpop.f32.mrf.mxu1 }
0x1158   :  { %v1587_v6 = vadd.f32 %v2964_v34, %v1586_v21 }
0x1159   :  { %v2374_v23 = vpop.f32.mrf.mxu1 }
0x115a   :  { %1600 = vrot.lane.b32.xlu1 %v1587_v6, %s2774_s30  ;;  %v1592_v35 = vadd.f32 %v1587_v6, %v2947_v18 }
0x115b   :  { %v1589_v24 = vpop.f32.mrf.mxu1 }
0x115c   :  { %v2108_v36 = vmul.f32 -1.442695, %v1592_v35 }
0x115d   :  { %v2375_v27 = vpop.f32.mrf.mxu1 }
0x1163   :  { %v2520_v28 = vpop.eup %2519 }
0x1164   :  { %v1478_v29 = vadd.f32 1.0, %v2520_v28 }
0x1166   :  { %2521 = vrcp.f32 %v1478_v29 }
0x1167   :  { %2523 = vpow2.f32 %v2108_v36 }
0x116b   :  { %v1483_v32 = vpop.permute.xlu0 %1482 }
0x1173   :  { %v2522_v31 = vpop.eup %2521 }
0x1174   :  { %v1485_v33 = vmul.f32 %v2522_v31, %v1483_v32  ;;  %v2524_v37 = vpop.eup %2523  ;;  %v1492_v46 = vsub.f32 1.0, %v2522_v31  ;;  %v1498_v48 = vmul.f32 %v2522_v31, %v3197_v57 }
0x1175   :  { %v1596_v38 = vadd.f32 1.0, %v2524_v37 }
0x1176   :  { %1487 = vrot.lane.b32.xlu0 %v1485_v33, %s2774_s30 }
0x1177   :  { %2525 = vrcp.f32 %v1596_v38 }
0x1184   :  { %v2526_v34 = vpop.eup %2525 }
0x1185   :  { %v1610_v59 = vsub.f32 1.0, %v2526_v34 }
0x11cc   :  { %v1601_v39 = vpop.permute.xlu1 %1600 }
0x11cd   :  { %v1603_v40 = vmul.f32 %v2526_v34, %v1601_v39 }
0x11cf   :  { %1605 = vrot.lane.b32.xlu1 %v1603_v40, %s2774_s30 }
0x11e8   :  { %v1488_v41 = vpop.permute.xlu0 %1487 }
0x11e9   :  { %v1490_v42 = vadd.f32 %v1488_v41, %v1469_v12 }
0x11eb   :  { %2527 = vtanh.f32 %v1490_v42 }
0x11f8   :  { %v2528_v16 = vpop.eup %2527 }
0x11f9   :  { %1494 = vrot.lane.b32.xlu0 %v2528_v16, %s2784_s19 }
0x1241   :  { %v1606_v43 = vpop.permute.xlu1 %1605 }
0x1242   :  { %v1608_v44 = vadd.f32 %v1606_v43, %v2947_v18  ;;  %v1616_v18 = vmul.f32 %v2526_v34, %v3203_v58 }
0x1244   :  { %2529 = vtanh.f32 %v1608_v44 }
0x1251   :  { %v2530_v45 = vpop.eup %2529 }
0x1252   :  { %1612 = vrot.lane.b32.xlu1 %v2530_v45, %s2784_s19 }
0x126b   :  { %v1495_v47 = vpop.permute.xlu0 %1494 }
0x126c   :  { %v1497_v49 = vmul.f32 %v1495_v47, %v1492_v46 }
0x126e   :  { %v3239_v10 = vadd.f32 %v1498_v48, %v1497_v49 }
0x1270   :  { %v1505_v55 = vpack.c.bf16 %v3239_v10, %v3239_v10 }
0x1272   :  { %1507 = vrot.lane.b32.xlu0 %v1505_v55, %s2784_s19 }
0x12c4   :  { %v1613_v30 = vpop.permute.xlu1 %1612 }
0x12c5   :  { %v1615_v60 = vmul.f32 %v1613_v30, %v1610_v59 }
0x12c7   :  { %v3245_v26 = vadd.f32 %v1616_v18, %v1615_v60  ;;  %v2554_v18 = vld [vmem:[%s3362_s6 + $0x8] sm:$0xff]   ;;  %v2555_v60 = vld [vmem:[%s3362_s6] sm:$0xff]  }
0x12c9   :  { %v1618_v20 = vpack.c.bf16 %v3245_v26, %v3245_v26 }
0x12cb   :  { %1620 = vrot.lane.b32.xlu1 %v1618_v20, %s2784_s19 }
0x12e4   :  { %v1508_v61 = vpop.permute.xlu0 %1507 }
0x12e5   :  { %2365 = vmatmul.mubr.msk.bf16.vlgmr.msra.gmra.mxu0 %vm152_vm1, %v1508_v61  ;;  %v2556_v61 = vld [vmem:[#allocation17] ss:$0 sm:$0xff] }
0x12e6   :  { %2377 = vmatpush3.bf16.msra.mxu0 %v2973_v50  ;;  %2380 = vmatprep.mubr.msk.bf16.mxu0 %vm2783_vm2, %v2782_v4  ;;  %v2552_v50 = vld [vmem:[#allocation10] sm:$0xff]  }
0x12e7   :  { %2378 = vmatprep.subr.bf16.mxu0 %v2782_v4 }
0x12ea   :  { %2379 = vmatpush3.bf16.msra.mxu0 %v2979_v52 }
0x12eb   :  { %2392 = vmatprep.subr.bf16.mxu0 %v2782_v4 }
0x133d   :  { %v1621_v58 = vpop.permute.xlu1 %1620 }
0x133e   :  { %2381 = vmatmul.mubr.msk.bf16.vlgmr.msra.gmra.mxu0 %vm152_vm1, %v1621_v58 }
0x133f   :  { %2393 = vmatpush3.bf16.msra.mxu0 %v2551_v1  ;;  %2396 = vmatprep.mubr.msk.bf16.mxu0 %vm2783_vm2, %v2782_v4 }
0x1340   :  { %2394 = vmatprep.subr.bf16.mxu0 %v2782_v4 }
0x1343   :  { %2395 = vmatpush3.bf16.msra.mxu0 %v2552_v50 }
0x1346   :  { %2397 = vmatmul.mubr.msk.bf16.vlgmr.msra.gmra.mxu0 %vm152_vm1, %v1621_v58 }
0x13a5   :  { %v1546_v63 = vpop.f32.mrf.mxu0 }
0x13a6   :  { %v1547_v62 = vadd.f32 %v2983_v53, %v1546_v63 }
0x13a7   :  { %v2366_v52 = vpop.f32.mrf.mxu0 }
0x13a8   :  { %1673 = vrot.lane.b32.xlu0 %v1547_v62, %s2774_s30  ;;  %v2557_v52 = vld [vmem:[#allocation16] ss:$0 sm:$0xff] }
0x13a9   :  { %v1549_v2 = vpop.f32.mrf.mxu0 }
0x13ab   :  { %v2367_v11 = vpop.f32.mrf.mxu0 }
0x13fe   :  { %v1659_v5 = vpop.f32.mrf.mxu0 }
0x13ff   :  { %v1660_v7 = vadd.f32 %v3009_v0, %v1659_v5 }
0x1400   :  { %v2382_v13 = vpop.f32.mrf.mxu0 }
0x1401   :  { %v1665_v8 = vadd.f32 %v1660_v7, %v1547_v62 }
0x1402   :  { %v1662_v9 = vpop.f32.mrf.mxu0 }
0x1403   :  { %v2110_v12 = vmul.f32 -1.442695, %v1665_v8 }
0x1404   :  { %v2383_v3 = vpop.f32.mrf.mxu0 }
0x1405   :  { %2531 = vpow2.f32 %v2110_v12 }
0x1406   :  { %v1777_v14 = vpop.f32.mrf.mxu0 }
0x1407   :  { %v1778_v17 = vadd.f32 %v2553_v15, %v1777_v14 }
0x1408   :  { %v2398_v19 = vpop.f32.mrf.mxu0 }
0x1409   :  { %1791 = vrot.lane.b32.xlu1 %v1778_v17, %s2774_s30  ;;  %v1783_v28 = vadd.f32 %v1778_v17, %v2953_v22 }
0x140a   :  { %v1780_v53 = vpop.f32.mrf.mxu0 }
0x140b   :  { %v2113_v29 = vmul.f32 -1.442695, %v1783_v28 }
0x140c   :  { %v2399_v21 = vpop.f32.mrf.mxu0 }
0x1412   :  { %v2532_v6 = vpop.eup %2531 }
0x1413   :  { %v1669_v23 = vadd.f32 1.0, %v2532_v6  ;;  %v2452_v6 = vld [vmem:[%s3366_s10] sm:$0xff]  }
0x1415   :  { %2533 = vrcp.f32 %v1669_v23 }
0x1416   :  { %2535 = vpow2.f32 %v2113_v29 }
0x141a   :  { %v1674_v27 = vpop.permute.xlu0 %1673 }
0x1422   :  { %v2534_v24 = vpop.eup %2533 }
0x1423   :  { %v1676_v0 = vmul.f32 %v2534_v24, %v1674_v27  ;;  %v2536_v31 = vpop.eup %2535  ;;  %v1683_v42 = vsub.f32 1.0, %v2534_v24  ;;  %v1689_v43 = vmul.f32 %v2534_v24, %v3239_v10 }
0x1424   :  { %v1787_v32 = vadd.f32 1.0, %v2536_v31 }
0x1425   :  { %1678 = vrot.lane.b32.xlu0 %v1676_v0, %s2774_s30 }
0x1426   :  { %2537 = vrcp.f32 %v1787_v32 }
0x1433   :  { %v2538_v33 = vpop.eup %2537 }
0x1434   :  { %v1801_v47 = vsub.f32 1.0, %v2538_v33 }
0x147b   :  { %v1792_v35 = vpop.permute.xlu1 %1791 }
0x147c   :  { %v1794_v36 = vmul.f32 %v2538_v33, %v1792_v35 }
0x147e   :  { %1796 = vrot.lane.b32.xlu1 %v1794_v36, %s2774_s30 }
0x1497   :  { %v1679_v37 = vpop.permute.xlu0 %1678 }
0x1498   :  { %v1681_v38 = vadd.f32 %v1679_v37, %v1660_v7 }
0x149a   :  { %2539 = vtanh.f32 %v1681_v38 }
0x14a7   :  { %v2540_v34 = vpop.eup %2539 }
0x14a8   :  { %1685 = vrot.lane.b32.xlu0 %v2540_v34, %s2784_s19 }
0x14f0   :  { %v1797_v39 = vpop.permute.xlu1 %1796 }
0x14f1   :  { %v1799_v40 = vadd.f32 %v1797_v39, %v2953_v22  ;;  %v1807_v22 = vmul.f32 %v2538_v33, %v3245_v26 }
0x14f3   :  { %2541 = vtanh.f32 %v1799_v40 }
0x1500   :  { %v2542_v41 = vpop.eup %2541 }
0x1501   :  { %1803 = vrot.lane.b32.xlu1 %v2542_v41, %s2784_s19 }
0x151a   :  { %v1686_v16 = vpop.permute.xlu0 %1685 }
0x151b   :  { %v1688_v44 = vmul.f32 %v1686_v16, %v1683_v42 }
0x151d   :  { %v3273_v45 = vadd.f32 %v1689_v43, %v1688_v44 }
0x151f   :  { %v1696_v46 = vpack.c.bf16 %v3273_v45, %v3273_v45 }
0x1521   :  { %1698 = vrot.lane.b32.xlu0 %v1696_v46, %s2784_s19 }
0x1573   :  { %v1804_v48 = vpop.permute.xlu1 %1803 }
0x1574   :  { %v1806_v49 = vmul.f32 %v1804_v48, %v1801_v47 }
0x1576   :  { %v1808_v55 = vadd.f32 %v1807_v22, %v1806_v49 }
0x1578   :  { %v1809_v59 = vpack.c.bf16 %v1808_v55, %v1808_v55 }
0x157a   :  { %1811 = vrot.lane.b32.xlu1 %v1809_v59, %s2784_s19 }
0x1593   :  { %v1699_v30 = vpop.permute.xlu0 %1698 }
0x1594   :  { %2389 = vmatmul.mubr.msk.bf16.vlgmr.msra.gmra.mxu1 %vm152_vm1, %v1699_v30 }
0x1595   :  { %2401 = vmatpush3.bf16.msra.mxu1 %v2554_v18  ;;  %2404 = vmatprep.mubr.msk.bf16.mxu1 %vm2783_vm2, %v2782_v4 }
0x1596   :  { %2402 = vmatprep.subr.bf16.mxu1 %v2782_v4 }
0x1599   :  { %2403 = vmatpush3.bf16.msra.mxu1 %v2555_v60 }
0x15ec   :  { %v1812_v26 = vpop.permute.xlu1 %1811 }
0x15ed   :  { %2405 = vmatmul.mubr.msk.bf16.vlgmr.msra.gmra.mxu1 %vm152_vm1, %v1812_v26 }
0x1654   :  { %v1737_v20 = vpop.f32.mrf.mxu1 }
0x1655   :  { %v1738_v58 = vadd.f32 %v2556_v61, %v1737_v20 }
0x1656   :  { %v2390_v1 = vpop.f32.mrf.mxu1 }
0x1657   :  { %1864 = vrot.lane.b32.xlu0 %v1738_v58, %s2774_s30 }
0x1658   :  { %v1740_v50 = vpop.f32.mrf.mxu1 }
0x165a   :  { %v2391_v63 = vpop.f32.mrf.mxu1 }
0x16ad   :  { %v1850_v62 = vpop.f32.mrf.mxu1 }
0x16ae   :  { %v1851_v2 = vadd.f32 %v2557_v52, %v1850_v62 }
0x16af   :  { %v2406_v4 = vpop.f32.mrf.mxu1 }
0x16b0   :  { %v1856_v11 = vadd.f32 %v1851_v2, %v1738_v58 }
0x16b1   :  { %v1853_v5 = vpop.f32.mrf.mxu1 }
0x16b2   :  { %v2115_v7 = vmul.f32 -1.442695, %v1856_v11 }
0x16b3   :  { %v2407_v13 = vpop.f32.mrf.mxu1 }
0x16b4   :  { %2543 = vpow2.f32 %v2115_v7 }
0x16c1   :  { %v2544_v8 = vpop.eup %2543 }
0x16c2   :  { %v1860_v9 = vadd.f32 1.0, %v2544_v8 }
0x16c4   :  { %2545 = vrcp.f32 %v1860_v9 }
0x16c9   :  { %v1865_v3 = vpop.permute.xlu0 %1864 }
0x16d1   :  { %v2546_v12 = vpop.eup %2545 }
0x16d2   :  { %v1867_v14 = vmul.f32 %v2546_v12, %v1865_v3  ;;  %v1874_v24 = vsub.f32 1.0, %v2546_v12  ;;  %v1880_v0 = vmul.f32 %v2546_v12, %v3273_v45 }
0x16d4   :  { %1869 = vrot.lane.b32.xlu1 %v1867_v14, %s2774_s30 }
0x16d8   :  { %546 = vrot.lane.b32.xlu1 %v3021_v51, %s2784_s19 }
0x16dc   :  { %928 = vrot.lane.b32.xlu1 %v3109_v56, %s2784_s19  ;;  %v2451_v56 = vld [vmem:[%s3366_s10 + $0x8] sm:$0xff]   ;;  %s2786_s10 = smov [#allocation20]  }
0x16dd   :  { %2408 = vmatprep.subr.bf16.mxu0 %v2451_v56  ;;  %s2036_s2 = sshll.u32 %s2786_s10, 4  ;;  %s2037_s2 = int_to_ptr.vmem [resolvable:$true] %s2036_s2 }
0x16de   :  { %2409 = vmatpush3.bf16.msra.mxu0 %v2451_v56  ;;  %s2718_s26 = scalar_lea.vmem %s2037_s2, 256  ;;  %p2723_p13 = scmp.lt.s32.totalorder %s2037_s2, %s2037_s2 }
0x16df   :  { %2410 = vmatprep.subr.bf16.mxu0 %v2452_v6  ;;  %p2719_p12 = scmp.ne.s32.totalorder %s2037_s2, %s2718_s26  ;;  %p2724_p0 = scmp.lt.s32.totalorder %s2718_s26, %s2718_s26 }
0x16e0   :  { %1310 = vrot.lane.b32.xlu1 %v3197_v57, %s2784_s19 }
0x16e1   :  { %p2725_p1 = por %p2724_p0, %p2723_p13 }
0x16e2   :  { %2411 = vmatpush3.bf16.msra.mxu0 %v2452_v6 }
0x16e3   :  { %p2726_p2 = pnand %p2725_p1, %p2719_p12 }
0x16e4   :  { %1692 = vrot.lane.b32.xlu1 %v3273_v45, %s2784_s19 }
0x16e8   :  { %2008 = vrot.lane.b32.xlu1 %v1808_v55, %s2784_s19 }
0x1746   :  { %v1870_v15 = vpop.permute.xlu1 %1869 }
0x1747   :  { %v1872_v17 = vadd.f32 %v1870_v15, %v1851_v2 }
0x1749   :  { %2547 = vtanh.f32 %v1872_v17 }
0x174a   :  { %v547_v19 = vpop.permute.xlu1 %546 }
0x174b   :  { %549 = vst.msk [vmem:[#allocation4] sm:$0xff] %vm152_vm1, %v547_v19 }
0x174e   :  { %v929_v53 = vpop.permute.xlu1 %928 }
0x174f   :  { %931 = vst.msk [vmem:[#allocation4 + $0x10] sm:$0xff] %vm152_vm1, %v929_v53 }
0x1752   :  { %v1311_v51 = vpop.permute.xlu1 %1310  ;;  %v1887_v33 = vld [vmem:[#allocation4] sm:$0xff] }
0x1753   :  { %1313 = vst.msk [vmem:[#allocation4 + $0x20] sm:$0xff] %vm152_vm1, %v1311_v51 }
0x1756   :  { %v2548_v57 = vpop.eup %2547  ;;  %v1693_v21 = vpop.permute.xlu1 %1692  ;;  %v1889_v35 = vld [vmem:[#allocation4 + $0x10] sm:$0xff] }
0x1757   :  { %1695 = vst.msk [vmem:[#allocation4 + $0x30] sm:$0xff] %vm152_vm1, %v1693_v21  ;;  %1876 = vrot.lane.b32.xlu0 %v2548_v57, %s2784_s19 }
0x175a   :  { %v2009_v23 = vpop.permute.xlu1 %2008  ;;  %v1891_v38 = vld [vmem:[#allocation4 + $0x20] sm:$0xff] }
0x175b   :  { %2011 = vst.msk [vmem:[#allocation2] sm:$0xff] %vm152_vm1, %v2009_v23  ;;  %2016 = vst.msk [vmem:[#allocation20] sm:$0xff] %vm152_vm1, %v2009_v23  ;;  %737 = vrot.lane.b32.xlu0 %v3065_v54, %s2784_s19 }
0x175e   :  { %v1893_v41 = vld [vmem:[#allocation4 + $0x30] sm:$0xff] }
0x175f   :  { %1119 = vrot.lane.b32.xlu0 %v3153_v25, %s2784_s19 }
0x1763   :  { %1501 = vrot.lane.b32.xlu0 %v3239_v10, %s2784_s19 }
0x17c9   :  { %v1877_v27 = vpop.permute.xlu0 %1876 }
0x17ca   :  { %v1879_v28 = vmul.f32 %v1877_v27, %v1874_v24 }
0x17cc   :  { %v1881_v29 = vadd.f32 %v1880_v0, %v1879_v28 }
0x17cd   :  { %v738_v31 = vpop.permute.xlu0 %737 }
0x17ce   :  { %740 = vst.msk [vmem:[#allocation4 + $0x8] sm:$0xff] %vm152_vm1, %v738_v31  ;;  %1883 = vrot.lane.b32.xlu0 %v1881_v29, %s2784_s19 }
0x17d1   :  { %v1120_v32 = vpop.permute.xlu0 %1119 }
0x17d2   :  { %1122 = vst.msk [vmem:[#allocation4 + $0x18] sm:$0xff] %vm152_vm1, %v1120_v32 }
0x17d5   :  { %v1502_v54 = vpop.permute.xlu0 %1501  ;;  %v1888_v25 = vld [vmem:[#allocation4 + $0x8] sm:$0xff] }
0x17d6   :  { %1504 = vst.msk [vmem:[#allocation4 + $0x28] sm:$0xff] %vm152_vm1, %v1502_v54  ;;  %v1895_v10 = vpack.c.bf16 %v1888_v25, %v1887_v33 }
0x17d8   :  { %2412 = vmatprep.mubr.msk.bf16.mxu0 %vm152_vm1, %v1895_v10 }
0x17d9   :  { %v1890_v36 = vld [vmem:[#allocation4 + $0x18] sm:$0xff] }
0x17da   :  { %v1896_v37 = vpack.c.bf16 %v1890_v36, %v1889_v35 }
0x17dc   :  { %2413 = vmatmul.mubr.msk.bf16.vlgmr.msra.gmra.mxu0 %vm152_vm1, %v1896_v37 }
0x17dd   :  { %v1892_v34 = vld [vmem:[#allocation4 + $0x28] sm:$0xff] }
0x17de   :  { %v1897_v39 = vpack.c.bf16 %v1892_v34, %v1891_v38 }
0x17e0   :  { %2416 = vmatprep.mubr.msk.bf16.mxu0 %vm152_vm1, %v1897_v39 }
0x1840   :  { %v1884_v40 = vpop.permute.xlu0 %1883 }
0x1841   :  { %1886 = vst.msk [vmem:[#allocation4 + $0x38] sm:$0xff] %vm152_vm1, %v1884_v40  ;;  %2012 = vst.msk [vmem:[#allocation3] sm:$0xff] %vm152_vm1, %v1884_v40 }
0x1842   :  { %2018 = vst.msk [vmem:[#allocation20 + $0x8] sm:$0xff] %vm152_vm1, %v1884_v40 }
0x1848   :  { %v1894_v42 = vld [vmem:[#allocation4 + $0x38] sm:$0xff] }
0x1849   :  { %v1898_v16 = vpack.c.bf16 %v1894_v42, %v1893_v41 }
0x184b   :  { %2417 = vmatmul.mubr.msk.bf16.gmra.mxu0 %vm152_vm1, %v1898_v16 }
0x184c   :  { %2729 = shalt.err (!%p2726_p2)
}
0x184d   :  { %s2787_s3 = smov 128   ;;  %s2788_s14 = smov 8   ;;  %v2116_v43 = vld [vmem:[%s3367_s11] ss:$0 sm:$0xff] }
0x184e   :  { %2042 = dma.vmem_to_hbm [thread:$0]  %s2037_s2, 256, %s3369_s13, [#allocation21], %s2787_s3, %s2787_s3, %s2788_s14  }
0x184f   :  { %s2789_s11 = smov [#allocation19]  }
0x1850   :  { %s2024_s13 = sshll.u32 %s2789_s11, 4  ;;  %s2025_s13 = int_to_ptr.vmem [resolvable:$true] %s2024_s13 }
0x1851   :  { %s2738_s29 = scalar_lea.vmem %s2025_s13, 1024  ;;  %p2743_p4 = scmp.lt.s32.totalorder %s2025_s13, %s2025_s13 }
0x1852   :  { %p2739_p3 = scmp.ne.s32.totalorder %s2025_s13, %s2738_s29  ;;  %p2744_p5 = scmp.lt.s32.totalorder %s2738_s29, %s2738_s29 }
0x1854   :  { %p2745_p6 = por %p2744_p5, %p2743_p4 }
0x1856   :  { %p2746_p7 = pnand %p2745_p6, %p2739_p3 }
0x189c   :  { %v2414_v44 = vpop.f32.mrf.mxu0 }
0x189d   :  { %v1977_v45 = vadd.f32 %v2414_v44, %v2116_v43 }
0x189e   :  { %v1968_v46 = vpop.f32.mrf.mxu0 }
0x189f   :  { %2001 = vst.msk [vmem:[#allocation19 + $0x10] sm:$0xff] %vm215_vm0, %v1977_v45  ;;  %v1969_v47 = vadd.f32 %v2116_v43, %v1968_v46 }
0x18a0   :  { %v2415_v48 = vpop.f32.mrf.mxu0 }
0x18a1   :  { %1999 = vst.msk [vmem:[#allocation19] sm:$0xff] %vm215_vm0, %v1969_v47  ;;  %v1980_v22 = vadd.f32 %v2415_v48, %v2116_v43 }
0x18a2   :  { %v1971_v49 = vpop.f32.mrf.mxu0 }
0x18a3   :  { %2002 = vst.msk [vmem:[#allocation19 + $0x18] sm:$0xff] %vm215_vm0, %v1980_v22  ;;  %v1972_v55 = vadd.f32 %v2116_v43, %v1971_v49 }
0x18a5   :  { %2000 = vst.msk [vmem:[#allocation19 + $0x8] sm:$0xff] %vm215_vm0, %v1972_v55 }
0x190b   :  { %v2418_v59 = vpop.f32.mrf.mxu0 }
0x190c   :  { %v1993_v30 = vadd.f32 %v2418_v59, %v2116_v43 }
0x190d   :  { %v1984_v18 = vpop.f32.mrf.mxu0 }
0x190e   :  { %2005 = vst.msk [vmem:[#allocation19 + $0x30] sm:$0xff] %vm215_vm0, %v1993_v30  ;;  %v1985_v60 = vadd.f32 %v2116_v43, %v1984_v18 }
0x190f   :  { %v2419_v26 = vpop.f32.mrf.mxu0 }
0x1910   :  { %2003 = vst.msk [vmem:[#allocation19 + $0x20] sm:$0xff] %vm215_vm0, %v1985_v60  ;;  %v1996_v20 = vadd.f32 %v2419_v26, %v2116_v43 }
0x1911   :  { %v1987_v61 = vpop.f32.mrf.mxu0 }
0x1912   :  { %2006 = vst.msk [vmem:[#allocation19 + $0x38] sm:$0xff] %vm215_vm0, %v1996_v20  ;;  %v1988_v58 = vadd.f32 %v2116_v43, %v1987_v61 }
0x1914   :  { %2004 = vst.msk [vmem:[#allocation19 + $0x28] sm:$0xff] %vm215_vm0, %v1988_v58 }
0x1915   :  { %2749 = shalt.err (!%p2746_p7)
}
0x1916   :  { %2030 = dma.vmem_to_hbm [thread:$0]  %s2025_s13, 1024, %s3368_s12, [#allocation7], %s2787_s3, %s2787_s3, %s2788_s14  }
0x1917   :  { %2768 = dma.done.wait [#allocation7], 1024  }
0x1918   :  { %2769 = vsyncadd [#allocation7], 4294966272 }
0x1919   :  { %2770 = dma.done.wait [#allocation21], 256  }
0x191a   :  { %2771 = vsyncadd [#allocation21], 4294967040 }
0x191b   :  { %2049 = vsyncpa [#allocation6], 1 }
0x191c   :  { %2050 = vsyncpa [#allocation9], 1 }
0x191d   :  { %2051 = vsyncpa [#allocation12], 1 }
0x191e   :  { %2052 = vsyncpa [#allocation15], 1 }
0x191f   :  { %2053 = vsyncpa [#allocation18], 1 }
0x1920   :  { %2054 = vsyncpa [#allocation7], 1 }
0x1921   :  { %2055 = vsyncpa [#allocation21], 1 }

// kernel: tpu_custom_call.1
= control target key start
LH: loop header
LB: loop body
LE: loop exit
PB: predicated region body
PF: predicated region fallthrough
CT: control target
= control target key end

     0   :  { %19 = vsyncpa [#allocation6], 0  ;;  %s3356_s0 = inlined_call_operand.hbm [shape: bf16[8,8,16], index: 0, kind: input, shape index: {}]   ;;  %s3357_s1 = inlined_call_operand.vmem [shape: f32[2,8,32], index: 1, kind: input, shape index: {}]   ;;  %s3358_s2 = inlined_call_operand.hbm [shape: bf16[16,96], index: 2, kind: input, shape index: {}]   ;;  %s3359_s3 = inlined_call_operand.hbm [shape: bf16[32,96], index: 3, kind: input, shape index: {}]   ;;  %s3360_s4 = inlined_call_operand.hbm [shape: f32[1,96], index: 4, kind: input, shape index: {}]   ;;  %s3361_s5 = inlined_call_operand.hbm [shape: f32[1,96], index: 5, kind: input, shape index: {}]   ;;  %s3362_s6 = inlined_call_operand.vmem [shape: bf16[32,96], index: 6, kind: input, shape index: {}]   ;;  %s3363_s7 = inlined_call_operand.hbm [shape: bf16[32,96], index: 7, kind: input, shape index: {}]   ;;  %s3364_s8 = inlined_call_operand.hbm [shape: f32[1,96], index: 8, kind: input, shape index: {}]   ;;  %s3365_s9 = inlined_call_operand.hbm [shape: f32[1,96], index: 9, kind: input, shape index: {}]   ;;  %s3366_s10 = inlined_call_operand.vmem [shape: bf16[32,16], index: 10, kind: input, shape index: {}]   ;;  %s3367_s11 = inlined_call_operand.vmem [shape: f32[1,16], index: 11, kind: input, shape index: {}]   ;;  %s3368_s12 = inlined_call_operand.hbm [shape: f32[8,8,16], index: 12, kind: output, shape index: {0}]   ;;  %s3369_s13 = inlined_call_operand.hbm [shape: f32[2,8,32], index: 13, kind: output, shape index: {1}]  }
   0x1   :  { %20 = vsyncpa [#allocation9], 0 }
   0x2   :  { %21 = vsyncpa [#allocation12], 0 }
   0x3   :  { %22 = vsyncpa [#allocation15], 0 }
   0x4   :  { %23 = vsyncpa [#allocation18], 0 }
   0x5   :  { %24 = vsyncpa [#allocation7], 0 }
   0x6   :  { %25 = vsyncpa [#allocation21], 0  ;;  %s2772_s25 = smov [#allocation8]   ;;  %s2773_s27 = smov [#allocation11]  }
   0x7   :  { %s45_s26 = sshll.u32 %s2772_s25, 4  ;;  %s70_s28 = sshll.u32 %s2773_s27, 4  ;;  %s46_s26 = int_to_ptr.vmem [resolvable:$true] %s45_s26  ;;  %s71_s28 = int_to_ptr.vmem [resolvable:$true] %s70_s28 }
   0x8   :  { %s2566_s29 = scalar_lea.vmem %s46_s26, 128  ;;  %p2571_p1 = scmp.lt.s32.totalorder %s46_s26, %s46_s26 }
   0x9   :  { %p2567_p0 = scmp.ne.s32.totalorder %s46_s26, %s2566_s29  ;;  %p2572_p2 = scmp.lt.s32.totalorder %s2566_s29, %s2566_s29 }
   0xb   :  { %p2573_p3 = por %p2572_p2, %p2571_p1 }
   0xd   :  { %p2574_p4 = pnand %p2573_p3, %p2567_p0 }
   0xf   :  { %2577 = shalt.err (!%p2574_p4)
}
  0x10   :  { %s2774_s30 = smov 64   ;;  %s2775_s14 = smov 4  }
  0x11   :  { %51 = dma.hbm_to_vmem [thread:$0]  %s3358_s2, 128, %s46_s26, [#allocation9], %s2774_s30, %s2774_s30, %s2775_s14  }
  0x12   :  { %s2586_s17 = scalar_lea.vmem %s71_s28, 16  ;;  %s2590_s18 = scalar_lea.vmem %s71_s28, 32 }
  0x13   :  { %p2587_p5 = scmp.ne.s32.totalorder %s71_s28, %s2586_s17  ;;  %p2591_p6 = scmp.lt.s32.totalorder %s71_s28, %s71_s28 }
  0x14   :  { %p2592_p7 = scmp.lt.s32.totalorder %s2590_s18, %s2586_s17 }
  0x16   :  { %p2593_p8 = por %p2592_p7, %p2591_p6 }
  0x18   :  { %p2594_p9 = pnand %p2593_p8, %p2587_p5 }
  0x1a   :  { %2597 = shalt.err (!%p2594_p9)
}
  0x1b   :  { %73 = dma.hbm_to_vmem [thread:$0]  %s3360_s4, 16, %s71_s28, [#allocation12]  }
  0x1c   :  { %s2776_s21 = smov [#allocation14]   ;;  %s2777_s23 = smov [#allocation5]  }
  0x1d   :  { %s91_s22 = sshll.u32 %s2776_s21, 4  ;;  %s31_s24 = sshll.u32 %s2777_s23, 4  ;;  %s92_s22 = int_to_ptr.vmem [resolvable:$true] %s91_s22  ;;  %s32_s24 = int_to_ptr.vmem [resolvable:$true] %s31_s24 }
  0x1e   :  { %s2606_s25 = scalar_lea.vmem %s92_s22, 256  ;;  %p2611_p11 = scmp.lt.s32.totalorder %s92_s22, %s92_s22 }
  0x1f   :  { %p2607_p10 = scmp.ne.s32.totalorder %s92_s22, %s2606_s25  ;;  %p2612_p12 = scmp.lt.s32.totalorder %s2606_s25, %s2606_s25 }
  0x21   :  { %p2613_p13 = por %p2612_p12, %p2611_p11 }
  0x23   :  { %p2614_p0 = pnand %p2613_p13, %p2607_p10 }
  0x25   :  { %2617 = shalt.err (!%p2614_p0)
}
  0x26   :  { %97 = dma.hbm_to_vmem [thread:$0]  %s3363_s7, 256, %s92_s22, [#allocation15], %s2774_s30, %s2774_s30, %s2775_s14  }
  0x27   :  { %s2626_s4 = scalar_lea.vmem %s32_s24, 512  ;;  %p2631_p2 = scmp.lt.s32.totalorder %s32_s24, %s32_s24 }
  0x28   :  { %p2627_p1 = scmp.ne.s32.totalorder %s32_s24, %s2626_s4  ;;  %p2632_p3 = scmp.lt.s32.totalorder %s2626_s4, %s2626_s4 }
  0x2a   :  { %p2633_p4 = por %p2632_p3, %p2631_p2 }
  0x2c   :  { %p2634_p5 = pnand %p2633_p4, %p2627_p1 }
  0x2e   :  { %2637 = shalt.err (!%p2634_p5)
}
  0x2f   :  { %37 = dma.hbm_to_vmem [thread:$0]  %s3356_s0, 512, %s32_s24, [#allocation6], %s2774_s30, %s2774_s30, %s2775_s14  }
  0x30   :  { %s2778_s29 = smov [#allocation10]   ;;  %s2779_s16 = smov [#allocation13]  }
  0x31   :  { %s57_s15 = sshll.u32 %s2778_s29, 4  ;;  %s80_s17 = sshll.u32 %s2779_s16, 4  ;;  %s58_s15 = int_to_ptr.vmem [resolvable:$true] %s57_s15  ;;  %s81_s17 = int_to_ptr.vmem [resolvable:$true] %s80_s17 }
  0x32   :  { %s2646_s7 = scalar_lea.vmem %s58_s15, 256  ;;  %p2651_p7 = scmp.lt.s32.totalorder %s58_s15, %s58_s15 }
  0x33   :  { %p2647_p6 = scmp.ne.s32.totalorder %s58_s15, %s2646_s7  ;;  %p2652_p8 = scmp.lt.s32.totalorder %s2646_s7, %s2646_s7 }
  0x35   :  { %p2653_p9 = por %p2652_p8, %p2651_p7 }
  0x37   :  { %p2654_p10 = pnand %p2653_p9, %p2647_p6 }
  0x39   :  { %2657 = shalt.err (!%p2654_p10)
}
  0x3a   :  { %63 = dma.hbm_to_vmem [thread:$0]  %s3359_s3, 256, %s58_s15, [#allocation9], %s2774_s30, %s2774_s30, %s2775_s14  }
  0x3b   :  { %s2666_s0 = scalar_lea.vmem %s81_s17, 16  ;;  %s2670_s20 = scalar_lea.vmem %s81_s17, 32 }
  0x3c   :  { %p2667_p11 = scmp.ne.s32.totalorder %s81_s17, %s2666_s0  ;;  %p2671_p12 = scmp.lt.s32.totalorder %s81_s17, %s81_s17 }
  0x3d   :  { %p2672_p13 = scmp.lt.s32.totalorder %s2670_s20, %s2666_s0 }
  0x3f   :  { %p2673_p0 = por %p2672_p13, %p2671_p12 }
  0x41   :  { %p2674_p1 = pnand %p2673_p0, %p2667_p11 }
  0x43   :  { %2677 = shalt.err (!%p2674_p1)
}
  0x44   :  { %83 = dma.hbm_to_vmem [thread:$0]  %s3361_s5, 16, %s81_s17, [#allocation12]  }
  0x45   :  { %s2780_s23 = smov [#allocation16]   ;;  %s2781_s25 = smov [#allocation17]  }
  0x46   :  { %s104_s24 = sshll.u32 %s2780_s23, 4  ;;  %s114_s2 = sshll.u32 %s2781_s25, 4  ;;  %s105_s24 = int_to_ptr.vmem [resolvable:$true] %s104_s24  ;;  %s115_s2 = int_to_ptr.vmem [resolvable:$true] %s114_s2 }
  0x47   :  { %s2686_s26 = scalar_lea.vmem %s105_s24, 16  ;;  %s2690_s3 = scalar_lea.vmem %s105_s24, 32 }
  0x48   :  { %p2687_p2 = scmp.ne.s32.totalorder %s105_s24, %s2686_s26  ;;  %p2691_p3 = scmp.lt.s32.totalorder %s105_s24, %s105_s24 }
  0x49   :  { %p2692_p4 = scmp.lt.s32.totalorder %s2690_s3, %s2686_s26 }
  0x4b   :  { %p2693_p5 = por %p2692_p4, %p2691_p3 }
  0x4d   :  { %p2694_p6 = pnand %p2693_p5, %p2687_p2 }
  0x4f   :  { %2697 = shalt.err (!%p2694_p6)
}
  0x50   :  { %107 = dma.hbm_to_vmem [thread:$0]  %s3364_s8, 16, %s105_s24, [#allocation15]  }
  0x51   :  { %s2706_s27 = scalar_lea.vmem %s115_s2, 16  ;;  %s2710_s5 = scalar_lea.vmem %s115_s2, 32 }
  0x52   :  { %p2707_p7 = scmp.ne.s32.totalorder %s115_s2, %s2706_s27  ;;  %p2711_p8 = scmp.lt.s32.totalorder %s115_s2, %s115_s2 }
  0x53   :  { %p2712_p9 = scmp.lt.s32.totalorder %s2710_s5, %s2706_s27 }
  0x55   :  { %p2713_p10 = por %p2712_p9, %p2711_p8 }
  0x57   :  { %p2714_p11 = pnand %p2713_p10, %p2707_p7 }
  0x59   :  { %2717 = shalt.err (!%p2714_p11)
}
  0x5a   :  { %117 = dma.hbm_to_vmem [thread:$0]  %s3365_s9, 16, %s115_s2, [#allocation18]  }
  0x5b   :  { %2758 = dma.done.wait [#allocation6], 512  }
  0x5c   :  { %2759 = vsyncadd [#allocation6], 4294966784 }
  0x5d   :  { %2760 = dma.done.wait [#allocation9], 384  }
  0x5e   :  { %2761 = vsyncadd [#allocation9], 4294966912 }
  0x5f   :  { %2762 = dma.done.wait [#allocation12], 32  }
  0x60   :  { %2763 = vsyncadd [#allocation12], 4294967264 }
  0x61   :  { %2764 = dma.done.wait [#allocation15], 272  }
  0x62   :  { %2765 = vsyncadd [#allocation15], 4294967024 }
  0x63   :  { %2766 = dma.done.wait [#allocation18], 16  }
  0x64   :  { %2767 = vsyncadd [#allocation18], 4294967280  ;;  %v2440_v0 = vld [vmem:[#allocation8] sm:$0xff]   ;;  %vm215_vm0 = vcmask 130048   ;;  %v2441_v1 = vld [vmem:[#allocation5 + $0x10] sm:$0xff]   ;;  %vm152_vm1 = vcmask 261120  }
  0x65   :  { %2420 = vmatprep.subr.bf16.mxu1 %v2440_v0  ;;  %v2442_v2 = vld [vmem:[#allocation5 + $0x18] sm:$0xff]   ;;  %2206 = vmatprep.subr.bf16.mxu0 %v2440_v0  ;;  %v2897_v3 = vld [vmem:[#allocation14 + $0x8] sm:$0xff]   ;;  %v2782_v4 = vmov 0.0   ;;  %vm2783_vm2 = vmmov 0   ;;  %v151_v9 = vld [vmem:[%s3357_s1] sm:$0xff]  ;;  %s2784_s19 = smov 96  }
  0x66   :  { %2421 = vmatpush3.bf16.msra.mxu1 %v2440_v0  ;;  %2212 = vmatprep.mubr.msk.bf16.mxu1 %vm215_vm0, %v2441_v1  ;;  %v2056_v5 = vld [vmem:[%s3357_s1 + $0x8] sm:$0xff]  ;;  %v2447_v7 = vld [vmem:[#allocation5] sm:$0xff]   ;;  %v2448_v8 = vld [vmem:[#allocation5 + $0x8] sm:$0xff]   ;;  %153 = vst.msk [vmem:[#allocation2] sm:$0xff] %vm152_vm1, %v151_v9  ;;  %s2785_s0 = smov 32  }
  0x67   :  { %2216 = vmatprep.subr.bf16.mxu1 %v2782_v4  ;;  %2207 = vmatpush3.bf16.msra.mxu0 %v2440_v0  ;;  %156 = vst.msk [vmem:[#allocation3] sm:$0xff] %vm152_vm1, %v2056_v5  ;;  %v2907_v6 = vld [vmem:[#allocation14] sm:$0xff]   ;;  %v2924_v11 = vld [vmem:[#allocation10 + $0x8] sm:$0xff]   ;;  %v2930_v13 = vld [vmem:[#allocation10] sm:$0xff]  }
  0x68   :  { %2232 = vmatprep.subr.bf16.mxu0 %v2782_v4  ;;  %2208 = vmatprep.mubr.msk.bf16.mxu0 %vm215_vm0, %v2447_v7  ;;  %v2944_v16 = vld [vmem:[#allocation11] ss:$0 sm:$0xff]  ;;  %v2964_v34 = vld [vmem:[#allocation13] ss:$0 sm:$0xff]  ;;  %v2979_v52 = vld [vmem:[%s3362_s6] sm:$0xff]  }
  0x69   :  { %2213 = vmatmul.mubr.msk.bf16.vlgmr.msra.gmra.mxu1 %vm215_vm0, %v2442_v2  ;;  %v2973_v50 = vld [vmem:[%s3362_s6 + $0x8] sm:$0xff]   ;;  %v2983_v53 = vld [vmem:[#allocation17] ss:$0 sm:$0xff]  ;;  %v3009_v0 = vld [vmem:[#allocation16] ss:$0 sm:$0xff] }
  0x6a   :  { %2217 = vmatpush3.bf16.msra.mxu1 %v2897_v3  ;;  %2220 = vmatprep.mubr.msk.bf16.mxu1 %vm2783_vm2, %v2782_v4 }
  0x6b   :  { %2218 = vmatprep.subr.bf16.mxu1 %v2782_v4  ;;  %2209 = vmatmul.mubr.msk.bf16.vlgmr.msra.gmra.mxu0 %vm215_vm0, %v2448_v8 }
  0x6c   :  { %2236 = vmatprep.mubr.msk.bf16.mxu0 %vm2783_vm2, %v2782_v4  ;;  %2233 = vmatpush3.bf16.msra.mxu0 %v2973_v50 }
  0x6d   :  { %v293_v14 = vld [vmem:[#allocation2] sm:$0xff]  ;;  %2234 = vmatprep.subr.bf16.mxu0 %v2782_v4 }
  0x6e   :  { %2219 = vmatpush3.bf16.msra.mxu1 %v2907_v6  ;;  %v2922_v10 = vld [vmem:[#allocation3] sm:$0xff]  ;;  %v358_v15 = vpack.c.bf16 %v293_v14, %v293_v14 }
  0x6f   :  { %2224 = vmatprep.subr.bf16.mxu1 %v2782_v4  ;;  %v295_v12 = vpack.c.bf16 %v2922_v10, %v2922_v10 }
  0x70   :  { %2235 = vmatpush3.bf16.msra.mxu0 %v2979_v52 }
  0x71   :  { %2221 = vmatmul.mubr.msk.bf16.vlgmr.msra.gmra.mxu1 %vm152_vm1, %v295_v12  ;;  %2248 = vmatprep.subr.bf16.mxu0 %v2782_v4 }
  0x72   :  { %2225 = vmatpush3.bf16.msra.mxu1 %v2924_v11  ;;  %2228 = vmatprep.mubr.msk.bf16.mxu1 %vm2783_vm2, %v2782_v4 }
  0x73   :  { %2226 = vmatprep.subr.bf16.mxu1 %v2782_v4 }
  0x76   :  { %2227 = vmatpush3.bf16.msra.mxu1 %v2930_v13 }
  0x77   :  { %2240 = vmatprep.subr.bf16.mxu1 %v2782_v4 }
  0x79   :  { %2229 = vmatmul.mubr.msk.bf16.vlgmr.msra.gmra.mxu1 %vm152_vm1, %v358_v15 }
  0x7a   :  { %2241 = vmatpush3.bf16.msra.mxu1 %v2897_v3  ;;  %2244 = vmatprep.mubr.msk.bf16.mxu1 %vm2783_vm2, %v2782_v4 }
  0x7b   :  { %2242 = vmatprep.subr.bf16.mxu1 %v2782_v4 }
  0x7e   :  { %2243 = vmatpush3.bf16.msra.mxu1 %v2907_v6 }
  0x7f   :  { %2256 = vmatprep.subr.bf16.mxu1 %v2782_v4 }
 0x129   :  { %v2214_v17 = vpop.f32.mrf.mxu1 }
 0x12a   :  { %v2947_v18 = vadd.f32 %v2214_v17, %v2944_v16 }
 0x12b   :  { %v278_v19 = vpop.f32.mrf.mxu1  ;;  %v2210_v23 = vpop.f32.mrf.mxu0 }
 0x12c   :  { %v2950_v20 = vadd.f32 %v2944_v16, %v278_v19  ;;  %v2956_v25 = vadd.f32 %v2210_v23, %v2944_v16 }
 0x12d   :  { %v2215_v21 = vpop.f32.mrf.mxu1  ;;  %v262_v27 = vpop.f32.mrf.mxu0 }
 0x12e   :  { %v2953_v22 = vadd.f32 %v2215_v21, %v2944_v16  ;;  %v263_v40 = vadd.f32 %v2944_v16, %v262_v27 }
 0x12f   :  { %v281_v24 = vpop.f32.mrf.mxu1  ;;  %v2211_v28 = vpop.f32.mrf.mxu0 }
 0x130   :  { %v2959_v26 = vadd.f32 %v2944_v16, %v281_v24  ;;  %v2962_v30 = vadd.f32 %v2211_v28, %v2944_v16 }
 0x131   :  { %v352_v29 = vpop.f32.mrf.mxu1  ;;  %v265_v63 = vpop.f32.mrf.mxu0 }
 0x132   :  { %v353_v54 = vadd.f32 %v2983_v53, %v352_v29 }
 0x133   :  { %v2222_v31 = vpop.f32.mrf.mxu1 }
 0x134   :  { %v266_v31 = vadd.f32 %v2944_v16, %v265_v63 }
 0x135   :  { %v355_v32 = vpop.f32.mrf.mxu1 }
 0x137   :  { %v2223_v33 = vpop.f32.mrf.mxu1 }
 0x139   :  { %v414_v35 = vpop.f32.mrf.mxu1 }
 0x13a   :  { %v415_v36 = vadd.f32 %v2964_v34, %v414_v35 }
 0x13b   :  { %v2230_v37 = vpop.f32.mrf.mxu1 }
 0x13c   :  { %428 = vrot.lane.b32.xlu0 %v415_v36, %s2774_s30  ;;  %v420_v41 = vadd.f32 %v415_v36, %v263_v40 }
 0x13d   :  { %v417_v38 = vpop.f32.mrf.mxu1 }
 0x13e   :  { %v2075_v42 = vmul.f32 -1.442695, %v420_v41 }
 0x13f   :  { %v2231_v39 = vpop.f32.mrf.mxu1 }
 0x140   :  { %2453 = vpow2.f32 %v2075_v42 }
 0x14d   :  { %v2454_v43 = vpop.eup %2453 }
 0x14e   :  { %v424_v44 = vadd.f32 1.0, %v2454_v43 }
 0x150   :  { %2455 = vrcp.f32 %v424_v44 }
 0x15d   :  { %v2456_v45 = vpop.eup %2455 }
 0x15e   :  { %v438_v56 = vsub.f32 1.0, %v2456_v45 }
 0x1ae   :  { %v429_v46 = vpop.permute.xlu0 %428 }
 0x1af   :  { %v431_v47 = vmul.f32 %v2456_v45, %v429_v46 }
 0x1b1   :  { %433 = vrot.lane.b32.xlu0 %v431_v47, %s2774_s30 }
 0x223   :  { %v434_v48 = vpop.permute.xlu0 %433 }
 0x224   :  { %v436_v49 = vadd.f32 %v434_v48, %v263_v40 }
 0x226   :  { %2457 = vtanh.f32 %v436_v49 }
 0x233   :  { %v2458_v51 = vpop.eup %2457 }
 0x234   :  { %440 = vrot.lane.b32.xlu1 %v2458_v51, %s2784_s19 }
 0x238   :  { %445 = vrot.lane.b32.xlu1 %v293_v14, %s2785_s0 }
 0x23c   :  { %523 = vrot.lane.b32.xlu1 %v353_v54, %s2774_s30 }
 0x2a6   :  { %v441_v55 = vpop.permute.xlu1 %440 }
 0x2a7   :  { %v443_v58 = vmul.f32 %v441_v55, %v438_v56 }
 0x2aa   :  { %v446_v57 = vpop.permute.xlu1 %445 }
 0x2ab   :  { %v448_v59 = vmul.f32 %v2456_v45, %v446_v57 }
 0x2ad   :  { %v2990_v60 = vadd.f32 %v448_v59, %v443_v58 }
 0x2ae   :  { %v524_v28 = vpop.permute.xlu1 %523 }
 0x2af   :  { %v450_v61 = vpack.c.bf16 %v2990_v60, %v2990_v60 }
 0x2b1   :  { %458 = vrot.lane.b32.xlu0 %v450_v61, %s2784_s19 }
 0x323   :  { %v459_v62 = vpop.permute.xlu0 %458 }
 0x324   :  { %2237 = vmatmul.mubr.msk.bf16.vlgmr.msra.gmra.mxu0 %vm152_vm1, %v459_v62 }
 0x325   :  { %2249 = vmatpush3.bf16.msra.mxu0 %v2924_v11  ;;  %2252 = vmatprep.mubr.msk.bf16.mxu0 %vm2783_vm2, %v2782_v4 }
 0x326   :  { %2250 = vmatprep.subr.bf16.mxu0 %v2782_v4 }
 0x329   :  { %2251 = vmatpush3.bf16.msra.mxu0 %v2930_v13 }
 0x32a   :  { %2264 = vmatprep.subr.bf16.mxu0 %v2782_v4 }
 0x32c   :  { %2253 = vmatmul.mubr.msk.bf16.vlgmr.msra.gmra.mxu0 %vm152_vm1, %v459_v62 }
 0x32d   :  { %2265 = vmatpush3.bf16.msra.mxu0 %v2897_v3  ;;  %2268 = vmatprep.mubr.msk.bf16.mxu0 %vm2783_vm2, %v2782_v4 }
 0x32e   :  { %2266 = vmatprep.subr.bf16.mxu0 %v2782_v4 }
 0x331   :  { %2267 = vmatpush3.bf16.msra.mxu0 %v2907_v6 }
 0x332   :  { %2280 = vmatprep.subr.bf16.mxu0 %v2782_v4 }
 0x3e4   :  { %v509_v1 = vpop.f32.mrf.mxu0 }
 0x3e5   :  { %v510_v2 = vadd.f32 %v3009_v0, %v509_v1 }
 0x3e6   :  { %v2238_v5 = vpop.f32.mrf.mxu0 }
 0x3e7   :  { %v515_v7 = vadd.f32 %v510_v2, %v353_v54 }
 0x3e8   :  { %v512_v8 = vpop.f32.mrf.mxu0 }
 0x3e9   :  { %v2080_v9 = vmul.f32 -1.442695, %v515_v7 }
 0x3ea   :  { %v2239_v12 = vpop.f32.mrf.mxu0 }
 0x3eb   :  { %2459 = vpow2.f32 %v2080_v9 }
 0x3ec   :  { %v631_v14 = vpop.f32.mrf.mxu0 }
 0x3ed   :  { %v632_v15 = vadd.f32 %v2964_v34, %v631_v14 }
 0x3ee   :  { %v2254_v17 = vpop.f32.mrf.mxu0 }
 0x3ef   :  { %645 = vrot.lane.b32.xlu0 %v632_v15, %s2774_s30  ;;  %v637_v32 = vadd.f32 %v632_v15, %v266_v31 }
 0x3f0   :  { %v634_v19 = vpop.f32.mrf.mxu0 }
 0x3f1   :  { %v2083_v33 = vmul.f32 -1.442695, %v637_v32 }
 0x3f2   :  { %v2255_v21 = vpop.f32.mrf.mxu0 }
 0x3f8   :  { %v2460_v23 = vpop.eup %2459 }
 0x3f9   :  { %v519_v24 = vadd.f32 1.0, %v2460_v23 }
 0x3fb   :  { %2461 = vrcp.f32 %v519_v24 }
 0x3fc   :  { %2463 = vpow2.f32 %v2083_v33 }
 0x408   :  { %v2462_v27 = vpop.eup %2461 }
 0x409   :  { %v526_v29 = vmul.f32 %v2462_v27, %v524_v28  ;;  %v2464_v35 = vpop.eup %2463  ;;  %v533_v46 = vsub.f32 1.0, %v2462_v27 }
 0x40a   :  { %v641_v36 = vadd.f32 1.0, %v2464_v35 }
 0x40b   :  { %528 = vrot.lane.b32.xlu1 %v526_v29, %s2774_s30 }
 0x40c   :  { %2465 = vrcp.f32 %v641_v36 }
 0x419   :  { %v2466_v37 = vpop.eup %2465 }
 0x41a   :  { %v655_v54 = vsub.f32 1.0, %v2466_v37  ;;  %v661_v56 = vmul.f32 %v2466_v37, %v2990_v60 }
 0x461   :  { %v646_v38 = vpop.permute.xlu0 %645 }
 0x462   :  { %v648_v39 = vmul.f32 %v2466_v37, %v646_v38 }
 0x464   :  { %650 = vrot.lane.b32.xlu0 %v648_v39, %s2774_s30 }
 0x468   :  { %540 = vrot.lane.b32.xlu0 %v2922_v10, %s2785_s0 }
 0x47d   :  { %v529_v40 = vpop.permute.xlu1 %528 }
 0x47e   :  { %v531_v41 = vadd.f32 %v529_v40, %v510_v2 }
 0x480   :  { %2467 = vtanh.f32 %v531_v41 }
 0x48d   :  { %v2468_v42 = vpop.eup %2467 }
 0x48e   :  { %535 = vrot.lane.b32.xlu1 %v2468_v42, %s2784_s19 }
 0x4d6   :  { %v651_v16 = vpop.permute.xlu0 %650 }
 0x4d7   :  { %v653_v43 = vadd.f32 %v651_v16, %v266_v31 }
 0x4d9   :  { %2469 = vtanh.f32 %v653_v43 }
 0x4da   :  { %v541_v45 = vpop.permute.xlu0 %540 }
 0x4db   :  { %v543_v48 = vmul.f32 %v2462_v27, %v541_v45 }
 0x4e6   :  { %v2470_v44 = vpop.eup %2469 }
 0x4e7   :  { %657 = vrot.lane.b32.xlu1 %v2470_v44, %s2784_s19 }
 0x500   :  { %v536_v47 = vpop.permute.xlu1 %535 }
 0x501   :  { %v538_v49 = vmul.f32 %v536_v47, %v533_v46 }
 0x503   :  { %v3021_v51 = vadd.f32 %v543_v48, %v538_v49 }
 0x505   :  { %v550_v10 = vpack.c.bf16 %v3021_v51, %v3021_v51 }
 0x507   :  { %552 = vrot.lane.b32.xlu0 %v550_v10, %s2784_s19 }
 0x559   :  { %v658_v55 = vpop.permute.xlu1 %657 }
 0x55a   :  { %v660_v57 = vmul.f32 %v658_v55, %v655_v54 }
 0x55c   :  { %v3027_v58 = vadd.f32 %v661_v56, %v660_v57 }
 0x55e   :  { %v663_v59 = vpack.c.bf16 %v3027_v58, %v3027_v58 }
 0x560   :  { %665 = vrot.lane.b32.xlu1 %v663_v59, %s2784_s19 }
 0x579   :  { %v553_v61 = vpop.permute.xlu0 %552 }
 0x57a   :  { %2245 = vmatmul.mubr.msk.bf16.vlgmr.msra.gmra.mxu1 %vm152_vm1, %v553_v61 }
 0x57b   :  { %2257 = vmatpush3.bf16.msra.mxu1 %v2973_v50  ;;  %2260 = vmatprep.mubr.msk.bf16.mxu1 %vm2783_vm2, %v2782_v4 }
 0x57c   :  { %2258 = vmatprep.subr.bf16.mxu1 %v2782_v4 }
 0x57f   :  { %2259 = vmatpush3.bf16.msra.mxu1 %v2979_v52 }
 0x580   :  { %2272 = vmatprep.subr.bf16.mxu1 %v2782_v4 }
 0x5d2   :  { %v666_v60 = vpop.permute.xlu1 %665 }
 0x5d3   :  { %2261 = vmatmul.mubr.msk.bf16.vlgmr.msra.gmra.mxu1 %vm152_vm1, %v666_v60 }
 0x5d4   :  { %2273 = vmatpush3.bf16.msra.mxu1 %v2924_v11  ;;  %2276 = vmatprep.mubr.msk.bf16.mxu1 %vm2783_vm2, %v2782_v4 }
 0x5d5   :  { %2274 = vmatprep.subr.bf16.mxu1 %v2782_v4 }
 0x5d8   :  { %2275 = vmatpush3.bf16.msra.mxu1 %v2930_v13 }
 0x5d9   :  { %2288 = vmatprep.subr.bf16.mxu1 %v2782_v4 }
 0x5db   :  { %2277 = vmatmul.mubr.msk.bf16.vlgmr.msra.gmra.mxu1 %vm152_vm1, %v666_v60 }
 0x5dc   :  { %2289 = vmatpush3.bf16.msra.mxu1 %v2897_v3  ;;  %2292 = vmatprep.mubr.msk.bf16.mxu1 %vm2783_vm2, %v2782_v4 }
 0x5dd   :  { %2290 = vmatprep.subr.bf16.mxu1 %v2782_v4 }
 0x5e0   :  { %2291 = vmatpush3.bf16.msra.mxu1 %v2907_v6 }
 0x5e1   :  { %2304 = vmatprep.subr.bf16.mxu1 %v2782_v4 }
 0x63a   :  { %v591_v62 = vpop.f32.mrf.mxu1 }
 0x63b   :  { %v592_v63 = vadd.f32 %v2983_v53, %v591_v62 }
 0x63c   :  { %v2246_v1 = vpop.f32.mrf.mxu1 }
 0x63d   :  { %718 = vrot.lane.b32.xlu0 %v592_v63, %s2774_s30 }
 0x63e   :  { %v594_v2 = vpop.f32.mrf.mxu1 }
 0x640   :  { %v2247_v5 = vpop.f32.mrf.mxu1 }
 0x693   :  { %v704_v7 = vpop.f32.mrf.mxu1 }
 0x694   :  { %v705_v8 = vadd.f32 %v3009_v0, %v704_v7 }
 0x695   :  { %v2262_v9 = vpop.f32.mrf.mxu1 }
 0x696   :  { %v710_v12 = vadd.f32 %v705_v8, %v592_v63 }
 0x697   :  { %v707_v14 = vpop.f32.mrf.mxu1 }
 0x698   :  { %v2085_v15 = vmul.f32 -1.442695, %v710_v12 }
 0x699   :  { %v2263_v17 = vpop.f32.mrf.mxu1 }
 0x69a   :  { %2471 = vpow2.f32 %v2085_v15 }
 0x69b   :  { %v822_v19 = vpop.f32.mrf.mxu1 }
 0x69c   :  { %v823_v21 = vadd.f32 %v2964_v34, %v822_v19 }
 0x69d   :  { %v2278_v23 = vpop.f32.mrf.mxu1 }
 0x69e   :  { %836 = vrot.lane.b32.xlu1 %v823_v21, %s2774_s30  ;;  %v828_v35 = vadd.f32 %v823_v21, %v2956_v25 }
 0x69f   :  { %v825_v24 = vpop.f32.mrf.mxu1 }
 0x6a0   :  { %v2088_v36 = vmul.f32 -1.442695, %v828_v35 }
 0x6a1   :  { %v2279_v27 = vpop.f32.mrf.mxu1 }
 0x6a7   :  { %v2472_v28 = vpop.eup %2471 }
 0x6a8   :  { %v714_v29 = vadd.f32 1.0, %v2472_v28 }
 0x6aa   :  { %2473 = vrcp.f32 %v714_v29 }
 0x6ab   :  { %2475 = vpow2.f32 %v2088_v36 }
 0x6af   :  { %v719_v32 = vpop.permute.xlu0 %718 }
 0x6b7   :  { %v2474_v31 = vpop.eup %2473 }
 0x6b8   :  { %v721_v33 = vmul.f32 %v2474_v31, %v719_v32  ;;  %v2476_v37 = vpop.eup %2475  ;;  %v728_v47 = vsub.f32 1.0, %v2474_v31  ;;  %v734_v49 = vmul.f32 %v2474_v31, %v3021_v51 }
 0x6b9   :  { %v832_v38 = vadd.f32 1.0, %v2476_v37 }
 0x6ba   :  { %723 = vrot.lane.b32.xlu0 %v721_v33, %s2774_s30 }
 0x6bb   :  { %2477 = vrcp.f32 %v832_v38 }
 0x6c8   :  { %v2478_v39 = vpop.eup %2477 }
 0x6c9   :  { %v846_v56 = vsub.f32 1.0, %v2478_v39 }
 0x710   :  { %v837_v40 = vpop.permute.xlu1 %836 }
 0x711   :  { %v839_v41 = vmul.f32 %v2478_v39, %v837_v40 }
 0x713   :  { %841 = vrot.lane.b32.xlu1 %v839_v41, %s2774_s30 }
 0x72c   :  { %v724_v42 = vpop.permute.xlu0 %723 }
 0x72d   :  { %v726_v16 = vadd.f32 %v724_v42, %v705_v8 }
 0x72f   :  { %2479 = vtanh.f32 %v726_v16 }
 0x73c   :  { %v2480_v43 = vpop.eup %2479 }
 0x73d   :  { %730 = vrot.lane.b32.xlu0 %v2480_v43, %s2784_s19 }
 0x785   :  { %v842_v44 = vpop.permute.xlu1 %841 }
 0x786   :  { %v844_v45 = vadd.f32 %v842_v44, %v2956_v25  ;;  %v852_v25 = vmul.f32 %v2478_v39, %v3027_v58 }
 0x788   :  { %2481 = vtanh.f32 %v844_v45 }
 0x795   :  { %v2482_v46 = vpop.eup %2481 }
 0x796   :  { %848 = vrot.lane.b32.xlu1 %v2482_v46, %s2784_s19 }
 0x7af   :  { %v731_v48 = vpop.permute.xlu0 %730 }
 0x7b0   :  { %v733_v10 = vmul.f32 %v731_v48, %v728_v47 }
 0x7b2   :  { %v3065_v54 = vadd.f32 %v734_v49, %v733_v10 }
 0x7b4   :  { %v741_v55 = vpack.c.bf16 %v3065_v54, %v3065_v54 }
 0x7b6   :  { %743 = vrot.lane.b32.xlu0 %v741_v55, %s2784_s19 }
 0x808   :  { %v849_v57 = vpop.permute.xlu1 %848 }
 0x809   :  { %v851_v59 = vmul.f32 %v849_v57, %v846_v56 }
 0x80b   :  { %v3071_v61 = vadd.f32 %v852_v25, %v851_v59 }
 0x80d   :  { %v854_v60 = vpack.c.bf16 %v3071_v61, %v3071_v61 }
 0x80f   :  { %856 = vrot.lane.b32.xlu1 %v854_v60, %s2784_s19 }
 0x828   :  { %v744_v62 = vpop.permute.xlu0 %743 }
 0x829   :  { %2269 = vmatmul.mubr.msk.bf16.vlgmr.msra.gmra.mxu0 %vm152_vm1, %v744_v62 }
 0x82a   :  { %2281 = vmatpush3.bf16.msra.mxu0 %v2973_v50  ;;  %2284 = vmatprep.mubr.msk.bf16.mxu0 %vm2783_vm2, %v2782_v4 }
 0x82b   :  { %2282 = vmatprep.subr.bf16.mxu0 %v2782_v4 }
 0x82e   :  { %2283 = vmatpush3.bf16.msra.mxu0 %v2979_v52 }
 0x82f   :  { %2296 = vmatprep.subr.bf16.mxu0 %v2782_v4 }
 0x881   :  { %v857_v58 = vpop.permute.xlu1 %856 }
 0x882   :  { %2285 = vmatmul.mubr.msk.bf16.vlgmr.msra.gmra.mxu0 %vm152_vm1, %v857_v58 }
 0x883   :  { %2297 = vmatpush3.bf16.msra.mxu0 %v2924_v11  ;;  %2300 = vmatprep.mubr.msk.bf16.mxu0 %vm2783_vm2, %v2782_v4 }
 0x884   :  { %2298 = vmatprep.subr.bf16.mxu0 %v2782_v4 }
 0x887   :  { %2299 = vmatpush3.bf16.msra.mxu0 %v2930_v13 }
 0x888   :  { %2312 = vmatprep.subr.bf16.mxu0 %v2782_v4 }
 0x88a   :  { %2301 = vmatmul.mubr.msk.bf16.vlgmr.msra.gmra.mxu0 %vm152_vm1, %v857_v58 }
 0x88b   :  { %2313 = vmatpush3.bf16.msra.mxu0 %v2897_v3  ;;  %2316 = vmatprep.mubr.msk.bf16.mxu0 %vm2783_vm2, %v2782_v4 }
 0x88c   :  { %2314 = vmatprep.subr.bf16.mxu0 %v2782_v4 }
 0x88f   :  { %2315 = vmatpush3.bf16.msra.mxu0 %v2907_v6 }
 0x890   :  { %2328 = vmatprep.subr.bf16.mxu0 %v2782_v4 }
 0x8e9   :  { %v782_v63 = vpop.f32.mrf.mxu0 }
 0x8ea   :  { %v783_v1 = vadd.f32 %v2983_v53, %v782_v63 }
 0x8eb   :  { %v2270_v2 = vpop.f32.mrf.mxu0 }
 0x8ec   :  { %909 = vrot.lane.b32.xlu0 %v783_v1, %s2774_s30 }
 0x8ed   :  { %v785_v5 = vpop.f32.mrf.mxu0 }
 0x8ef   :  { %v2271_v7 = vpop.f32.mrf.mxu0 }
 0x942   :  { %v895_v8 = vpop.f32.mrf.mxu0 }
 0x943   :  { %v896_v9 = vadd.f32 %v3009_v0, %v895_v8 }
 0x944   :  { %v2286_v12 = vpop.f32.mrf.mxu0 }
 0x945   :  { %v901_v14 = vadd.f32 %v896_v9, %v783_v1 }
 0x946   :  { %v898_v15 = vpop.f32.mrf.mxu0 }
 0x947   :  { %v2090_v17 = vmul.f32 -1.442695, %v901_v14 }
 0x948   :  { %v2287_v19 = vpop.f32.mrf.mxu0 }
 0x949   :  { %2483 = vpow2.f32 %v2090_v17 }
 0x94a   :  { %v1013_v21 = vpop.f32.mrf.mxu0 }
 0x94b   :  { %v1014_v23 = vadd.f32 %v2964_v34, %v1013_v21 }
 0x94c   :  { %v2302_v24 = vpop.f32.mrf.mxu0 }
 0x94d   :  { %1027 = vrot.lane.b32.xlu1 %v1014_v23, %s2774_s30  ;;  %v1019_v36 = vadd.f32 %v1014_v23, %v2962_v30 }
 0x94e   :  { %v1016_v27 = vpop.f32.mrf.mxu0 }
 0x94f   :  { %v2093_v37 = vmul.f32 -1.442695, %v1019_v36 }
 0x950   :  { %v2303_v28 = vpop.f32.mrf.mxu0 }
 0x956   :  { %v2484_v29 = vpop.eup %2483 }
 0x957   :  { %v905_v31 = vadd.f32 1.0, %v2484_v29 }
 0x959   :  { %2485 = vrcp.f32 %v905_v31 }
 0x95a   :  { %2487 = vpow2.f32 %v2093_v37 }
 0x95e   :  { %v910_v33 = vpop.permute.xlu0 %909 }
 0x966   :  { %v2486_v32 = vpop.eup %2485 }
 0x967   :  { %v912_v35 = vmul.f32 %v2486_v32, %v910_v33  ;;  %v2488_v38 = vpop.eup %2487  ;;  %v919_v48 = vsub.f32 1.0, %v2486_v32  ;;  %v925_v10 = vmul.f32 %v2486_v32, %v3065_v54 }
 0x968   :  { %v1023_v39 = vadd.f32 1.0, %v2488_v38 }
 0x969   :  { %914 = vrot.lane.b32.xlu0 %v912_v35, %s2774_s30 }
 0x96a   :  { %2489 = vrcp.f32 %v1023_v39 }
 0x977   :  { %v2490_v40 = vpop.eup %2489 }
 0x978   :  { %v1037_v25 = vsub.f32 1.0, %v2490_v40 }
 0x9bf   :  { %v1028_v41 = vpop.permute.xlu1 %1027 }
 0x9c0   :  { %v1030_v42 = vmul.f32 %v2490_v40, %v1028_v41 }
 0x9c2   :  { %1032 = vrot.lane.b32.xlu1 %v1030_v42, %s2774_s30 }
 0x9db   :  { %v915_v16 = vpop.permute.xlu0 %914 }
 0x9dc   :  { %v917_v43 = vadd.f32 %v915_v16, %v896_v9 }
 0x9de   :  { %2491 = vtanh.f32 %v917_v43 }
 0x9eb   :  { %v2492_v44 = vpop.eup %2491 }
 0x9ec   :  { %921 = vrot.lane.b32.xlu0 %v2492_v44, %s2784_s19 }
 0xa34   :  { %v1033_v45 = vpop.permute.xlu1 %1032 }
 0xa35   :  { %v1035_v46 = vadd.f32 %v1033_v45, %v2962_v30  ;;  %v1043_v30 = vmul.f32 %v2490_v40, %v3071_v61 }
 0xa37   :  { %2493 = vtanh.f32 %v1035_v46 }
 0xa44   :  { %v2494_v47 = vpop.eup %2493 }
 0xa45   :  { %1039 = vrot.lane.b32.xlu1 %v2494_v47, %s2784_s19 }
 0xa5e   :  { %v922_v49 = vpop.permute.xlu0 %921 }
 0xa5f   :  { %v924_v55 = vmul.f32 %v922_v49, %v919_v48 }
 0xa61   :  { %v3109_v56 = vadd.f32 %v925_v10, %v924_v55 }
 0xa63   :  { %v932_v57 = vpack.c.bf16 %v3109_v56, %v3109_v56 }
 0xa65   :  { %934 = vrot.lane.b32.xlu0 %v932_v57, %s2784_s19 }
 0xab7   :  { %v1040_v59 = vpop.permute.xlu1 %1039 }
 0xab8   :  { %v1042_v60 = vmul.f32 %v1040_v59, %v1037_v25 }
 0xaba   :  { %v3115_v62 = vadd.f32 %v1043_v30, %v1042_v60 }
 0xabc   :  { %v1045_v58 = vpack.c.bf16 %v3115_v62, %v3115_v62 }
 0xabe   :  { %1047 = vrot.lane.b32.xlu1 %v1045_v58, %s2784_s19 }
 0xad7   :  { %v935_v63 = vpop.permute.xlu0 %934 }
 0xad8   :  { %2293 = vmatmul.mubr.msk.bf16.vlgmr.msra.gmra.mxu1 %vm152_vm1, %v935_v63 }
 0xad9   :  { %2305 = vmatpush3.bf16.msra.mxu1 %v2973_v50  ;;  %2308 = vmatprep.mubr.msk.bf16.mxu1 %vm2783_vm2, %v2782_v4 }
 0xada   :  { %2306 = vmatprep.subr.bf16.mxu1 %v2782_v4 }
 0xadd   :  { %2307 = vmatpush3.bf16.msra.mxu1 %v2979_v52 }
 0xade   :  { %2320 = vmatprep.subr.bf16.mxu1 %v2782_v4 }
 0xb30   :  { %v1048_v61 = vpop.permute.xlu1 %1047 }
 0xb31   :  { %2309 = vmatmul.mubr.msk.bf16.vlgmr.msra.gmra.mxu1 %vm152_vm1, %v1048_v61 }
 0xb32   :  { %2321 = vmatpush3.bf16.msra.mxu1 %v2924_v11  ;;  %2324 = vmatprep.mubr.msk.bf16.mxu1 %vm2783_vm2, %v2782_v4 }
 0xb33   :  { %2322 = vmatprep.subr.bf16.mxu1 %v2782_v4 }
 0xb36   :  { %2323 = vmatpush3.bf16.msra.mxu1 %v2930_v13 }
 0xb37   :  { %2336 = vmatprep.subr.bf16.mxu1 %v2782_v4 }
 0xb39   :  { %2325 = vmatmul.mubr.msk.bf16.vlgmr.msra.gmra.mxu1 %vm152_vm1, %v1048_v61 }
 0xb3a   :  { %2337 = vmatpush3.bf16.msra.mxu1 %v2897_v3  ;;  %2340 = vmatprep.mubr.msk.bf16.mxu1 %vm2783_vm2, %v2782_v4 }
 0xb3b   :  { %2338 = vmatprep.subr.bf16.mxu1 %v2782_v4 }
 0xb3e   :  { %2339 = vmatpush3.bf16.msra.mxu1 %v2907_v6 }
 0xb3f   :  { %2352 = vmatprep.subr.bf16.mxu1 %v2782_v4 }
 0xb98   :  { %v973_v1 = vpop.f32.mrf.mxu1 }
 0xb99   :  { %v974_v2 = vadd.f32 %v2983_v53, %v973_v1 }
 0xb9a   :  { %v2294_v5 = vpop.f32.mrf.mxu1 }
 0xb9b   :  { %1100 = vrot.lane.b32.xlu0 %v974_v2, %s2774_s30 }
 0xb9c   :  { %v976_v7 = vpop.f32.mrf.mxu1 }
 0xb9e   :  { %v2295_v8 = vpop.f32.mrf.mxu1 }
 0xbf1   :  { %v1086_v9 = vpop.f32.mrf.mxu1 }
 0xbf2   :  { %v1087_v12 = vadd.f32 %v3009_v0, %v1086_v9 }
 0xbf3   :  { %v2310_v14 = vpop.f32.mrf.mxu1 }
 0xbf4   :  { %v1092_v15 = vadd.f32 %v1087_v12, %v974_v2 }
 0xbf5   :  { %v1089_v17 = vpop.f32.mrf.mxu1 }
 0xbf6   :  { %v2095_v19 = vmul.f32 -1.442695, %v1092_v15 }
 0xbf7   :  { %v2311_v21 = vpop.f32.mrf.mxu1 }
 0xbf8   :  { %2495 = vpow2.f32 %v2095_v19 }
 0xbf9   :  { %v1204_v23 = vpop.f32.mrf.mxu1 }
 0xbfa   :  { %v1205_v24 = vadd.f32 %v2964_v34, %v1204_v23 }
 0xbfb   :  { %v2326_v27 = vpop.f32.mrf.mxu1 }
 0xbfc   :  { %1218 = vrot.lane.b32.xlu1 %v1205_v24, %s2774_s30  ;;  %v1210_v37 = vadd.f32 %v1205_v24, %v2950_v20 }
 0xbfd   :  { %v1207_v28 = vpop.f32.mrf.mxu1 }
 0xbfe   :  { %v2098_v38 = vmul.f32 -1.442695, %v1210_v37 }
 0xbff   :  { %v2327_v29 = vpop.f32.mrf.mxu1 }
 0xc05   :  { %v2496_v31 = vpop.eup %2495 }
 0xc06   :  { %v1096_v32 = vadd.f32 1.0, %v2496_v31 }
 0xc08   :  { %2497 = vrcp.f32 %v1096_v32 }
 0xc09   :  { %2499 = vpow2.f32 %v2098_v38 }
 0xc0d   :  { %v1101_v35 = vpop.permute.xlu0 %1100 }
 0xc15   :  { %v2498_v33 = vpop.eup %2497 }
 0xc16   :  { %v1103_v36 = vmul.f32 %v2498_v33, %v1101_v35  ;;  %v2500_v39 = vpop.eup %2499  ;;  %v1110_v49 = vsub.f32 1.0, %v2498_v33  ;;  %v1116_v55 = vmul.f32 %v2498_v33, %v3109_v56 }
 0xc17   :  { %v1214_v40 = vadd.f32 1.0, %v2500_v39 }
 0xc18   :  { %1105 = vrot.lane.b32.xlu0 %v1103_v36, %s2774_s30 }
 0xc19   :  { %2501 = vrcp.f32 %v1214_v40 }
 0xc26   :  { %v2502_v41 = vpop.eup %2501 }
 0xc27   :  { %v1228_v30 = vsub.f32 1.0, %v2502_v41 }
 0xc6e   :  { %v1219_v42 = vpop.permute.xlu1 %1218 }
 0xc6f   :  { %v1221_v16 = vmul.f32 %v2502_v41, %v1219_v42 }
 0xc71   :  { %1223 = vrot.lane.b32.xlu1 %v1221_v16, %s2774_s30 }
 0xc8a   :  { %v1106_v43 = vpop.permute.xlu0 %1105 }
 0xc8b   :  { %v1108_v44 = vadd.f32 %v1106_v43, %v1087_v12 }
 0xc8d   :  { %2503 = vtanh.f32 %v1108_v44 }
 0xc9a   :  { %v2504_v45 = vpop.eup %2503 }
 0xc9b   :  { %1112 = vrot.lane.b32.xlu0 %v2504_v45, %s2784_s19 }
 0xce3   :  { %v1224_v46 = vpop.permute.xlu1 %1223 }
 0xce4   :  { %v1226_v47 = vadd.f32 %v1224_v46, %v2950_v20  ;;  %v1234_v20 = vmul.f32 %v2502_v41, %v3115_v62 }
 0xce6   :  { %2505 = vtanh.f32 %v1226_v47 }
 0xcf3   :  { %v2506_v48 = vpop.eup %2505 }
 0xcf4   :  { %1230 = vrot.lane.b32.xlu1 %v2506_v48, %s2784_s19 }
 0xd0d   :  { %v1113_v10 = vpop.permute.xlu0 %1112 }
 0xd0e   :  { %v1115_v57 = vmul.f32 %v1113_v10, %v1110_v49 }
 0xd10   :  { %v3153_v25 = vadd.f32 %v1116_v55, %v1115_v57 }
 0xd12   :  { %v1123_v59 = vpack.c.bf16 %v3153_v25, %v3153_v25 }
 0xd14   :  { %1125 = vrot.lane.b32.xlu0 %v1123_v59, %s2784_s19 }
 0xd66   :  { %v1231_v60 = vpop.permute.xlu1 %1230 }
 0xd67   :  { %v1233_v58 = vmul.f32 %v1231_v60, %v1228_v30 }
 0xd69   :  { %v3159_v63 = vadd.f32 %v1234_v20, %v1233_v58 }
 0xd6b   :  { %v1236_v61 = vpack.c.bf16 %v3159_v63, %v3159_v63 }
 0xd6d   :  { %1238 = vrot.lane.b32.xlu1 %v1236_v61, %s2784_s19 }
 0xd86   :  { %v1126_v1 = vpop.permute.xlu0 %1125 }
 0xd87   :  { %2317 = vmatmul.mubr.msk.bf16.vlgmr.msra.gmra.mxu0 %vm152_vm1, %v1126_v1 }
 0xd88   :  { %2329 = vmatpush3.bf16.msra.mxu0 %v2973_v50  ;;  %2332 = vmatprep.mubr.msk.bf16.mxu0 %vm2783_vm2, %v2782_v4 }
 0xd89   :  { %2330 = vmatprep.subr.bf16.mxu0 %v2782_v4 }
 0xd8c   :  { %2331 = vmatpush3.bf16.msra.mxu0 %v2979_v52 }
 0xd8d   :  { %2344 = vmatprep.subr.bf16.mxu0 %v2782_v4 }
 0xddf   :  { %v1239_v62 = vpop.permute.xlu1 %1238 }
 0xde0   :  { %2333 = vmatmul.mubr.msk.bf16.vlgmr.msra.gmra.mxu0 %vm152_vm1, %v1239_v62 }
 0xde1   :  { %2345 = vmatpush3.bf16.msra.mxu0 %v2924_v11  ;;  %2348 = vmatprep.mubr.msk.bf16.mxu0 %vm2783_vm2, %v2782_v4 }
 0xde2   :  { %2346 = vmatprep.subr.bf16.mxu0 %v2782_v4 }
 0xde5   :  { %2347 = vmatpush3.bf16.msra.mxu0 %v2930_v13 }
 0xde6   :  { %2360 = vmatprep.subr.bf16.mxu0 %v2782_v4 }
 0xde8   :  { %2349 = vmatmul.mubr.msk.bf16.vlgmr.msra.gmra.mxu0 %vm152_vm1, %v1239_v62  ;;  %v2549_v62 = vld [vmem:[#allocation14 + $0x8] sm:$0xff]  }
 0xde9   :  { %2361 = vmatpush3.bf16.msra.mxu0 %v2897_v3  ;;  %2364 = vmatprep.mubr.msk.bf16.mxu0 %vm2783_vm2, %v2782_v4 }
 0xdea   :  { %2362 = vmatprep.subr.bf16.mxu0 %v2782_v4 }
 0xded   :  { %2363 = vmatpush3.bf16.msra.mxu0 %v2907_v6 }
 0xdee   :  { %2376 = vmatprep.subr.bf16.mxu0 %v2782_v4 }
 0xe47   :  { %v1164_v2 = vpop.f32.mrf.mxu0 }
 0xe48   :  { %v1165_v5 = vadd.f32 %v2983_v53, %v1164_v2  ;;  %v2550_v2 = vld [vmem:[#allocation14] sm:$0xff]  }
 0xe49   :  { %v2318_v7 = vpop.f32.mrf.mxu0 }
 0xe4a   :  { %1291 = vrot.lane.b32.xlu0 %v1165_v5, %s2774_s30 }
 0xe4b   :  { %v1167_v8 = vpop.f32.mrf.mxu0 }
 0xe4d   :  { %v2319_v9 = vpop.f32.mrf.mxu0 }
 0xea0   :  { %v1277_v12 = vpop.f32.mrf.mxu0 }
 0xea1   :  { %v1278_v3 = vadd.f32 %v3009_v0, %v1277_v12 }
 0xea2   :  { %v2334_v14 = vpop.f32.mrf.mxu0 }
 0xea3   :  { %v1283_v15 = vadd.f32 %v1278_v3, %v1165_v5 }
 0xea4   :  { %v1280_v17 = vpop.f32.mrf.mxu0 }
 0xea5   :  { %v2100_v19 = vmul.f32 -1.442695, %v1283_v15 }
 0xea6   :  { %v2335_v21 = vpop.f32.mrf.mxu0 }
 0xea7   :  { %2507 = vpow2.f32 %v2100_v19 }
 0xea8   :  { %v1395_v6 = vpop.f32.mrf.mxu0 }
 0xea9   :  { %v1396_v23 = vadd.f32 %v2964_v34, %v1395_v6 }
 0xeaa   :  { %v2350_v24 = vpop.f32.mrf.mxu0 }
 0xeab   :  { %1409 = vrot.lane.b32.xlu1 %v1396_v23, %s2774_s30  ;;  %v1401_v36 = vadd.f32 %v1396_v23, %v2959_v26 }
 0xeac   :  { %v1398_v27 = vpop.f32.mrf.mxu0 }
 0xead   :  { %v2103_v37 = vmul.f32 -1.442695, %v1401_v36 }
 0xeae   :  { %v2351_v28 = vpop.f32.mrf.mxu0 }
 0xeb4   :  { %v2508_v29 = vpop.eup %2507 }
 0xeb5   :  { %v1287_v31 = vadd.f32 1.0, %v2508_v29 }
 0xeb7   :  { %2509 = vrcp.f32 %v1287_v31 }
 0xeb8   :  { %2511 = vpow2.f32 %v2103_v37 }
 0xebc   :  { %v1292_v33 = vpop.permute.xlu0 %1291 }
 0xec4   :  { %v2510_v32 = vpop.eup %2509 }
 0xec5   :  { %v1294_v35 = vmul.f32 %v2510_v32, %v1292_v33  ;;  %v2512_v38 = vpop.eup %2511  ;;  %v1301_v48 = vsub.f32 1.0, %v2510_v32  ;;  %v1307_v10 = vmul.f32 %v2510_v32, %v3153_v25 }
 0xec6   :  { %v1405_v39 = vadd.f32 1.0, %v2512_v38 }
 0xec7   :  { %1296 = vrot.lane.b32.xlu0 %v1294_v35, %s2774_s30 }
 0xec8   :  { %2513 = vrcp.f32 %v1405_v39 }
 0xed5   :  { %v2514_v40 = vpop.eup %2513 }
 0xed6   :  { %v1419_v30 = vsub.f32 1.0, %v2514_v40 }
 0xf1d   :  { %v1410_v41 = vpop.permute.xlu1 %1409 }
 0xf1e   :  { %v1412_v42 = vmul.f32 %v2514_v40, %v1410_v41 }
 0xf20   :  { %1414 = vrot.lane.b32.xlu1 %v1412_v42, %s2774_s30 }
 0xf39   :  { %v1297_v16 = vpop.permute.xlu0 %1296 }
 0xf3a   :  { %v1299_v43 = vadd.f32 %v1297_v16, %v1278_v3 }
 0xf3c   :  { %2515 = vtanh.f32 %v1299_v43 }
 0xf49   :  { %v2516_v44 = vpop.eup %2515 }
 0xf4a   :  { %1303 = vrot.lane.b32.xlu0 %v2516_v44, %s2784_s19 }
 0xf92   :  { %v1415_v45 = vpop.permute.xlu1 %1414 }
 0xf93   :  { %v1417_v46 = vadd.f32 %v1415_v45, %v2959_v26  ;;  %v1425_v26 = vmul.f32 %v2514_v40, %v3159_v63 }
 0xf95   :  { %2517 = vtanh.f32 %v1417_v46 }
 0xfa2   :  { %v2518_v47 = vpop.eup %2517 }
 0xfa3   :  { %1421 = vrot.lane.b32.xlu1 %v2518_v47, %s2784_s19 }
 0xfbc   :  { %v1304_v49 = vpop.permute.xlu0 %1303 }
 0xfbd   :  { %v1306_v55 = vmul.f32 %v1304_v49, %v1301_v48 }
 0xfbf   :  { %v3197_v57 = vadd.f32 %v1307_v10, %v1306_v55 }
 0xfc1   :  { %v1314_v59 = vpack.c.bf16 %v3197_v57, %v3197_v57 }
 0xfc3   :  { %1316 = vrot.lane.b32.xlu0 %v1314_v59, %s2784_s19 }
0x1015   :  { %v1422_v60 = vpop.permute.xlu1 %1421 }
0x1016   :  { %v1424_v20 = vmul.f32 %v1422_v60, %v1419_v30 }
0x1018   :  { %v3203_v58 = vadd.f32 %v1425_v26, %v1424_v20 }
0x101a   :  { %v1427_v61 = vpack.c.bf16 %v3203_v58, %v3203_v58 }
0x101c   :  { %1429 = vrot.lane.b32.xlu1 %v1427_v61, %s2784_s19 }
0x1035   :  { %v1317_v1 = vpop.permute.xlu0 %1316 }
0x1036   :  { %2341 = vmatmul.mubr.msk.bf16.vlgmr.msra.gmra.mxu1 %vm152_vm1, %v1317_v1  ;;  %v2551_v1 = vld [vmem:[#allocation10 + $0x8] sm:$0xff]  }
0x1037   :  { %2353 = vmatpush3.bf16.msra.mxu1 %v2973_v50  ;;  %2356 = vmatprep.mubr.msk.bf16.mxu1 %vm2783_vm2, %v2782_v4 }
0x1038   :  { %2354 = vmatprep.subr.bf16.mxu1 %v2782_v4 }
0x103b   :  { %2355 = vmatpush3.bf16.msra.mxu1 %v2979_v52 }
0x103c   :  { %2368 = vmatprep.subr.bf16.mxu1 %v2782_v4 }
0x108e   :  { %v1430_v63 = vpop.permute.xlu1 %1429 }
0x108f   :  { %2357 = vmatmul.mubr.msk.bf16.vlgmr.msra.gmra.mxu1 %vm152_vm1, %v1430_v63 }
0x1090   :  { %2369 = vmatpush3.bf16.msra.mxu1 %v2924_v11  ;;  %2372 = vmatprep.mubr.msk.bf16.mxu1 %vm2783_vm2, %v2782_v4 }
0x1091   :  { %2370 = vmatprep.subr.bf16.mxu1 %v2782_v4 }
0x1094   :  { %2371 = vmatpush3.bf16.msra.mxu1 %v2930_v13 }
0x1095   :  { %2384 = vmatprep.subr.bf16.mxu1 %v2782_v4 }
0x1097   :  { %2373 = vmatmul.mubr.msk.bf16.vlgmr.msra.gmra.mxu1 %vm152_vm1, %v1430_v63 }
0x1098   :  { %2385 = vmatpush3.bf16.msra.mxu1 %v2549_v62  ;;  %2388 = vmatprep.mubr.msk.bf16.mxu1 %vm2783_vm2, %v2782_v4 }
0x1099   :  { %2386 = vmatprep.subr.bf16.mxu1 %v2782_v4 }
0x109c   :  { %2387 = vmatpush3.bf16.msra.mxu1 %v2550_v2 }
0x109d   :  { %2400 = vmatprep.subr.bf16.mxu1 %v2782_v4 }
0x10f6   :  { %v1355_v11 = vpop.f32.mrf.mxu1 }
0x10f7   :  { %v1356_v5 = vadd.f32 %v2983_v53, %v1355_v11 }
0x10f8   :  { %v2342_v7 = vpop.f32.mrf.mxu1 }
0x10f9   :  { %1482 = vrot.lane.b32.xlu0 %v1356_v5, %s2774_s30 }
0x10fa   :  { %v1358_v13 = vpop.f32.mrf.mxu1 }
0x10fc   :  { %v2343_v8 = vpop.f32.mrf.mxu1 }
0x114f   :  { %v1468_v9 = vpop.f32.mrf.mxu1 }
0x1150   :  { %v1469_v12 = vadd.f32 %v3009_v0, %v1468_v9 }
0x1151   :  { %v2358_v3 = vpop.f32.mrf.mxu1 }
0x1152   :  { %v1474_v14 = vadd.f32 %v1469_v12, %v1356_v5 }
0x1153   :  { %v1471_v15 = vpop.f32.mrf.mxu1 }
0x1154   :  { %v2105_v17 = vmul.f32 -1.442695, %v1474_v14  ;;  %v2553_v15 = vld [vmem:[#allocation13] ss:$0 sm:$0xff] }
0x1155   :  { %v2359_v19 = vpop.f32.mrf.mxu1 }
0x1156   :  { %2519 = vpow2.f32 %v2105_v17 }
0x1157   :  { %v1586_v21 = vpop.f32.mrf.mxu1 }
0x1158   :  { %v1587_v6 = vadd.f32 %v2964_v34, %v1586_v21 }
0x1159   :  { %v2374_v23 = vpop.f32.mrf.mxu1 }
0x115a   :  { %1600 = vrot.lane.b32.xlu1 %v1587_v6, %s2774_s30  ;;  %v1592_v35 = vadd.f32 %v1587_v6, %v2947_v18 }
0x115b   :  { %v1589_v24 = vpop.f32.mrf.mxu1 }
0x115c   :  { %v2108_v36 = vmul.f32 -1.442695, %v1592_v35 }
0x115d   :  { %v2375_v27 = vpop.f32.mrf.mxu1 }
0x1163   :  { %v2520_v28 = vpop.eup %2519 }
0x1164   :  { %v1478_v29 = vadd.f32 1.0, %v2520_v28 }
0x1166   :  { %2521 = vrcp.f32 %v1478_v29 }
0x1167   :  { %2523 = vpow2.f32 %v2108_v36 }
0x116b   :  { %v1483_v32 = vpop.permute.xlu0 %1482 }
0x1173   :  { %v2522_v31 = vpop.eup %2521 }
0x1174   :  { %v1485_v33 = vmul.f32 %v2522_v31, %v1483_v32  ;;  %v2524_v37 = vpop.eup %2523  ;;  %v1492_v46 = vsub.f32 1.0, %v2522_v31  ;;  %v1498_v48 = vmul.f32 %v2522_v31, %v3197_v57 }
0x1175   :  { %v1596_v38 = vadd.f32 1.0, %v2524_v37 }
0x1176   :  { %1487 = vrot.lane.b32.xlu0 %v1485_v33, %s2774_s30 }
0x1177   :  { %2525 = vrcp.f32 %v1596_v38 }
0x1184   :  { %v2526_v34 = vpop.eup %2525 }
0x1185   :  { %v1610_v59 = vsub.f32 1.0, %v2526_v34 }
0x11cc   :  { %v1601_v39 = vpop.permute.xlu1 %1600 }
0x11cd   :  { %v1603_v40 = vmul.f32 %v2526_v34, %v1601_v39 }
0x11cf   :  { %1605 = vrot.lane.b32.xlu1 %v1603_v40, %s2774_s30 }
0x11e8   :  { %v1488_v41 = vpop.permute.xlu0 %1487 }
0x11e9   :  { %v1490_v42 = vadd.f32 %v1488_v41, %v1469_v12 }
0x11eb   :  { %2527 = vtanh.f32 %v1490_v42 }
0x11f8   :  { %v2528_v16 = vpop.eup %2527 }
0x11f9   :  { %1494 = vrot.lane.b32.xlu0 %v2528_v16, %s2784_s19 }
0x1241   :  { %v1606_v43 = vpop.permute.xlu1 %1605 }
0x1242   :  { %v1608_v44 = vadd.f32 %v1606_v43, %v2947_v18  ;;  %v1616_v18 = vmul.f32 %v2526_v34, %v3203_v58 }
0x1244   :  { %2529 = vtanh.f32 %v1608_v44 }
0x1251   :  { %v2530_v45 = vpop.eup %2529 }
0x1252   :  { %1612 = vrot.lane.b32.xlu1 %v2530_v45, %s2784_s19 }
0x126b   :  { %v1495_v47 = vpop.permute.xlu0 %1494 }
0x126c   :  { %v1497_v49 = vmul.f32 %v1495_v47, %v1492_v46 }
0x126e   :  { %v3239_v10 = vadd.f32 %v1498_v48, %v1497_v49 }
0x1270   :  { %v1505_v55 = vpack.c.bf16 %v3239_v10, %v3239_v10 }
0x1272   :  { %1507 = vrot.lane.b32.xlu0 %v1505_v55, %s2784_s19 }
0x12c4   :  { %v1613_v30 = vpop.permute.xlu1 %1612 }
0x12c5   :  { %v1615_v60 = vmul.f32 %v1613_v30, %v1610_v59 }
0x12c7   :  { %v3245_v26 = vadd.f32 %v1616_v18, %v1615_v60  ;;  %v2554_v18 = vld [vmem:[%s3362_s6 + $0x8] sm:$0xff]   ;;  %v2555_v60 = vld [vmem:[%s3362_s6] sm:$0xff]  }
0x12c9   :  { %v1618_v20 = vpack.c.bf16 %v3245_v26, %v3245_v26 }
0x12cb   :  { %1620 = vrot.lane.b32.xlu1 %v1618_v20, %s2784_s19 }
0x12e4   :  { %v1508_v61 = vpop.permute.xlu0 %1507 }
0x12e5   :  { %2365 = vmatmul.mubr.msk.bf16.vlgmr.msra.gmra.mxu0 %vm152_vm1, %v1508_v61  ;;  %v2556_v61 = vld [vmem:[#allocation17] ss:$0 sm:$0xff] }
0x12e6   :  { %2377 = vmatpush3.bf16.msra.mxu0 %v2973_v50  ;;  %2380 = vmatprep.mubr.msk.bf16.mxu0 %vm2783_vm2, %v2782_v4  ;;  %v2552_v50 = vld [vmem:[#allocation10] sm:$0xff]  }
0x12e7   :  { %2378 = vmatprep.subr.bf16.mxu0 %v2782_v4 }
0x12ea   :  { %2379 = vmatpush3.bf16.msra.mxu0 %v2979_v52 }
0x12eb   :  { %2392 = vmatprep.subr.bf16.mxu0 %v2782_v4 }
0x133d   :  { %v1621_v58 = vpop.permute.xlu1 %1620 }
0x133e   :  { %2381 = vmatmul.mubr.msk.bf16.vlgmr.msra.gmra.mxu0 %vm152_vm1, %v1621_v58 }
0x133f   :  { %2393 = vmatpush3.bf16.msra.mxu0 %v2551_v1  ;;  %2396 = vmatprep.mubr.msk.bf16.mxu0 %vm2783_vm2, %v2782_v4 }
0x1340   :  { %2394 = vmatprep.subr.bf16.mxu0 %v2782_v4 }
0x1343   :  { %2395 = vmatpush3.bf16.msra.mxu0 %v2552_v50 }
0x1346   :  { %2397 = vmatmul.mubr.msk.bf16.vlgmr.msra.gmra.mxu0 %vm152_vm1, %v1621_v58 }
0x13a5   :  { %v1546_v63 = vpop.f32.mrf.mxu0 }
0x13a6   :  { %v1547_v62 = vadd.f32 %v2983_v53, %v1546_v63 }
0x13a7   :  { %v2366_v52 = vpop.f32.mrf.mxu0 }
0x13a8   :  { %1673 = vrot.lane.b32.xlu0 %v1547_v62, %s2774_s30  ;;  %v2557_v52 = vld [vmem:[#allocation16] ss:$0 sm:$0xff] }
0x13a9   :  { %v1549_v2 = vpop.f32.mrf.mxu0 }
0x13ab   :  { %v2367_v11 = vpop.f32.mrf.mxu0 }
0x13fe   :  { %v1659_v5 = vpop.f32.mrf.mxu0 }
0x13ff   :  { %v1660_v7 = vadd.f32 %v3009_v0, %v1659_v5 }
0x1400   :  { %v2382_v13 = vpop.f32.mrf.mxu0 }
0x1401   :  { %v1665_v8 = vadd.f32 %v1660_v7, %v1547_v62 }
0x1402   :  { %v1662_v9 = vpop.f32.mrf.mxu0 }
0x1403   :  { %v2110_v12 = vmul.f32 -1.442695, %v1665_v8 }
0x1404   :  { %v2383_v3 = vpop.f32.mrf.mxu0 }
0x1405   :  { %2531 = vpow2.f32 %v2110_v12 }
0x1406   :  { %v1777_v14 = vpop.f32.mrf.mxu0 }
0x1407   :  { %v1778_v17 = vadd.f32 %v2553_v15, %v1777_v14 }
0x1408   :  { %v2398_v19 = vpop.f32.mrf.mxu0 }
0x1409   :  { %1791 = vrot.lane.b32.xlu1 %v1778_v17, %s2774_s30  ;;  %v1783_v28 = vadd.f32 %v1778_v17, %v2953_v22 }
0x140a   :  { %v1780_v53 = vpop.f32.mrf.mxu0 }
0x140b   :  { %v2113_v29 = vmul.f32 -1.442695, %v1783_v28 }
0x140c   :  { %v2399_v21 = vpop.f32.mrf.mxu0 }
0x1412   :  { %v2532_v6 = vpop.eup %2531 }
0x1413   :  { %v1669_v23 = vadd.f32 1.0, %v2532_v6  ;;  %v2452_v6 = vld [vmem:[%s3366_s10] sm:$0xff]  }
0x1415   :  { %2533 = vrcp.f32 %v1669_v23 }
0x1416   :  { %2535 = vpow2.f32 %v2113_v29 }
0x141a   :  { %v1674_v27 = vpop.permute.xlu0 %1673 }
0x1422   :  { %v2534_v24 = vpop.eup %2533 }
0x1423   :  { %v1676_v0 = vmul.f32 %v2534_v24, %v1674_v27  ;;  %v2536_v31 = vpop.eup %2535  ;;  %v1683_v42 = vsub.f32 1.0, %v2534_v24  ;;  %v1689_v43 = vmul.f32 %v2534_v24, %v3239_v10 }
0x1424   :  { %v1787_v32 = vadd.f32 1.0, %v2536_v31 }
0x1425   :  { %1678 = vrot.lane.b32.xlu0 %v1676_v0, %s2774_s30 }
0x1426   :  { %2537 = vrcp.f32 %v1787_v32 }
0x1433   :  { %v2538_v33 = vpop.eup %2537 }
0x1434   :  { %v1801_v47 = vsub.f32 1.0, %v2538_v33 }
0x147b   :  { %v1792_v35 = vpop.permute.xlu1 %1791 }
0x147c   :  { %v1794_v36 = vmul.f32 %v2538_v33, %v1792_v35 }
0x147e   :  { %1796 = vrot.lane.b32.xlu1 %v1794_v36, %s2774_s30 }
0x1497   :  { %v1679_v37 = vpop.permute.xlu0 %1678 }
0x1498   :  { %v1681_v38 = vadd.f32 %v1679_v37, %v1660_v7 }
0x149a   :  { %2539 = vtanh.f32 %v1681_v38 }
0x14a7   :  { %v2540_v34 = vpop.eup %2539 }
0x14a8   :  { %1685 = vrot.lane.b32.xlu0 %v2540_v34, %s2784_s19 }
0x14f0   :  { %v1797_v39 = vpop.permute.xlu1 %1796 }
0x14f1   :  { %v1799_v40 = vadd.f32 %v1797_v39, %v2953_v22  ;;  %v1807_v22 = vmul.f32 %v2538_v33, %v3245_v26 }
0x14f3   :  { %2541 = vtanh.f32 %v1799_v40 }
0x1500   :  { %v2542_v41 = vpop.eup %2541 }
0x1501   :  { %1803 = vrot.lane.b32.xlu1 %v2542_v41, %s2784_s19 }
0x151a   :  { %v1686_v16 = vpop.permute.xlu0 %1685 }
0x151b   :  { %v1688_v44 = vmul.f32 %v1686_v16, %v1683_v42 }
0x151d   :  { %v3273_v45 = vadd.f32 %v1689_v43, %v1688_v44 }
0x151f   :  { %v1696_v46 = vpack.c.bf16 %v3273_v45, %v3273_v45 }
0x1521   :  { %1698 = vrot.lane.b32.xlu0 %v1696_v46, %s2784_s19 }
0x1573   :  { %v1804_v48 = vpop.permute.xlu1 %1803 }
0x1574   :  { %v1806_v49 = vmul.f32 %v1804_v48, %v1801_v47 }
0x1576   :  { %v1808_v55 = vadd.f32 %v1807_v22, %v1806_v49 }
0x1578   :  { %v1809_v59 = vpack.c.bf16 %v1808_v55, %v1808_v55 }
0x157a   :  { %1811 = vrot.lane.b32.xlu1 %v1809_v59, %s2784_s19 }
0x1593   :  { %v1699_v30 = vpop.permute.xlu0 %1698 }
0x1594   :  { %2389 = vmatmul.mubr.msk.bf16.vlgmr.msra.gmra.mxu1 %vm152_vm1, %v1699_v30 }
0x1595   :  { %2401 = vmatpush3.bf16.msra.mxu1 %v2554_v18  ;;  %2404 = vmatprep.mubr.msk.bf16.mxu1 %vm2783_vm2, %v2782_v4 }
0x1596   :  { %2402 = vmatprep.subr.bf16.mxu1 %v2782_v4 }
0x1599   :  { %2403 = vmatpush3.bf16.msra.mxu1 %v2555_v60 }
0x15ec   :  { %v1812_v26 = vpop.permute.xlu1 %1811 }
0x15ed   :  { %2405 = vmatmul.mubr.msk.bf16.vlgmr.msra.gmra.mxu1 %vm152_vm1, %v1812_v26 }
0x1654   :  { %v1737_v20 = vpop.f32.mrf.mxu1 }
0x1655   :  { %v1738_v58 = vadd.f32 %v2556_v61, %v1737_v20 }
0x1656   :  { %v2390_v1 = vpop.f32.mrf.mxu1 }
0x1657   :  { %1864 = vrot.lane.b32.xlu0 %v1738_v58, %s2774_s30 }
0x1658   :  { %v1740_v50 = vpop.f32.mrf.mxu1 }
0x165a   :  { %v2391_v63 = vpop.f32.mrf.mxu1 }
0x16ad   :  { %v1850_v62 = vpop.f32.mrf.mxu1 }
0x16ae   :  { %v1851_v2 = vadd.f32 %v2557_v52, %v1850_v62 }
0x16af   :  { %v2406_v4 = vpop.f32.mrf.mxu1 }
0x16b0   :  { %v1856_v11 = vadd.f32 %v1851_v2, %v1738_v58 }
0x16b1   :  { %v1853_v5 = vpop.f32.mrf.mxu1 }
0x16b2   :  { %v2115_v7 = vmul.f32 -1.442695, %v1856_v11 }
0x16b3   :  { %v2407_v13 = vpop.f32.mrf.mxu1 }
0x16b4   :  { %2543 = vpow2.f32 %v2115_v7 }
0x16c1   :  { %v2544_v8 = vpop.eup %2543 }
0x16c2   :  { %v1860_v9 = vadd.f32 1.0, %v2544_v8 }
0x16c4   :  { %2545 = vrcp.f32 %v1860_v9 }
0x16c9   :  { %v1865_v3 = vpop.permute.xlu0 %1864 }
0x16d1   :  { %v2546_v12 = vpop.eup %2545 }
0x16d2   :  { %v1867_v14 = vmul.f32 %v2546_v12, %v1865_v3  ;;  %v1874_v24 = vsub.f32 1.0, %v2546_v12  ;;  %v1880_v0 = vmul.f32 %v2546_v12, %v3273_v45 }
0x16d4   :  { %1869 = vrot.lane.b32.xlu1 %v1867_v14, %s2774_s30 }
0x16d8   :  { %546 = vrot.lane.b32.xlu1 %v3021_v51, %s2784_s19 }
0x16dc   :  { %928 = vrot.lane.b32.xlu1 %v3109_v56, %s2784_s19  ;;  %v2451_v56 = vld [vmem:[%s3366_s10 + $0x8] sm:$0xff]   ;;  %s2786_s10 = smov [#allocation20]  }
0x16dd   :  { %2408 = vmatprep.subr.bf16.mxu0 %v2451_v56  ;;  %s2036_s2 = sshll.u32 %s2786_s10, 4  ;;  %s2037_s2 = int_to_ptr.vmem [resolvable:$true] %s2036_s2 }
0x16de   :  { %2409 = vmatpush3.bf16.msra.mxu0 %v2451_v56  ;;  %s2718_s26 = scalar_lea.vmem %s2037_s2, 256  ;;  %p2723_p13 = scmp.lt.s32.totalorder %s2037_s2, %s2037_s2 }
0x16df   :  { %2410 = vmatprep.subr.bf16.mxu0 %v2452_v6  ;;  %p2719_p12 = scmp.ne.s32.totalorder %s2037_s2, %s2718_s26  ;;  %p2724_p0 = scmp.lt.s32.totalorder %s2718_s26, %s2718_s26 }
0x16e0   :  { %1310 = vrot.lane.b32.xlu1 %v3197_v57, %s2784_s19 }
0x16e1   :  { %p2725_p1 = por %p2724_p0, %p2723_p13 }
0x16e2   :  { %2411 = vmatpush3.bf16.msra.mxu0 %v2452_v6 }
0x16e3   :  { %p2726_p2 = pnand %p2725_p1, %p2719_p12 }
0x16e4   :  { %1692 = vrot.lane.b32.xlu1 %v3273_v45, %s2784_s19 }
0x16e8   :  { %2008 = vrot.lane.b32.xlu1 %v1808_v55, %s2784_s19 }
0x1746   :  { %v1870_v15 = vpop.permute.xlu1 %1869 }
0x1747   :  { %v1872_v17 = vadd.f32 %v1870_v15, %v1851_v2 }
0x1749   :  { %2547 = vtanh.f32 %v1872_v17 }
0x174a   :  { %v547_v19 = vpop.permute.xlu1 %546 }
0x174b   :  { %549 = vst.msk [vmem:[#allocation4] sm:$0xff] %vm152_vm1, %v547_v19 }
0x174e   :  { %v929_v53 = vpop.permute.xlu1 %928 }
0x174f   :  { %931 = vst.msk [vmem:[#allocation4 + $0x10] sm:$0xff] %vm152_vm1, %v929_v53 }
0x1752   :  { %v1311_v51 = vpop.permute.xlu1 %1310  ;;  %v1887_v33 = vld [vmem:[#allocation4] sm:$0xff] }
0x1753   :  { %1313 = vst.msk [vmem:[#allocation4 + $0x20] sm:$0xff] %vm152_vm1, %v1311_v51 }
0x1756   :  { %v2548_v57 = vpop.eup %2547  ;;  %v1693_v21 = vpop.permute.xlu1 %1692  ;;  %v1889_v35 = vld [vmem:[#allocation4 + $0x10] sm:$0xff] }
0x1757   :  { %1695 = vst.msk [vmem:[#allocation4 + $0x30] sm:$0xff] %vm152_vm1, %v1693_v21  ;;  %1876 = vrot.lane.b32.xlu0 %v2548_v57, %s2784_s19 }
0x175a   :  { %v2009_v23 = vpop.permute.xlu1 %2008  ;;  %v1891_v38 = vld [vmem:[#allocation4 + $0x20] sm:$0xff] }
0x175b   :  { %2011 = vst.msk [vmem:[#allocation2] sm:$0xff] %vm152_vm1, %v2009_v23  ;;  %2016 = vst.msk [vmem:[#allocation20] sm:$0xff] %vm152_vm1, %v2009_v23  ;;  %737 = vrot.lane.b32.xlu0 %v3065_v54, %s2784_s19 }
0x175e   :  { %v1893_v41 = vld [vmem:[#allocation4 + $0x30] sm:$0xff] }
0x175f   :  { %1119 = vrot.lane.b32.xlu0 %v3153_v25, %s2784_s19 }
0x1763   :  { %1501 = vrot.lane.b32.xlu0 %v3239_v10, %s2784_s19 }
0x17c9   :  { %v1877_v27 = vpop.permute.xlu0 %1876 }
0x17ca   :  { %v1879_v28 = vmul.f32 %v1877_v27, %v1874_v24 }
0x17cc   :  { %v1881_v29 = vadd.f32 %v1880_v0, %v1879_v28 }
0x17cd   :  { %v738_v31 = vpop.permute.xlu0 %737 }
0x17ce   :  { %740 = vst.msk [vmem:[#allocation4 + $0x8] sm:$0xff] %vm152_vm1, %v738_v31  ;;  %1883 = vrot.lane.b32.xlu0 %v1881_v29, %s2784_s19 }
0x17d1   :  { %v1120_v32 = vpop.permute.xlu0 %1119 }
0x17d2   :  { %1122 = vst.msk [vmem:[#allocation4 + $0x18] sm:$0xff] %vm152_vm1, %v1120_v32 }
0x17d5   :  { %v1502_v54 = vpop.permute.xlu0 %1501  ;;  %v1888_v25 = vld [vmem:[#allocation4 + $0x8] sm:$0xff] }
0x17d6   :  { %1504 = vst.msk [vmem:[#allocation4 + $0x28] sm:$0xff] %vm152_vm1, %v1502_v54  ;;  %v1895_v10 = vpack.c.bf16 %v1888_v25, %v1887_v33 }
0x17d8   :  { %2412 = vmatprep.mubr.msk.bf16.mxu0 %vm152_vm1, %v1895_v10 }
0x17d9   :  { %v1890_v36 = vld [vmem:[#allocation4 + $0x18] sm:$0xff] }
0x17da   :  { %v1896_v37 = vpack.c.bf16 %v1890_v36, %v1889_v35 }
0x17dc   :  { %2413 = vmatmul.mubr.msk.bf16.vlgmr.msra.gmra.mxu0 %vm152_vm1, %v1896_v37 }
0x17dd   :  { %v1892_v34 = vld [vmem:[#allocation4 + $0x28] sm:$0xff] }
0x17de   :  { %v1897_v39 = vpack.c.bf16 %v1892_v34, %v1891_v38 }
0x17e0   :  { %2416 = vmatprep.mubr.msk.bf16.mxu0 %vm152_vm1, %v1897_v39 }
0x1840   :  { %v1884_v40 = vpop.permute.xlu0 %1883 }
0x1841   :  { %1886 = vst.msk [vmem:[#allocation4 + $0x38] sm:$0xff] %vm152_vm1, %v1884_v40  ;;  %2012 = vst.msk [vmem:[#allocation3] sm:$0xff] %vm152_vm1, %v1884_v40 }
0x1842   :  { %2018 = vst.msk [vmem:[#allocation20 + $0x8] sm:$0xff] %vm152_vm1, %v1884_v40 }
0x1848   :  { %v1894_v42 = vld [vmem:[#allocation4 + $0x38] sm:$0xff] }
0x1849   :  { %v1898_v16 = vpack.c.bf16 %v1894_v42, %v1893_v41 }
0x184b   :  { %2417 = vmatmul.mubr.msk.bf16.gmra.mxu0 %vm152_vm1, %v1898_v16 }
0x184c   :  { %2729 = shalt.err (!%p2726_p2)
}
0x184d   :  { %s2787_s3 = smov 128   ;;  %s2788_s14 = smov 8   ;;  %v2116_v43 = vld [vmem:[%s3367_s11] ss:$0 sm:$0xff] }
0x184e   :  { %2042 = dma.vmem_to_hbm [thread:$0]  %s2037_s2, 256, %s3369_s13, [#allocation21], %s2787_s3, %s2787_s3, %s2788_s14  }
0x184f   :  { %s2789_s11 = smov [#allocation19]  }
0x1850   :  { %s2024_s13 = sshll.u32 %s2789_s11, 4  ;;  %s2025_s13 = int_to_ptr.vmem [resolvable:$true] %s2024_s13 }
0x1851   :  { %s2738_s29 = scalar_lea.vmem %s2025_s13, 1024  ;;  %p2743_p4 = scmp.lt.s32.totalorder %s2025_s13, %s2025_s13 }
0x1852   :  { %p2739_p3 = scmp.ne.s32.totalorder %s2025_s13, %s2738_s29  ;;  %p2744_p5 = scmp.lt.s32.totalorder %s2738_s29, %s2738_s29 }
0x1854   :  { %p2745_p6 = por %p2744_p5, %p2743_p4 }
0x1856   :  { %p2746_p7 = pnand %p2745_p6, %p2739_p3 }
0x189c   :  { %v2414_v44 = vpop.f32.mrf.mxu0 }
0x189d   :  { %v1977_v45 = vadd.f32 %v2414_v44, %v2116_v43 }
0x189e   :  { %v1968_v46 = vpop.f32.mrf.mxu0 }
0x189f   :  { %2001 = vst.msk [vmem:[#allocation19 + $0x10] sm:$0xff] %vm215_vm0, %v1977_v45  ;;  %v1969_v47 = vadd.f32 %v2116_v43, %v1968_v46 }
0x18a0   :  { %v2415_v48 = vpop.f32.mrf.mxu0 }
0x18a1   :  { %1999 = vst.msk [vmem:[#allocation19] sm:$0xff] %vm215_vm0, %v1969_v47  ;;  %v1980_v22 = vadd.f32 %v2415_v48, %v2116_v43 }
0x18a2   :  { %v1971_v49 = vpop.f32.mrf.mxu0 }
0x18a3   :  { %2002 = vst.msk [vmem:[#allocation19 + $0x18] sm:$0xff] %vm215_vm0, %v1980_v22  ;;  %v1972_v55 = vadd.f32 %v2116_v43, %v1971_v49 }
0x18a5   :  { %2000 = vst.msk [vmem:[#allocation19 + $0x8] sm:$0xff] %vm215_vm0, %v1972_v55 }
0x190b   :  { %v2418_v59 = vpop.f32.mrf.mxu0 }
0x190c   :  { %v1993_v30 = vadd.f32 %v2418_v59, %v2116_v43 }
0x190d   :  { %v1984_v18 = vpop.f32.mrf.mxu0 }
0x190e   :  { %2005 = vst.msk [vmem:[#allocation19 + $0x30] sm:$0xff] %vm215_vm0, %v1993_v30  ;;  %v1985_v60 = vadd.f32 %v2116_v43, %v1984_v18 }
0x190f   :  { %v2419_v26 = vpop.f32.mrf.mxu0 }
0x1910   :  { %2003 = vst.msk [vmem:[#allocation19 + $0x20] sm:$0xff] %vm215_vm0, %v1985_v60  ;;  %v1996_v20 = vadd.f32 %v2419_v26, %v2116_v43 }
0x1911   :  { %v1987_v61 = vpop.f32.mrf.mxu0 }
0x1912   :  { %2006 = vst.msk [vmem:[#allocation19 + $0x38] sm:$0xff] %vm215_vm0, %v1996_v20  ;;  %v1988_v58 = vadd.f32 %v2116_v43, %v1987_v61 }
0x1914   :  { %2004 = vst.msk [vmem:[#allocation19 + $0x28] sm:$0xff] %vm215_vm0, %v1988_v58 }
0x1915   :  { %2749 = shalt.err (!%p2746_p7)
}
0x1916   :  { %2030 = dma.vmem_to_hbm [thread:$0]  %s2025_s13, 1024, %s3368_s12, [#allocation7], %s2787_s3, %s2787_s3, %s2788_s14  }
0x1917   :  { %2768 = dma.done.wait [#allocation7], 1024  }
0x1918   :  { %2769 = vsyncadd [#allocation7], 4294966272 }
0x1919   :  { %2770 = dma.done.wait [#allocation21], 256  }
0x191a   :  { %2771 = vsyncadd [#allocation21], 4294967040 }
0x191b   :  { %2049 = vsyncpa [#allocation6], 1 }
0x191c   :  { %2050 = vsyncpa [#allocation9], 1 }
0x191d   :  { %2051 = vsyncpa [#allocation12], 1 }
0x191e   :  { %2052 = vsyncpa [#allocation15], 1 }
0x191f   :  { %2053 = vsyncpa [#allocation18], 1 }
0x1920   :  { %2054 = vsyncpa [#allocation7], 1 }
0x1921   :  { %2055 = vsyncpa [#allocation21], 1 }

</bundles_post_ra>
